<compile_context>
chip_gen: v7x
topology: tpu7x:2x2x1
jax: 0.10.0
libtpu: 0.0.40
codegen_flags: <defaults>
</compile_context>

<pallas_src>
import functools
import math

import jax
import jax.numpy as jnp
from jax.experimental import pallas as pl
from jax.experimental.pallas import tpu as pltpu

EPS = 1e-5  # nn.LayerNorm default


def _layernorm(x, w, b):
    mean = jnp.mean(x, axis=-1, keepdims=True)
    var = jnp.mean((x - mean) ** 2, axis=-1, keepdims=True)
    return (x - mean) * jax.lax.rsqrt(var + EPS) * w + b


def encoder_layer_kernel(
    x_ref, mask_ref,
    fc_w_ref, fc_b_ref, n1_w_ref, n1_b_ref,
    ff1_w_ref, ff1_b_ref, ff2_w_ref, ff2_b_ref,
    n2_w_ref, n2_b_ref,
    out_ref,
    act_ref, ctx_ref,
    *, heads, embed_size,
):
    f32 = jnp.float32
    bf16 = jnp.bfloat16
    head_dim = embed_size // heads
    inv_sqrt_e = 1.0 / math.sqrt(embed_size)
    layer = pl.program_id(1)

    # Layer 0 loads the embeddings; later layers reuse the VMEM-resident carry.
    @pl.when(layer == 0)
    def _():
        act_ref[...] = x_ref[0]

    x = act_ref[...]                     # (S, E) f32 residual (value==key==query)
    xq = x * inv_sqrt_e                  # 1/sqrt(E) folded into the query operand
    mask_add = mask_ref[0]               # (1, S) additive key-padding mask

    # --- multi-head self attention -------------------------------------------
    # heads is small & static: unrolled per head, rank-2 ops only.  Each head's
    # context is stored at its lane offset so fc_out sees one contiguous (S, E)
    # operand and runs as a single K=E matmul.
    for h in range(heads):
        lo = h * head_dim
        kh = x[:, lo:lo + head_dim].astype(bf16)    # (S, D) keys == values
        qh = xq[:, lo:lo + head_dim].astype(bf16)   # (S, D) pre-scaled queries
        energy = jnp.einsum("qd,kd->qk", qh, kh, preferred_element_type=f32)
        logits = energy + mask_add                  # additive mask, no select
        m = jnp.max(logits, axis=-1, keepdims=True)
        p = jnp.exp(logits - m)
        denom = jnp.sum(p, axis=-1, keepdims=True)
        attn = p * pl.reciprocal(denom, approx=True)        # EUP, not VPU divide
        ctx_ref[:, lo:lo + head_dim] = jnp.dot(
            attn.astype(bf16), kh, preferred_element_type=f32)

    # fc_out: one full-depth (K = E) MXU contraction.
    attn_out = jnp.dot(ctx_ref[...].astype(bf16), fc_w_ref[0],
                       preferred_element_type=f32) + fc_b_ref[0]

    # --- residual + layernorm 1 (f32) ---
    x1 = _layernorm(attn_out + x, n1_w_ref[0], n1_b_ref[0])

    # --- feed forward: Linear -> ReLU -> Linear (bf16 matmuls, f32 accum) ---
    h1 = jnp.dot(x1.astype(bf16), ff1_w_ref[0],
                 preferred_element_type=f32) + ff1_b_ref[0]
    h1 = jnp.maximum(h1, 0.0)
    ff = jnp.dot(h1.astype(bf16), ff2_w_ref[0],
                 preferred_element_type=f32) + ff2_b_ref[0]

    # --- residual + layernorm 2; update the layer carry and the output block ---
    y = _layernorm(ff + x1, n2_w_ref[0], n2_b_ref[0])
    act_ref[...] = y
    out_ref[0] = y


def encoder_stack(x, mask_keep, p, *, heads):
    """x: (N, S, E) f32 embeddings; mask_keep: (N, S) 0/1; p: dict of (L, ...) stacked params."""
    N, S, E = x.shape
    L, _, FE = p["ff1_w"].shape
    inv_sqrt_e = 1.0 / math.sqrt(E)

    # Additive key-padding mask.  Includes the 1/sqrt(E) factor so it reproduces
    # the reference's mask-before-scale fill of -1e20.
    mask_add = (mask_keep.astype(jnp.float32) - 1.0)[:, None, :] * (1e20 * inv_sqrt_e)

    fc_w = p["fc_w"].astype(jnp.bfloat16)    # (L, E, E)
    ff1_w = p["ff1_w"].astype(jnp.bfloat16)  # (L, E, FE)
    ff2_w = p["ff2_w"].astype(jnp.bfloat16)  # (L, FE, E)

    def wspec(*dims):
        # Per-layer weight block, indexed only by the (arbitrary) layer grid axis.
        return pl.BlockSpec((1,) + dims, lambda b, l: (l,) + (0,) * len(dims))

    in_specs = [
        pl.BlockSpec((1, S, E), lambda b, l: (b, 0, 0)),   # activations: 1 DMA per batch elem
        pl.BlockSpec((1, 1, S), lambda b, l: (b, 0, 0)),   # additive mask
        wspec(E, E), wspec(1, E),      # fc_out w, b
        wspec(1, E), wspec(1, E),      # norm1 w, b
        wspec(E, FE), wspec(1, FE),    # ffn linear1 w, b
        wspec(FE, E), wspec(1, E),     # ffn linear2 w, b
        wspec(1, E), wspec(1, E),      # norm2 w, b
    ]

    flops = N * L * (4 * S * S * E        # energy + attn@V
                     + 2 * S * E * E      # fc_out
                     + 4 * S * E * FE)    # ffn
    weight_bytes = int(fc_w.nbytes + p["fc_b"].nbytes + p["n1_w"].nbytes + p["n1_b"].nbytes
                       + ff1_w.nbytes + p["ff1_b"].nbytes + ff2_w.nbytes + p["ff2_b"].nbytes
                       + p["n2_w"].nbytes + p["n2_b"].nbytes)
    cost = pl.CostEstimate(
        flops=flops,
        transcendentals=N * L * heads * S * S,
        bytes_accessed=int(x.nbytes + mask_add.nbytes + N * S * E * 4 + N * weight_bytes),
    )

    kernel = functools.partial(encoder_layer_kernel, heads=heads, embed_size=E)
    return pl.pallas_call(
        kernel,
        out_shape=jax.ShapeDtypeStruct((N, S, E), jnp.float32),
        grid=(N, L),
        in_specs=in_specs,
        out_specs=pl.BlockSpec((1, S, E), lambda b, l: (b, 0, 0)),
        scratch_shapes=[
            pltpu.VMEM((S, E), jnp.float32),   # activation carry across the layer axis
            pltpu.VMEM((S, E), jnp.float32),   # lane-concatenated per-head contexts
        ],
        compiler_params=pltpu.CompilerParams(
            dimension_semantics=("parallel", "arbitrary"),
        ),
        cost_estimate=cost,
    )(x, mask_add, fc_w, p["fc_b"], p["n1_w"], p["n1_b"],
      ff1_w, p["ff1_b"], ff2_w, p["ff2_b"], p["n2_w"], p["n2_b"])


# ----------------------------- parameter init -----------------------------

def init_block_params(key, embed_size, forward_expansion):
    FE = forward_expansion * embed_size
    ks = jax.random.split(key, 3)

    def lin(k, fan_in, fan_out):
        bound = 1.0 / math.sqrt(fan_in)
        kw, kb = jax.random.split(k)
        w = jax.random.uniform(kw, (fan_in, fan_out), jnp.float32, -bound, bound)
        b = jax.random.uniform(kb, (1, fan_out), jnp.float32, -bound, bound)
        return w, b

    fc_w, fc_b = lin(ks[0], embed_size, embed_size)
    ff1_w, ff1_b = lin(ks[1], embed_size, FE)
    ff2_w, ff2_b = lin(ks[2], FE, embed_size)
    return dict(
        fc_w=fc_w, fc_b=fc_b,
        n1_w=jnp.ones((1, embed_size), jnp.float32),
        n1_b=jnp.zeros((1, embed_size), jnp.float32),
        ff1_w=ff1_w, ff1_b=ff1_b,
        ff2_w=ff2_w, ff2_b=ff2_b,
        n2_w=jnp.ones((1, embed_size), jnp.float32),
        n2_b=jnp.zeros((1, embed_size), jnp.float32),
    )


def init_encoder_params(key, src_vocab_size, embed_size, num_layers,
                        forward_expansion, max_length):
    keys = jax.random.split(key, num_layers + 2)
    word_emb = jax.random.normal(keys[0], (src_vocab_size, embed_size), jnp.float32)
    pos_emb = jax.random.normal(keys[1], (max_length, embed_size), jnp.float32)
    layers = [init_block_params(keys[2 + i], embed_size, forward_expansion)
              for i in range(num_layers)]
    return dict(word_emb=word_emb, pos_emb=pos_emb, layers=layers)


# ------------------------------ encoder glue -------------------------------

def encoder_forward(params, tokens, mask, *, heads):
    N, S = tokens.shape
    positions = jnp.arange(S)[None, :]
    out = (params["word_emb"][tokens]
           + params["pos_emb"][positions]).astype(jnp.float32)       # (N, S, E)
    # Stack per-layer weights with a leading L axis for the fused-layer grid.
    stacked = {k: jnp.stack([lp[k] for lp in params["layers"]], axis=0)
               for k in params["layers"][0]}
    return encoder_stack(out, mask, stacked, heads=heads)


# ------------------------- pure-JAX reference check ------------------------

def _block_ref(x, mask, p, heads):
    N, S, E = x.shape
    D = E // heads
    q = x.reshape(N, S, heads, D)
    energy = jnp.einsum("nqhd,nkhd->nhqk", q, q)
    energy = jnp.where(mask[:, None, None, :] == 0.0, -1e20, energy)
    attn = jax.nn.softmax(energy / math.sqrt(E), axis=3)
    out = jnp.einsum("nhqk,nkhd->nqhd", attn, q).reshape(N, S, E)
    out = out @ p["fc_w"] + p["fc_b"]
    x1 = _layernorm(out + x, p["n1_w"], p["n1_b"])
    ff = jnp.maximum(x1 @ p["ff1_w"] + p["ff1_b"], 0.0) @ p["ff2_w"] + p["ff2_b"]
    return _layernorm(ff + x1, p["n2_w"], p["n2_b"])


def _encoder_ref(params, tokens, mask, *, heads):
    N, S = tokens.shape
    positions = jnp.arange(S)[None, :]
    out = (params["word_emb"][tokens] + params["pos_emb"][positions]).astype(jnp.float32)
    m = mask.astype(jnp.float32)
    for lp in params["layers"]:
        out = _block_ref(out, m, lp, heads=heads)
    return out


# ---------------------------------- main -----------------------------------

if __name__ == "__main__":
    # Small, lane-dense deterministic config (E and S multiples of 128).
    src_vocab_size = 50
    embed_size = 128
    num_layers = 2
    heads = 4
    forward_expansion = 4
    max_length = 128
    N, S = 2, 128

    key = jax.random.PRNGKey(0)
    kp, kt = jax.random.split(key)
    params = init_encoder_params(kp, src_vocab_size, embed_size, num_layers,
                                 forward_expansion, max_length)

    tokens = jax.random.randint(kt, (N, S), 0, src_vocab_size, dtype=jnp.int32)
    # Padding mask: batch element 1 has its last 16 positions masked out.
    mask = jnp.ones((N, S), jnp.int32).at[1, -16:].set(0)

    out = encoder_forward(params, tokens, mask, heads=heads)
    out = jax.block_until_ready(out)

    ref = _encoder_ref(params, tokens, mask, heads=heads)
    assert out.shape == (N, S, embed_size)
    # Tolerance accounts for bf16 matmul inputs (f32 accumulation) in the kernel.
    assert jnp.allclose(out, ref, atol=5e-2, rtol=5e-2), "mismatch vs JAX reference"

    print("KERNEL_OK")
</pallas_src>

<mosaic_0001>
module attributes {stable_mosaic.version = 11 : i64} {
  func.func @encoder_layer_kernel(%arg0: i32, %arg1: i32, %arg2: memref<1x128x128xf32, #tpu.memory_space<vmem>>, %arg3: memref<1x1x128xf32, #tpu.memory_space<vmem>>, %arg4: memref<1x128x128xbf16, #tpu.memory_space<vmem>>, %arg5: memref<1x1x128xf32, #tpu.memory_space<vmem>>, %arg6: memref<1x1x128xf32, #tpu.memory_space<vmem>>, %arg7: memref<1x1x128xf32, #tpu.memory_space<vmem>>, %arg8: memref<1x128x512xbf16, #tpu.memory_space<vmem>>, %arg9: memref<1x1x512xf32, #tpu.memory_space<vmem>>, %arg10: memref<1x512x128xbf16, #tpu.memory_space<vmem>>, %arg11: memref<1x1x128xf32, #tpu.memory_space<vmem>>, %arg12: memref<1x1x128xf32, #tpu.memory_space<vmem>>, %arg13: memref<1x1x128xf32, #tpu.memory_space<vmem>>, %arg14: memref<1x128x128xf32, #tpu.memory_space<vmem>>, %arg15: memref<128x128xf32, #tpu.memory_space<vmem>>, %arg16: memref<128x128xf32, #tpu.memory_space<vmem>>) attributes {dimension_semantics = [#tpu.dimension_semantics<parallel>, #tpu.dimension_semantics<arbitrary>], iteration_bounds = array<i64: 2, 2>, scalar_prefetch = 0 : i64, scratch_operands = 2 : i64, tpu.core_type = #tpu.core_type<tc>, window_params = [{transform_indices = @transform_0, window_bounds = array<i64: 1, 128, 128>}, {transform_indices = @transform_1, window_bounds = array<i64: 1, 1, 128>}, {transform_indices = @transform_2, window_bounds = array<i64: 1, 128, 128>}, {transform_indices = @transform_3, window_bounds = array<i64: 1, 1, 128>}, {transform_indices = @transform_4, window_bounds = array<i64: 1, 1, 128>}, {transform_indices = @transform_5, window_bounds = array<i64: 1, 1, 128>}, {transform_indices = @transform_6, window_bounds = array<i64: 1, 128, 512>}, {transform_indices = @transform_7, window_bounds = array<i64: 1, 1, 512>}, {transform_indices = @transform_8, window_bounds = array<i64: 1, 512, 128>}, {transform_indices = @transform_9, window_bounds = array<i64: 1, 1, 128>}, {transform_indices = @transform_10, window_bounds = array<i64: 1, 1, 128>}, {transform_indices = @transform_11, window_bounds = array<i64: 1, 1, 128>}, {transform_indices = @transform_12, window_bounds = array<i64: 1, 128, 128>}]} {
    %c0_i32 = arith.constant 0 : i32
    %0 = arith.cmpi eq, %arg1, %c0_i32 : i32
    %1 = arith.extui %0 : i1 to i32
    %c0_i32_0 = arith.constant 0 : i32
    %2 = arith.cmpi ne, %1, %c0_i32_0 : i32
    scf.if %2 {
      %c0_77 = arith.constant 0 : index
      %c0_78 = arith.constant 0 : index
      %c0_79 = arith.constant 0 : index
      %173 = vector.load %arg2[%c0_77, %c0_78, %c0_79] : memref<1x128x128xf32, #tpu.memory_space<vmem>>, vector<1x128x128xf32>
      %174 = vector.shape_cast %173 : vector<1x128x128xf32> to vector<128x128xf32>
      %c0_80 = arith.constant 0 : index
      %c0_81 = arith.constant 0 : index
      %175 = vector.load %arg15[%c0_80, %c0_81] : memref<128x128xf32, #tpu.memory_space<vmem>>, vector<128x128xf32>
      tpu.vector_store %arg15[%c0_80, %c0_81], %174 {strides = array<i32>} : memref<128x128xf32, #tpu.memory_space<vmem>>, vector<128x128xf32>,
    } else {
    }
    %c0 = arith.constant 0 : index
    %c0_1 = arith.constant 0 : index
    %3 = vector.load %arg15[%c0, %c0_1] : memref<128x128xf32, #tpu.memory_space<vmem>>, vector<128x128xf32>
    %cst = arith.constant 0.0883883461 : f32
    %4 = vector.broadcast %cst : f32 to vector<128x128xf32>
    %5 = arith.mulf %3, %4 : vector<128x128xf32>
    %c0_2 = arith.constant 0 : index
    %c0_3 = arith.constant 0 : index
    %c0_4 = arith.constant 0 : index
    %6 = vector.load %arg3[%c0_2, %c0_3, %c0_4] : memref<1x1x128xf32, #tpu.memory_space<vmem>>, vector<1x1x128xf32>
    %7 = vector.shape_cast %6 : vector<1x1x128xf32> to vector<1x128xf32>
    %8 = vector.extract_strided_slice %3 {offsets = [0, 0], sizes = [128, 32], strides = [1, 1]} : vector<128x128xf32> to vector<128x32xf32>
    %9 = arith.truncf %8 : vector<128x32xf32> to vector<128x32xbf16>
    %10 = vector.extract_strided_slice %5 {offsets = [0, 0], sizes = [128, 32], strides = [1, 1]} : vector<128x128xf32> to vector<128x32xf32>
    %11 = arith.truncf %10 : vector<128x32xf32> to vector<128x32xbf16>
    "tpu.trace_start"() <{level = 10 : i32, message = "qd,kd->qk"}> : () -> ()
    %cst_5 = arith.constant dense<0.000000e+00> : vector<128x128xf32>
    %12 = tpu.matmul %11, %9, %cst_5 {dimension_numbers = #tpu.dot_dimension_numbers<[1], [1], [0], [0], [0, 0, 1, 0], [], []>} : vector<128x32xbf16>, vector<128x32xbf16>, vector<128x128xf32> -> vector<128x128xf32>
    "tpu.trace_stop"() : () -> ()
    %13 = vector.broadcast %7 : vector<1x128xf32> to vector<128x128xf32>
    %14 = arith.addf %12, %13 : vector<128x128xf32>
    %cst_6 = arith.constant dense<0xFF800000> : vector<128xf32>
    %15 = vector.multi_reduction <maximumf>, %14, %cst_6 [1] : vector<128x128xf32> to vector<128xf32>
    %16 = vector.shape_cast %15 : vector<128xf32> to vector<128x1xf32>
    %17 = vector.broadcast %16 : vector<128x1xf32> to vector<128x128xf32>
    %18 = arith.subf %14, %17 : vector<128x128xf32>
    %19 = math.exp %18 : vector<128x128xf32>
    %cst_7 = arith.constant dense<0.000000e+00> : vector<128xf32>
    %20 = vector.multi_reduction <add>, %19, %cst_7 [1] : vector<128x128xf32> to vector<128xf32>
    %21 = vector.shape_cast %20 : vector<128xf32> to vector<128x1xf32>
    %22 = tpu.reciprocal %21 {approx = true} : vector<128x1xf32> -> vector<128x1xf32>
    %23 = vector.broadcast %22 : vector<128x1xf32> to vector<128x128xf32>
    %24 = arith.mulf %19, %23 : vector<128x128xf32>
    %25 = arith.truncf %24 : vector<128x128xf32> to vector<128x128xbf16>
    %cst_8 = arith.constant dense<0.000000e+00> : vector<128x32xf32>
    %26 = tpu.matmul %25, %9, %cst_8 {dimension_numbers = #tpu.dot_dimension_numbers<[1], [0], [0], [1], [0, 0, 1, 1], [], []>} : vector<128x128xbf16>, vector<128x32xbf16>, vector<128x32xf32> -> vector<128x32xf32>
    %c0_9 = arith.constant 0 : index
    %c0_10 = arith.constant 0 : index
    %27 = vector.load %arg16[%c0_9, %c0_10] : memref<128x128xf32, #tpu.memory_space<vmem>>, vector<128x32xf32>
    tpu.vector_store %arg16[%c0_9, %c0_10], %26 {strides = array<i32>} : memref<128x128xf32, #tpu.memory_space<vmem>>, vector<128x32xf32>,
    %28 = vector.extract_strided_slice %3 {offsets = [0, 32], sizes = [128, 32], strides = [1, 1]} : vector<128x128xf32> to vector<128x32xf32>
    %29 = arith.truncf %28 : vector<128x32xf32> to vector<128x32xbf16>
    %30 = vector.extract_strided_slice %5 {offsets = [0, 32], sizes = [128, 32], strides = [1, 1]} : vector<128x128xf32> to vector<128x32xf32>
    %31 = arith.truncf %30 : vector<128x32xf32> to vector<128x32xbf16>
    "tpu.trace_start"() <{level = 10 : i32, message = "qd,kd->qk"}> : () -> ()
    %cst_11 = arith.constant dense<0.000000e+00> : vector<128x128xf32>
    %32 = tpu.matmul %31, %29, %cst_11 {dimension_numbers = #tpu.dot_dimension_numbers<[1], [1], [0], [0], [0, 0, 1, 0], [], []>} : vector<128x32xbf16>, vector<128x32xbf16>, vector<128x128xf32> -> vector<128x128xf32>
    "tpu.trace_stop"() : () -> ()
    %33 = vector.broadcast %7 : vector<1x128xf32> to vector<128x128xf32>
    %34 = arith.addf %32, %33 : vector<128x128xf32>
    %cst_12 = arith.constant dense<0xFF800000> : vector<128xf32>
    %35 = vector.multi_reduction <maximumf>, %34, %cst_12 [1] : vector<128x128xf32> to vector<128xf32>
    %36 = vector.shape_cast %35 : vector<128xf32> to vector<128x1xf32>
    %37 = vector.broadcast %36 : vector<128x1xf32> to vector<128x128xf32>
    %38 = arith.subf %34, %37 : vector<128x128xf32>
    %39 = math.exp %38 : vector<128x128xf32>
    %cst_13 = arith.constant dense<0.000000e+00> : vector<128xf32>
    %40 = vector.multi_reduction <add>, %39, %cst_13 [1] : vector<128x128xf32> to vector<128xf32>
    %41 = vector.shape_cast %40 : vector<128xf32> to vector<128x1xf32>
    %42 = tpu.reciprocal %41 {approx = true} : vector<128x1xf32> -> vector<128x1xf32>
    %43 = vector.broadcast %42 : vector<128x1xf32> to vector<128x128xf32>
    %44 = arith.mulf %39, %43 : vector<128x128xf32>
    %45 = arith.truncf %44 : vector<128x128xf32> to vector<128x128xbf16>
    %cst_14 = arith.constant dense<0.000000e+00> : vector<128x32xf32>
    %46 = tpu.matmul %45, %29, %cst_14 {dimension_numbers = #tpu.dot_dimension_numbers<[1], [0], [0], [1], [0, 0, 1, 1], [], []>} : vector<128x128xbf16>, vector<128x32xbf16>, vector<128x32xf32> -> vector<128x32xf32>
    %c0_15 = arith.constant 0 : index
    %c32 = arith.constant 32 : index
    %47 = vector.load %arg16[%c0_15, %c32] : memref<128x128xf32, #tpu.memory_space<vmem>>, vector<128x32xf32>
    tpu.vector_store %arg16[%c0_15, %c32], %46 {strides = array<i32>} : memref<128x128xf32, #tpu.memory_space<vmem>>, vector<128x32xf32>,
    %48 = vector.extract_strided_slice %3 {offsets = [0, 64], sizes = [128, 32], strides = [1, 1]} : vector<128x128xf32> to vector<128x32xf32>
    %49 = arith.truncf %48 : vector<128x32xf32> to vector<128x32xbf16>
    %50 = vector.extract_strided_slice %5 {offsets = [0, 64], sizes = [128, 32], strides = [1, 1]} : vector<128x128xf32> to vector<128x32xf32>
    %51 = arith.truncf %50 : vector<128x32xf32> to vector<128x32xbf16>
    "tpu.trace_start"() <{level = 10 : i32, message = "qd,kd->qk"}> : () -> ()
    %cst_16 = arith.constant dense<0.000000e+00> : vector<128x128xf32>
    %52 = tpu.matmul %51, %49, %cst_16 {dimension_numbers = #tpu.dot_dimension_numbers<[1], [1], [0], [0], [0, 0, 1, 0], [], []>} : vector<128x32xbf16>, vector<128x32xbf16>, vector<128x128xf32> -> vector<128x128xf32>
    "tpu.trace_stop"() : () -> ()
    %53 = vector.broadcast %7 : vector<1x128xf32> to vector<128x128xf32>
    %54 = arith.addf %52, %53 : vector<128x128xf32>
    %cst_17 = arith.constant dense<0xFF800000> : vector<128xf32>
    %55 = vector.multi_reduction <maximumf>, %54, %cst_17 [1] : vector<128x128xf32> to vector<128xf32>
    %56 = vector.shape_cast %55 : vector<128xf32> to vector<128x1xf32>
    %57 = vector.broadcast %56 : vector<128x1xf32> to vector<128x128xf32>
    %58 = arith.subf %54, %57 : vector<128x128xf32>
    %59 = math.exp %58 : vector<128x128xf32>
    %cst_18 = arith.constant dense<0.000000e+00> : vector<128xf32>
    %60 = vector.multi_reduction <add>, %59, %cst_18 [1] : vector<128x128xf32> to vector<128xf32>
    %61 = vector.shape_cast %60 : vector<128xf32> to vector<128x1xf32>
    %62 = tpu.reciprocal %61 {approx = true} : vector<128x1xf32> -> vector<128x1xf32>
    %63 = vector.broadcast %62 : vector<128x1xf32> to vector<128x128xf32>
    %64 = arith.mulf %59, %63 : vector<128x128xf32>
    %65 = arith.truncf %64 : vector<128x128xf32> to vector<128x128xbf16>
    %cst_19 = arith.constant dense<0.000000e+00> : vector<128x32xf32>
    %66 = tpu.matmul %65, %49, %cst_19 {dimension_numbers = #tpu.dot_dimension_numbers<[1], [0], [0], [1], [0, 0, 1, 1], [], []>} : vector<128x128xbf16>, vector<128x32xbf16>, vector<128x32xf32> -> vector<128x32xf32>
    %c0_20 = arith.constant 0 : index
    %c64 = arith.constant 64 : index
    %67 = vector.load %arg16[%c0_20, %c64] : memref<128x128xf32, #tpu.memory_space<vmem>>, vector<128x32xf32>
    tpu.vector_store %arg16[%c0_20, %c64], %66 {strides = array<i32>} : memref<128x128xf32, #tpu.memory_space<vmem>>, vector<128x32xf32>,
    %68 = vector.extract_strided_slice %3 {offsets = [0, 96], sizes = [128, 32], strides = [1, 1]} : vector<128x128xf32> to vector<128x32xf32>
    %69 = arith.truncf %68 : vector<128x32xf32> to vector<128x32xbf16>
    %70 = vector.extract_strided_slice %5 {offsets = [0, 96], sizes = [128, 32], strides = [1, 1]} : vector<128x128xf32> to vector<128x32xf32>
    %71 = arith.truncf %70 : vector<128x32xf32> to vector<128x32xbf16>
    "tpu.trace_start"() <{level = 10 : i32, message = "qd,kd->qk"}> : () -> ()
    %cst_21 = arith.constant dense<0.000000e+00> : vector<128x128xf32>
    %72 = tpu.matmul %71, %69, %cst_21 {dimension_numbers = #tpu.dot_dimension_numbers<[1], [1], [0], [0], [0, 0, 1, 0], [], []>} : vector<128x32xbf16>, vector<128x32xbf16>, vector<128x128xf32> -> vector<128x128xf32>
    "tpu.trace_stop"() : () -> ()
    %73 = vector.broadcast %7 : vector<1x128xf32> to vector<128x128xf32>
    %74 = arith.addf %72, %73 : vector<128x128xf32>
    %cst_22 = arith.constant dense<0xFF800000> : vector<128xf32>
    %75 = vector.multi_reduction <maximumf>, %74, %cst_22 [1] : vector<128x128xf32> to vector<128xf32>
    %76 = vector.shape_cast %75 : vector<128xf32> to vector<128x1xf32>
    %77 = vector.broadcast %76 : vector<128x1xf32> to vector<128x128xf32>
    %78 = arith.subf %74, %77 : vector<128x128xf32>
    %79 = math.exp %78 : vector<128x128xf32>
    %cst_23 = arith.constant dense<0.000000e+00> : vector<128xf32>
    %80 = vector.multi_reduction <add>, %79, %cst_23 [1] : vector<128x128xf32> to vector<128xf32>
    %81 = vector.shape_cast %80 : vector<128xf32> to vector<128x1xf32>
    %82 = tpu.reciprocal %81 {approx = true} : vector<128x1xf32> -> vector<128x1xf32>
    %83 = vector.broadcast %82 : vector<128x1xf32> to vector<128x128xf32>
    %84 = arith.mulf %79, %83 : vector<128x128xf32>
    %85 = arith.truncf %84 : vector<128x128xf32> to vector<128x128xbf16>
    %cst_24 = arith.constant dense<0.000000e+00> : vector<128x32xf32>
    %86 = tpu.matmul %85, %69, %cst_24 {dimension_numbers = #tpu.dot_dimension_numbers<[1], [0], [0], [1], [0, 0, 1, 1], [], []>} : vector<128x128xbf16>, vector<128x32xbf16>, vector<128x32xf32> -> vector<128x32xf32>
    %c0_25 = arith.constant 0 : index
    %c96 = arith.constant 96 : index
    %87 = vector.load %arg16[%c0_25, %c96] : memref<128x128xf32, #tpu.memory_space<vmem>>, vector<128x32xf32>
    tpu.vector_store %arg16[%c0_25, %c96], %86 {strides = array<i32>} : memref<128x128xf32, #tpu.memory_space<vmem>>, vector<128x32xf32>,
    %c0_26 = arith.constant 0 : index
    %c0_27 = arith.constant 0 : index
    %88 = vector.load %arg16[%c0_26, %c0_27] : memref<128x128xf32, #tpu.memory_space<vmem>>, vector<128x128xf32>
    %89 = arith.truncf %88 : vector<128x128xf32> to vector<128x128xbf16>
    %c0_28 = arith.constant 0 : index
    %c0_29 = arith.constant 0 : index
    %c0_30 = arith.constant 0 : index
    %90 = vector.load %arg4[%c0_28, %c0_29, %c0_30] : memref<1x128x128xbf16, #tpu.memory_space<vmem>>, vector<1x128x128xbf16>
    %91 = vector.shape_cast %90 : vector<1x128x128xbf16> to vector<128x128xbf16>
    %cst_31 = arith.constant dense<0.000000e+00> : vector<128x128xf32>
    %92 = tpu.matmul %89, %91, %cst_31 {dimension_numbers = #tpu.dot_dimension_numbers<[1], [0], [0], [1], [0, 0, 1, 1], [], []>} : vector<128x128xbf16>, vector<128x128xbf16>, vector<128x128xf32> -> vector<128x128xf32>
    %c0_32 = arith.constant 0 : index
    %c0_33 = arith.constant 0 : index
    %c0_34 = arith.constant 0 : index
    %93 = vector.load %arg5[%c0_32, %c0_33, %c0_34] : memref<1x1x128xf32, #tpu.memory_space<vmem>>, vector<1x1x128xf32>
    %94 = vector.shape_cast %93 : vector<1x1x128xf32> to vector<1x128xf32>
    %95 = vector.broadcast %94 : vector<1x128xf32> to vector<128x128xf32>
    %96 = arith.addf %92, %95 : vector<128x128xf32>
    %97 = arith.addf %96, %3 : vector<128x128xf32>
    %c0_35 = arith.constant 0 : index
    %c0_36 = arith.constant 0 : index
    %c0_37 = arith.constant 0 : index
    %98 = vector.load %arg6[%c0_35, %c0_36, %c0_37] : memref<1x1x128xf32, #tpu.memory_space<vmem>>, vector<1x1x128xf32>
    %99 = vector.shape_cast %98 : vector<1x1x128xf32> to vector<1x128xf32>
    %c0_38 = arith.constant 0 : index
    %c0_39 = arith.constant 0 : index
    %c0_40 = arith.constant 0 : index
    %100 = vector.load %arg7[%c0_38, %c0_39, %c0_40] : memref<1x1x128xf32, #tpu.memory_space<vmem>>, vector<1x1x128xf32>
    %101 = vector.shape_cast %100 : vector<1x1x128xf32> to vector<1x128xf32>
    %cst_41 = arith.constant dense<0.000000e+00> : vector<128xf32>
    %102 = vector.multi_reduction <add>, %97, %cst_41 [1] : vector<128x128xf32> to vector<128xf32>
    %103 = vector.shape_cast %102 : vector<128xf32> to vector<128x1xf32>
    %cst_42 = arith.constant 1.280000e+02 : f32
    %104 = vector.broadcast %cst_42 : f32 to vector<128x1xf32>
    %105 = arith.divf %103, %104 : vector<128x1xf32>
    %106 = vector.broadcast %105 : vector<128x1xf32> to vector<128x128xf32>
    %107 = arith.subf %97, %106 : vector<128x128xf32>
    %108 = arith.mulf %107, %107 : vector<128x128xf32>
    %cst_43 = arith.constant dense<0.000000e+00> : vector<128xf32>
    %109 = vector.multi_reduction <add>, %108, %cst_43 [1] : vector<128x128xf32> to vector<128xf32>
    %110 = vector.shape_cast %109 : vector<128xf32> to vector<128x1xf32>
    %cst_44 = arith.constant 1.280000e+02 : f32
    %111 = vector.broadcast %cst_44 : f32 to vector<128x1xf32>
    %112 = arith.divf %110, %111 : vector<128x1xf32>
    %113 = vector.broadcast %105 : vector<128x1xf32> to vector<128x128xf32>
    %114 = arith.subf %97, %113 : vector<128x128xf32>
    %cst_45 = arith.constant 9.99999974E-6 : f32
    %115 = vector.broadcast %cst_45 : f32 to vector<128x1xf32>
    %116 = arith.addf %112, %115 : vector<128x1xf32>
    %117 = math.rsqrt %116 : vector<128x1xf32>
    %118 = vector.broadcast %117 : vector<128x1xf32> to vector<128x128xf32>
    %119 = arith.mulf %114, %118 : vector<128x128xf32>
    %120 = vector.broadcast %99 : vector<1x128xf32> to vector<128x128xf32>
    %121 = arith.mulf %119, %120 : vector<128x128xf32>
    %122 = vector.broadcast %101 : vector<1x128xf32> to vector<128x128xf32>
    %123 = arith.addf %121, %122 : vector<128x128xf32>
    %124 = arith.truncf %123 : vector<128x128xf32> to vector<128x128xbf16>
    %c0_46 = arith.constant 0 : index
    %c0_47 = arith.constant 0 : index
    %c0_48 = arith.constant 0 : index
    %125 = vector.load %arg8[%c0_46, %c0_47, %c0_48] : memref<1x128x512xbf16, #tpu.memory_space<vmem>>, vector<1x128x512xbf16>
    %126 = vector.shape_cast %125 : vector<1x128x512xbf16> to vector<128x512xbf16>
    %cst_49 = arith.constant dense<0.000000e+00> : vector<128x512xf32>
    %127 = tpu.matmul %124, %126, %cst_49 {dimension_numbers = #tpu.dot_dimension_numbers<[1], [0], [0], [1], [0, 0, 1, 1], [], []>} : vector<128x128xbf16>, vector<128x512xbf16>, vector<128x512xf32> -> vector<128x512xf32>
    %c0_50 = arith.constant 0 : index
    %c0_51 = arith.constant 0 : index
    %c0_52 = arith.constant 0 : index
    %128 = vector.load %arg9[%c0_50, %c0_51, %c0_52] : memref<1x1x512xf32, #tpu.memory_space<vmem>>, vector<1x1x512xf32>
    %129 = vector.shape_cast %128 : vector<1x1x512xf32> to vector<1x512xf32>
    %130 = vector.broadcast %129 : vector<1x512xf32> to vector<128x512xf32>
    %131 = arith.addf %127, %130 : vector<128x512xf32>
    %cst_53 = arith.constant 0.000000e+00 : f32
    %132 = vector.broadcast %cst_53 : f32 to vector<128x512xf32>
    %133 = arith.maximumf %131, %132 : vector<128x512xf32>
    %134 = arith.truncf %133 : vector<128x512xf32> to vector<128x512xbf16>
    %c0_54 = arith.constant 0 : index
    %c0_55 = arith.constant 0 : index
    %c0_56 = arith.constant 0 : index
    %135 = vector.load %arg10[%c0_54, %c0_55, %c0_56] : memref<1x512x128xbf16, #tpu.memory_space<vmem>>, vector<1x512x128xbf16>
    %136 = vector.shape_cast %135 : vector<1x512x128xbf16> to vector<512x128xbf16>
    %cst_57 = arith.constant dense<0.000000e+00> : vector<128x128xf32>
    %137 = tpu.matmul %134, %136, %cst_57 {dimension_numbers = #tpu.dot_dimension_numbers<[1], [0], [0], [1], [0, 0, 1, 1], [], []>} : vector<128x512xbf16>, vector<512x128xbf16>, vector<128x128xf32> -> vector<128x128xf32>
    %c0_58 = arith.constant 0 : index
    %c0_59 = arith.constant 0 : index
    %c0_60 = arith.constant 0 : index
    %138 = vector.load %arg11[%c0_58, %c0_59, %c0_60] : memref<1x1x128xf32, #tpu.memory_space<vmem>>, vector<1x1x128xf32>
    %139 = vector.shape_cast %138 : vector<1x1x128xf32> to vector<1x128xf32>
    %140 = vector.broadcast %139 : vector<1x128xf32> to vector<128x128xf32>
    %141 = arith.addf %137, %140 : vector<128x128xf32>
    %142 = arith.addf %141, %123 : vector<128x128xf32>
    %c0_61 = arith.constant 0 : index
    %c0_62 = arith.constant 0 : index
    %c0_63 = arith.constant 0 : index
    %143 = vector.load %arg12[%c0_61, %c0_62, %c0_63] : memref<1x1x128xf32, #tpu.memory_space<vmem>>, vector<1x1x128xf32>
    %144 = vector.shape_cast %143 : vector<1x1x128xf32> to vector<1x128xf32>
    %c0_64 = arith.constant 0 : index
    %c0_65 = arith.constant 0 : index
    %c0_66 = arith.constant 0 : index
    %145 = vector.load %arg13[%c0_64, %c0_65, %c0_66] : memref<1x1x128xf32, #tpu.memory_space<vmem>>, vector<1x1x128xf32>
    %146 = vector.shape_cast %145 : vector<1x1x128xf32> to vector<1x128xf32>
    %cst_67 = arith.constant dense<0.000000e+00> : vector<128xf32>
    %147 = vector.multi_reduction <add>, %142, %cst_67 [1] : vector<128x128xf32> to vector<128xf32>
    %148 = vector.shape_cast %147 : vector<128xf32> to vector<128x1xf32>
    %cst_68 = arith.constant 1.280000e+02 : f32
    %149 = vector.broadcast %cst_68 : f32 to vector<128x1xf32>
    %150 = arith.divf %148, %149 : vector<128x1xf32>
    %151 = vector.broadcast %150 : vector<128x1xf32> to vector<128x128xf32>
    %152 = arith.subf %142, %151 : vector<128x128xf32>
    %153 = arith.mulf %152, %152 : vector<128x128xf32>
    %cst_69 = arith.constant dense<0.000000e+00> : vector<128xf32>
    %154 = vector.multi_reduction <add>, %153, %cst_69 [1] : vector<128x128xf32> to vector<128xf32>
    %155 = vector.shape_cast %154 : vector<128xf32> to vector<128x1xf32>
    %cst_70 = arith.constant 1.280000e+02 : f32
    %156 = vector.broadcast %cst_70 : f32 to vector<128x1xf32>
    %157 = arith.divf %155, %156 : vector<128x1xf32>
    %158 = vector.broadcast %150 : vector<128x1xf32> to vector<128x128xf32>
    %159 = arith.subf %142, %158 : vector<128x128xf32>
    %cst_71 = arith.constant 9.99999974E-6 : f32
    %160 = vector.broadcast %cst_71 : f32 to vector<128x1xf32>
    %161 = arith.addf %157, %160 : vector<128x1xf32>
    %162 = math.rsqrt %161 : vector<128x1xf32>
    %163 = vector.broadcast %162 : vector<128x1xf32> to vector<128x128xf32>
    %164 = arith.mulf %159, %163 : vector<128x128xf32>
    %165 = vector.broadcast %144 : vector<1x128xf32> to vector<128x128xf32>
    %166 = arith.mulf %164, %165 : vector<128x128xf32>
    %167 = vector.broadcast %146 : vector<1x128xf32> to vector<128x128xf32>
    %168 = arith.addf %166, %167 : vector<128x128xf32>
    %c0_72 = arith.constant 0 : index
    %c0_73 = arith.constant 0 : index
    %169 = vector.load %arg15[%c0_72, %c0_73] : memref<128x128xf32, #tpu.memory_space<vmem>>, vector<128x128xf32>
    tpu.vector_store %arg15[%c0_72, %c0_73], %168 {strides = array<i32>} : memref<128x128xf32, #tpu.memory_space<vmem>>, vector<128x128xf32>,
    %c0_74 = arith.constant 0 : index
    %c0_75 = arith.constant 0 : index
    %c0_76 = arith.constant 0 : index
    %170 = vector.load %arg14[%c0_74, %c0_75, %c0_76] : memref<1x128x128xf32, #tpu.memory_space<vmem>>, vector<1x128x128xf32>
    %171 = vector.shape_cast %170 : vector<1x128x128xf32> to vector<128x128xf32>
    %172 = vector.shape_cast %168 : vector<128x128xf32> to vector<1x128x128xf32>
    tpu.vector_store %arg14[%c0_74, %c0_75, %c0_76], %172 {strides = array<i32>} : memref<1x128x128xf32, #tpu.memory_space<vmem>>, vector<1x128x128xf32>,
    return
  }
  func.func @transform_0(%arg0: i32, %arg1: i32) -> (i32, i32, i32) {
    %c0_i32 = arith.constant 0 : i32
    %c0_i32_0 = arith.constant 0 : i32
    %c0_i32_1 = arith.constant 0 : i32
    return %arg0, %c0_i32, %c0_i32_0 : i32, i32, i32
  }
  func.func @transform_1(%arg0: i32, %arg1: i32) -> (i32, i32, i32) {
    %c0_i32 = arith.constant 0 : i32
    %c0_i32_0 = arith.constant 0 : i32
    %c0_i32_1 = arith.constant 0 : i32
    return %arg0, %c0_i32, %c0_i32_0 : i32, i32, i32
  }
  func.func @transform_2(%arg0: i32, %arg1: i32) -> (i32, i32, i32) {
    %c0_i32 = arith.constant 0 : i32
    %c0_i32_0 = arith.constant 0 : i32
    %c0_i32_1 = arith.constant 0 : i32
    return %arg1, %c0_i32, %c0_i32_0 : i32, i32, i32
  }
  func.func @transform_3(%arg0: i32, %arg1: i32) -> (i32, i32, i32) {
    %c0_i32 = arith.constant 0 : i32
    %c0_i32_0 = arith.constant 0 : i32
    %c0_i32_1 = arith.constant 0 : i32
    return %arg1, %c0_i32, %c0_i32_0 : i32, i32, i32
  }
  func.func @transform_4(%arg0: i32, %arg1: i32) -> (i32, i32, i32) {
    %c0_i32 = arith.constant 0 : i32
    %c0_i32_0 = arith.constant 0 : i32
    %c0_i32_1 = arith.constant 0 : i32
    return %arg1, %c0_i32, %c0_i32_0 : i32, i32, i32
  }
  func.func @transform_5(%arg0: i32, %arg1: i32) -> (i32, i32, i32) {
    %c0_i32 = arith.constant 0 : i32
    %c0_i32_0 = arith.constant 0 : i32
    %c0_i32_1 = arith.constant 0 : i32
    return %arg1, %c0_i32, %c0_i32_0 : i32, i32, i32
  }
  func.func @transform_6(%arg0: i32, %arg1: i32) -> (i32, i32, i32) {
    %c0_i32 = arith.constant 0 : i32
    %c0_i32_0 = arith.constant 0 : i32
    %c0_i32_1 = arith.constant 0 : i32
    return %arg1, %c0_i32, %c0_i32_0 : i32, i32, i32
  }
  func.func @transform_7(%arg0: i32, %arg1: i32) -> (i32, i32, i32) {
    %c0_i32 = arith.constant 0 : i32
    %c0_i32_0 = arith.constant 0 : i32
    %c0_i32_1 = arith.constant 0 : i32
    return %arg1, %c0_i32, %c0_i32_0 : i32, i32, i32
  }
  func.func @transform_8(%arg0: i32, %arg1: i32) -> (i32, i32, i32) {
    %c0_i32 = arith.constant 0 : i32
    %c0_i32_0 = arith.constant 0 : i32
    %c0_i32_1 = arith.constant 0 : i32
    return %arg1, %c0_i32, %c0_i32_0 : i32, i32, i32
  }
  func.func @transform_9(%arg0: i32, %arg1: i32) -> (i32, i32, i32) {
    %c0_i32 = arith.constant 0 : i32
    %c0_i32_0 = arith.constant 0 : i32
    %c0_i32_1 = arith.constant 0 : i32
    return %arg1, %c0_i32, %c0_i32_0 : i32, i32, i32
  }
  func.func @transform_10(%arg0: i32, %arg1: i32) -> (i32, i32, i32) {
    %c0_i32 = arith.constant 0 : i32
    %c0_i32_0 = arith.constant 0 : i32
    %c0_i32_1 = arith.constant 0 : i32
    return %arg1, %c0_i32, %c0_i32_0 : i32, i32, i32
  }
  func.func @transform_11(%arg0: i32, %arg1: i32) -> (i32, i32, i32) {
    %c0_i32 = arith.constant 0 : i32
    %c0_i32_0 = arith.constant 0 : i32
    %c0_i32_1 = arith.constant 0 : i32
    return %arg1, %c0_i32, %c0_i32_0 : i32, i32, i32
  }
  func.func @transform_12(%arg0: i32, %arg1: i32) -> (i32, i32, i32) {
    %c0_i32 = arith.constant 0 : i32
    %c0_i32_0 = arith.constant 0 : i32
    %c0_i32_1 = arith.constant 0 : i32
    return %arg0, %c0_i32, %c0_i32_0 : i32, i32, i32
  }
}

</mosaic_0001>

<bundles_post_ra>
// kernel: tpu_custom_call.1
= control target key start
LH: loop header
LB: loop body
LE: loop exit
PB: predicated region body
PF: predicated region fallthrough
CT: control target
= control target key end

     0   :  { %s8577_s0 = inlined_call_operand.hbm [shape: f32[2,128,128], index: 0, kind: input, shape index: {}]   ;;  %s8578_s1 = inlined_call_operand.vmem [shape: f32[2,1,128], index: 1, kind: input, shape index: {}]   ;;  %s8579_s2 = inlined_call_operand.hbm [shape: bf16[2,128,128], index: 2, kind: input, shape index: {}]   ;;  %s8580_s3 = inlined_call_operand.vmem [shape: f32[2,1,128], index: 3, kind: input, shape index: {}]   ;;  %s8581_s4 = inlined_call_operand.vmem [shape: f32[2,1,128], index: 4, kind: input, shape index: {}]   ;;  %s8582_s5 = inlined_call_operand.vmem [shape: f32[2,1,128], index: 5, kind: input, shape index: {}]   ;;  %s8583_s6 = inlined_call_operand.hbm [shape: bf16[2,128,512], index: 6, kind: input, shape index: {}]   ;;  %s8584_s7 = inlined_call_operand.vmem [shape: f32[2,1,512], index: 7, kind: input, shape index: {}]   ;;  %s8585_s8 = inlined_call_operand.hbm [shape: bf16[2,512,128], index: 8, kind: input, shape index: {}]   ;;  %s8586_s9 = inlined_call_operand.vmem [shape: f32[2,1,128], index: 9, kind: input, shape index: {}]   ;;  %s8587_s10 = inlined_call_operand.vmem [shape: f32[2,1,128], index: 10, kind: input, shape index: {}]   ;;  %s8588_s11 = inlined_call_operand.vmem [shape: f32[2,1,128], index: 11, kind: input, shape index: {}]   ;;  %s8589_s12 = inlined_call_operand.hbm [shape: f32[2,128,128], index: 12, kind: output, shape index: {}]  }
   0x1   :  { %8614 = sst [smem:[#allocation36_spill]] %s8577_s0 }
   0x2   :  { %8615 = sst [smem:[#allocation37_spill]] %s8578_s1 }
   0x3   :  { %8616 = sst [smem:[#allocation38_spill]] %s8579_s2 }
   0x4   :  { %8617 = sst [smem:[#allocation39_spill]] %s8580_s3 }
   0x5   :  { %8618 = sst [smem:[#allocation40_spill]] %s8581_s4 }
   0x6   :  { %8619 = sst [smem:[#allocation41_spill]] %s8582_s5 }
   0x7   :  { %8620 = sst [smem:[#allocation42_spill]] %s8583_s6 }
   0x8   :  { %8621 = sst [smem:[#allocation43_spill]] %s8584_s7 }
   0x9   :  { %8622 = sst [smem:[#allocation44_spill]] %s8585_s8 }
   0xa   :  { %8623 = sst [smem:[#allocation45_spill]] %s8586_s9 }
   0xb   :  { %8624 = sst [smem:[#allocation46_spill]] %s8587_s10 }
   0xc   :  { %8625 = sst [smem:[#allocation47_spill]] %s8588_s11 }
   0xd   :  { %8626 = sst [smem:[#allocation48_spill]] %s8589_s12 }
   0xe   :  { %17 = vsyncpa [#allocation5], 0 }
   0xf   :  { %19 = vsyncpa [#allocation5 + $0x1], 0 }
  0x10   :  { %20 = vsyncpa [#allocation8], 0 }
  0x11   :  { %22 = vsyncpa [#allocation8 + $0x1], 0 }
  0x12   :  { %23 = vsyncpa [#allocation11], 0 }
  0x13   :  { %25 = vsyncpa [#allocation11 + $0x1], 0 }
  0x14   :  { %26 = vsyncpa [#allocation6], 0 }
  0x15   :  { %28 = vsyncpa [#allocation6 + $0x1], 0  ;;  %s6322_s21 = smov 0   ;;  %s6324_s22 = smov 0  }
  0x16   :  { %s6326_s23 = smov 0   ;;  %s6328_s24 = smov 0  }
  0x17   :  { %s6330_s25 = smov 0   ;;  %s6332_s26 = smov 0  }
  0x18   :  { %s6334_s27 = smov 0   ;;  %s6336_s28 = smov 0  }
  0x19   :  { %s6338_s29 = smov 0   ;;  %s6340_s30 = smov 0  }
  0x1a   :  { %s6342_s13 = smov 0  }
  0x1b LB: > { %8627 = sst [smem:[#allocation17_spill]] %s6202_s22  ;;  %s43_s14 = sadd.s32 1, %s6230_s29  ;;  %s6238_s13 = sphi %s6342_s13, %s34_s13   ;;  %s6234_s30 = sphi %s6340_s30, %s8709_s30   ;;  %s6230_s29 = sphi %s6338_s29, %s8708_s29   ;;  %s6226_s28 = sphi %s6336_s28, %s8707_s28   ;;  %s6222_s27 = sphi %s6334_s27, %s8706_s27   ;;  %s6218_s26 = sphi %s6332_s26, %s8705_s26   ;;  %s6214_s25 = sphi %s6330_s25, %s8704_s25   ;;  %s6210_s24 = sphi %s6328_s24, %s8703_s24   ;;  %s6206_s23 = sphi %s6326_s23, %s8702_s23   ;;  %s6202_s22 = sphi %s6324_s22, %s8701_s22   ;;  %s6198_s21 = sphi %s6322_s21, %s8700_s21  }
  0x1c   : > { %8628 = sst [smem:[#allocation18_spill]] %s6206_s23  ;;  %p8594_p0 = scmp.eq.s32.totalorder %s6238_s13, 0 }
  0x1d   : > { %8629 = sst [smem:[#allocation19_spill]] %s6210_s24  ;;  %p6379_p1 = scmp.ge.s32.totalorder %s43_s14, 2 }
  0x1e   : > { %8630 = sst [smem:[#allocation20_spill]] %s6214_s25  ;;  %s105_s16 = sadd.s32 1, %s6206_s23 }
  0x1f   : > { %8631 = sst [smem:[#allocation21_spill]] %s6218_s26  ;;  %p112_p2 = scmp.ne.s32.totalorder %s6206_s23, %s6202_s22 }
  0x20   : > { %8632 = sst [smem:[#allocation22_spill]] %s6222_s27  ;;  %s8711_s14 = smov (%p6379_p1, %s43_s14), 0 }
  0x21   : > { %8633 = sst [smem:[#allocation23_spill]] %s6226_s28  ;;  %p114_p4 = por %p112_p2, %p8594_p0 }
  0x22   : > { %8634 = sst [smem:[#allocation24_spill]] %s6230_s29  ;;  %s102_s17 = ssub.s32 %s6230_s29, %s8711_s14 }
  0x23   : > { %8635 = sst [smem:[#allocation25_spill]] %s6234_s30  ;;  %p8593_p5 = scmp.lt.s32.totalorder %s6238_s13, 4 }
  0x24   : > { %s8636_s15 = scalar_select %p6379_p1, 1, 0 }
  0x25   : > { %8637 = sst [smem:[#allocation26_spill]] %s8711_s14  ;;  %p103_p6 = scmp.eq.s32.totalorder %s102_s17, 0 }
  0x26   : > { %s429_s18 = sand.u32 1, %s6238_s13   ;;  %s6399_s19 = sand.u32 1, %s6206_s23  }
  0x27   : > { %s6402_s20 = scalar_select %p103_p6, %s6206_s23, %s105_s16  }
  0x28   : > { %s4688_s12 = sshll.u32 %s6399_s19, 6  ;;  %s4822_s11 = sshll.u32 %s6230_s29, 10 }
  0x29   : > { %8638 = sst [smem:[#allocation27_spill]] %s6402_s20  ;;  %s8639_s2 = sld [smem:[#allocation38_spill]] }
  0x2a   : > { %s433_s14 = scalar_lea.vmem [#allocation7], %s4688_s12  ;;  %p6413_p7 = pnand %p8593_p5, %p114_p4 }
  0x2b   : > { %s440_s5 = sshll.u32 %s433_s14, 4  ;;  %s6419_s16 = scalar_lea.sflag [#allocation8], %s429_s18  ;;  %s6417_s5 = int_to_ptr.vmem [resolvable:$true] %s440_s5 }
  0x2c   : > { %s8640_s17 = scalar_select %p6413_p7, 1, 0 }
  0x2d   : > { %p6425_p9 = pneg %p6413_p7 }
  0x2f   : > { %s6409_s7 = scalar_lea.hbm %s8639_s2, %s4822_s11  ;;  %s5993_s12 = scalar_lea.hbm %s8639_s2, 2048 }
  0x30   : > { %s5988_s20 = scalar_lea.hbm %s6409_s7, 1024  ;;  %p5994_p12 = scmp.lt.u32.totalorder %s6409_s7, %s8639_s2 }
  0x31   : > { %p5989_p8 = scmp.ne.s32.totalorder %s6409_s7, %s5988_s20  ;;  %p5995_p13 = scmp.lt.u32.totalorder %s5993_s12, %s5988_s20 }
  0x32   : > { %p5997_p4 = scmp.lt.u32.totalorder %s5988_s20, %s6409_s7 }
  0x33   : > { %p5991_p10 = pnand %p6425_p9, %p5989_p8  ;;  %p5996_p2 = por %p5995_p13, %p5994_p12 }
  0x35   : > { %p5992_p11 = pneg %p5991_p10  ;;  %p5998_p6 = por %p5997_p4, %p5996_p2 }
  0x37   : > { %p5999_p5 = pnand %p5998_p6, %p5992_p11 }
  0x39   : > { %6002 = shalt.err (!%p5999_p5)
}
  0x3a   : > { %s6003_s18 = scalar_lea.vmem %s6417_s5, 1024  ;;  %s6240_s10 = smov [#allocation7]  }
  0x3b   : > { %p6004_p8 = scmp.ne.s32.totalorder %s6417_s5, %s6003_s18  ;;  %s6008_s11 = sshll.u32 %s6240_s10, 4  ;;  %s6009_s11 = int_to_ptr.vmem [resolvable:$false] %s6008_s11 }
  0x3c   : > { %s6010_s23 = scalar_lea.vmem %s6009_s11, 2048  ;;  %p6011_p0 = scmp.lt.s32.totalorder %s6417_s5, %s6009_s11 }
  0x3d   : > { %p6006_p10 = pnand %p6004_p8, %p6425_p9  ;;  %p6012_p1 = scmp.lt.s32.totalorder %s6010_s23, %s6003_s18 }
  0x3f   : > { %p6007_p3 = pneg %p6006_p10  ;;  %p6013_p12 = por %p6012_p1, %p6011_p0 }
  0x41   : > { %p6014_p13 = pnand %p6013_p12, %p6007_p3 }
  0x43   : > { %6017 = shalt.err (!%p6014_p13)
}
  0x44   : > { %s8596_s20 = smov 64   ;;  %s8597_s12 = smov 4  }
  0x45   : > { %5450 = dma.hbm_to_vmem [thread:$0]  (!%p6413_p7), %s6409_s7, 1024, %s6417_s5, %s6419_s16, %s8596_s20, %s8596_s20, %s8597_s12  }
  0x46   : > { %p4697_p0 = scmp.ge.s32.totalorder %s6238_s13, 1  ;;  %p533_p1 = scmp.lt.s32.totalorder %s6238_s13, 5 }
  0x47   : > { %s6459_s18 = sadd.s32 4294967295, %s6238_s13   ;;  %s4682_s10 = sadd.s32 4294967294, %s6238_s13  }
  0x48   : > { %p6454_p3 = pnand %p4697_p0, %p533_p1  ;;  %s46_s11 = sadd.s32 1, %s6234_s30 }
  0x49   : > { %p8643_p5 = scmp.ne.s32.totalorder %s8636_s15, 0  ;;  %s53_s5 = sadd.s32 1, %s6218_s26 }
  0x4a   : > { %s8642_s14 = scalar_select %p6454_p3, 1, 0 }
  0x4b   : > { %s8713_s11 = smov (!%p8643_p5, %s46_s11), %s6234_s30  ;;  %p60_p11 = scmp.ne.s32.totalorder %s6218_s26, %s6214_s25 }
  0x4c   : > { %p48_p2 = scmp.ge.s32.totalorder %s8713_s11, 2  ;;  %p66_p4 = scmp.ne.s32.totalorder %s6214_s25, %s6210_s24 }
  0x4d   : > { %p8644_p6 = scmp.eq.s32.totalorder %s6238_s13, 0  ;;  %p67_p10 = scmp.eq.s32.totalorder %s6459_s18, 0 }
  0x4e   : > { %s8715_s11 = smov (%p48_p2, %s8713_s11), 0  ;;  %p8648_p13 = scmp.ne.s32.totalorder %s6202_s22, %s6198_s21 }
  0x4f   : > { %p6473_p8 = por %p8644_p6, %p60_p11  ;;  %8646 = sst [smem:[#allocation28_spill]] %s8715_s11 }
  0x50   : > { %p6483_p12 = por %p67_p10, %p66_p4  ;;  %p6490_p0 = por %p8648_p13, %p67_p10 }
  0x51   : > { %s50_s20 = ssub.s32 %s6234_s30, %s8715_s11  ;;  %p376_p1 = scmp.eq.s32.totalorder %s6459_s18, 3 }
  0x52   : > { %s8647_s15 = scalar_select %p6483_p12, 1, 0 }
  0x53   : > { %s8649_s23 = scalar_select %p6490_p0, 1, 0 }
  0x54   : > { %p51_p5 = scmp.eq.s32.totalorder %s50_s20, 0  ;;  %p382_p6 = scmp.eq.s32.totalorder %s4682_s10, 3 }
  0x55   : > { %p6497_p3 = por %p376_p1, %p60_p11  ;;  %s402_s2 = sand.u32 1, %s6218_s26  }
  0x56   : > { %s6503_s4 = scalar_select %p51_p5, %s6218_s26, %s53_s5  }
  0x57   : > { %s8650_s12 = scalar_select %p6497_p3, 1, 0 }
  0x58   : > { %8651 = sst [smem:[#allocation29_spill]] %s6503_s4  ;;  %p6508_p2 = por %p382_p6, %p66_p4 }
  0x59   : > { %s4685_s21 = sshll.u32 %s402_s2, 7  ;;  %s4821_s1 = sshll.u32 %s6234_s30, 11 }
  0x5a   : > { %s8652_s3 = scalar_select %p6508_p2, 1, 0 }
  0x5b   : > { %s8654_s0 = sld [smem:[#allocation36_spill]]  ;;  %s406_s20 = scalar_lea.vmem [#allocation4], %s4685_s21 }
  0x5c   : > { %8653 = sst [smem:[#allocation30_spill]] %s8652_s3  ;;  %s413_s10 = sshll.u32 %s406_s20, 4  ;;  %s6526_s10 = int_to_ptr.vmem [resolvable:$true] %s413_s10 }
  0x5d   : > { %p8655_p11 = scmp.lt.s32.totalorder %s6238_s13, 4  ;;  %s6528_s30 = scalar_lea.sflag [#allocation5], %s402_s2 }
  0x5f   : > { %p6522_p10 = pnand %p8655_p11, %p6473_p8 }
  0x61   : > { %s6516_s11 = scalar_lea.hbm %s8654_s0, %s4821_s1  ;;  %p6020_p13 = pneg %p6522_p10 }
  0x62   : > { %s6018_s1 = scalar_lea.hbm %s6516_s11, 2048  ;;  %s6023_s7 = scalar_lea.hbm %s8654_s0, 4096 }
  0x63   : > { %p6019_p4 = scmp.ne.s32.totalorder %s6516_s11, %s6018_s1  ;;  %p6024_p8 = scmp.lt.u32.totalorder %s6516_s11, %s8654_s0 }
  0x64   : > { %p6025_p6 = scmp.lt.u32.totalorder %s6023_s7, %s6018_s1  ;;  %p6027_p2 = scmp.lt.u32.totalorder %s6018_s1, %s6516_s11 }
  0x65   : > { %p6021_p1 = pnand %p6020_p13, %p6019_p4 }
  0x66   : > { %p6026_p11 = por %p6025_p6, %p6024_p8 }
  0x67   : > { %p6022_p5 = pneg %p6021_p1 }
  0x68   : > { %p6028_p3 = por %p6027_p2, %p6026_p11 }
  0x6a   : > { %p6029_p0 = pnand %p6028_p3, %p6022_p5 }
  0x6c   : > { %6032 = shalt.err (!%p6029_p0)
}
  0x6d   : > { %s6033_s2 = scalar_lea.vmem %s6526_s10, 2048  ;;  %s6243_s27 = smov [#allocation4]  }
  0x6e   : > { %p6034_p4 = scmp.ne.s32.totalorder %s6526_s10, %s6033_s2  ;;  %s6038_s28 = sshll.u32 %s6243_s27, 4  ;;  %s6039_s28 = int_to_ptr.vmem [resolvable:$false] %s6038_s28 }
  0x6f   : > { %s6040_s21 = scalar_lea.vmem %s6039_s28, 4096  ;;  %p6041_p7 = scmp.lt.s32.totalorder %s6526_s10, %s6039_s28 }
  0x70   : > { %p6036_p1 = pnand %p6034_p4, %p6020_p13  ;;  %p6042_p8 = scmp.lt.s32.totalorder %s6040_s21, %s6033_s2 }
  0x72   : > { %p6037_p12 = pneg %p6036_p1  ;;  %p6043_p6 = por %p6042_p8, %p6041_p7 }
  0x74   : > { %p6044_p2 = pnand %p6043_p6, %p6037_p12 }
  0x76   : > { %6047 = shalt.err (!%p6044_p2)
}
  0x77   : > { %s6244_s1 = smov 128   ;;  %s6245_s7 = smov 8  }
  0x78   : > { %5447 = dma.hbm_to_vmem [thread:$0]  (!%p6522_p10), %s6516_s11, 2048, %s6526_s10, %s6528_s30, %s6244_s1, %s6244_s1, %s6245_s7  }
  0x79   : > { %s4691_s20 = sshll.u32 %s6399_s19, 8  ;;  %s4823_s27 = sshll.u32 %s6230_s29, 12 }
  0x7a   : > { %s8657_s6 = sld [smem:[#allocation42_spill]]  ;;  %s472_s0 = scalar_lea.vmem [#allocation9], %s4691_s20 }
  0x7b   : > { %s479_s4 = sshll.u32 %s472_s0, 4  ;;  %s6567_s4 = int_to_ptr.vmem [resolvable:$true] %s479_s4 }
  0x80   : > { %s6563_s21 = scalar_lea.hbm %s8657_s6, %s4823_s27  ;;  %s6053_s10 = scalar_lea.hbm %s8657_s6, 8192 }
  0x81   : > { %s6048_s26 = scalar_lea.hbm %s6563_s21, 4096  ;;  %p6054_p0 = scmp.lt.u32.totalorder %s6563_s21, %s8657_s6 }
  0x82   : > { %p6049_p7 = scmp.ne.s32.totalorder %s6563_s21, %s6048_s26  ;;  %p6055_p10 = scmp.lt.u32.totalorder %s6053_s10, %s6048_s26 }
  0x83   : > { %p6057_p5 = scmp.lt.u32.totalorder %s6048_s26, %s6563_s21 }
  0x84   : > { %p6051_p3 = pnand %p6049_p7, %p6425_p9  ;;  %p6056_p13 = por %p6055_p10, %p6054_p0 }
  0x86   : > { %p6052_p12 = pneg %p6051_p3  ;;  %p6058_p11 = por %p6057_p5, %p6056_p13 }
  0x88   : > { %p6059_p4 = pnand %p6058_p11, %p6052_p12 }
  0x8a   : > { %6062 = shalt.err (!%p6059_p4)
}
  0x8b   : > { %s6063_s0 = scalar_lea.vmem %s6567_s4, 4096  ;;  %s6246_s7 = smov [#allocation9]  }
  0x8c   : > { %p6064_p1 = scmp.ne.s32.totalorder %s6567_s4, %s6063_s0  ;;  %s6068_s2 = sshll.u32 %s6246_s7, 4  ;;  %s6069_s2 = int_to_ptr.vmem [resolvable:$false] %s6068_s2 }
  0x8d   : > { %s6070_s28 = scalar_lea.vmem %s6069_s2, 8192  ;;  %p6071_p2 = scmp.lt.s32.totalorder %s6567_s4, %s6069_s2 }
  0x8e   : > { %p6066_p8 = pnand %p6064_p1, %p6425_p9  ;;  %p6072_p7 = scmp.lt.s32.totalorder %s6070_s28, %s6063_s0 }
  0x90   : > { %p6067_p6 = pneg %p6066_p8  ;;  %p6073_p3 = por %p6072_p7, %p6071_p2 }
  0x92   : > { %p6074_p0 = pnand %p6073_p3, %p6067_p6 }
  0x94   : > { %6077 = shalt.err (!%p6074_p0)
}
  0x95   : > { %s6247_s26 = smov 256   ;;  %s6248_s30 = smov 16  }
  0x96   : > { %p8658_p12 = scmp.ne.s32.totalorder %s8640_s17, 0  ;;  %s8659_s8 = sld [smem:[#allocation44_spill]] }
  0x97   : > { %s500_s1 = scalar_lea.vmem [#allocation10], %s4691_s20  ;;  %s497_s7 = scalar_lea.sflag [#allocation11], %s6399_s19 }
  0x98   : > { %5453 = dma.hbm_to_vmem [thread:$0]  (!%p8658_p12), %s6563_s21, 4096, %s6567_s4, %s6419_s16, %s6247_s26, %s6247_s26, %s6248_s30  }
  0x99   : > { %s507_s0 = sshll.u32 %s500_s1, 4  ;;  %s6600_s0 = int_to_ptr.vmem [resolvable:$true] %s507_s0 }
  0x9c   : > { %s6596_s5 = scalar_lea.hbm %s8659_s8, %s4823_s27  ;;  %s6083_s27 = scalar_lea.hbm %s8659_s8, 8192 }
  0x9d   : > { %s6078_s2 = scalar_lea.hbm %s6596_s5, 4096  ;;  %p6084_p11 = scmp.lt.u32.totalorder %s6596_s5, %s8659_s8 }
  0x9e   : > { %p6079_p10 = scmp.ne.s32.totalorder %s6596_s5, %s6078_s2  ;;  %p6085_p4 = scmp.lt.u32.totalorder %s6083_s27, %s6078_s2 }
  0x9f   : > { %p6087_p8 = scmp.lt.u32.totalorder %s6078_s2, %s6596_s5 }
  0xa0   : > { %p6081_p13 = pnand %p6079_p10, %p6425_p9  ;;  %p6086_p1 = por %p6085_p4, %p6084_p11 }
  0xa2   : > { %p6082_p5 = pneg %p6081_p13  ;;  %p6088_p6 = por %p6087_p8, %p6086_p1 }
  0xa4   : > { %p6089_p2 = pnand %p6088_p6, %p6082_p5 }
  0xa6   : > { %6092 = shalt.err (!%p6089_p2)
}
  0xa7   : > { %s6093_s20 = scalar_lea.vmem %s6600_s0, 4096  ;;  %s6249_s26 = smov [#allocation10]  }
  0xa8   : > { %p6094_p7 = scmp.ne.s32.totalorder %s6600_s0, %s6093_s20  ;;  %s6098_s30 = sshll.u32 %s6249_s26, 4  ;;  %s6099_s30 = int_to_ptr.vmem [resolvable:$false] %s6098_s30 }
  0xa9   : > { %s6100_s11 = scalar_lea.vmem %s6099_s30, 8192  ;;  %p6101_p10 = scmp.lt.s32.totalorder %s6600_s0, %s6099_s30 }
  0xaa   : > { %p6096_p3 = pnand %p6094_p7, %p6425_p9  ;;  %p6102_p13 = scmp.lt.s32.totalorder %s6100_s11, %s6093_s20 }
  0xac   : > { %p6097_p0 = pneg %p6096_p3  ;;  %p6103_p11 = por %p6102_p13, %p6101_p10 }
  0xae   : > { %p6104_p4 = pnand %p6103_p11, %p6097_p0 }
  0xb0   : > { %6107 = shalt.err (!%p6104_p4)
}
  0xb1   : > { %s8660_s10 = smov 4   ;;  %s8661_s1 = smov 64  }
  0xb2   : > { %5456 = dma.hbm_to_vmem [thread:$0]  (!%p8658_p12), %s6596_s5, 4096, %s6600_s0, %s497_s7, %s8661_s1, %s8661_s1, %s8660_s10  }
  0xb3   : > { %p8662_p9 = scmp.ne.s32.totalorder %s8642_s14, 0 }
  0xb5   : > { %537 = sbr.rel (%p8662_p9) target bundleno = 4428 (0x114c), region = 68 }
  0xbc   : > { %s6632_s9 = sand.u32 1, %s6214_s25   ;;  %p8663_p5 = scmp.ne.s32.totalorder %s8647_s15, 0 }
  0xbd   : > { %s8608_s2 = sshll.u32 %s6632_s9, 7  ;;  %s540_s17 = scalar_lea.sflag [#allocation5], %s6632_s9 }
  0xbe   : > { %s6638_s4 = scalar_lea.vmem [#allocation4], %s8608_s2 }
  0xbf   : > { %6181 = dma.done.wait (%p8663_p5), %s540_s17, 2048  }
  0xc0   : > { %6183 = vsyncadd (%p8663_p5), %s540_s17, 4294965248  ;;  %s548_s19 = sand.u32 1, %s6459_s18   ;;  %s550_s14 = sand.u32 1, %s6202_s22  }
  0xc1   : > { %s4699_s5 = sshll.u32 %s550_s14, 6  ;;  %s549_s0 = scalar_lea.sflag [#allocation8], %s548_s19 }
  0xc2   : > { %s6646_s7 = scalar_lea.vmem [#allocation7], %s4699_s5  ;;  %p8664_p12 = scmp.ne.s32.totalorder %s8649_s23, 0 }
  0xc4   : > { %6185 = dma.done.wait (%p8664_p12), %s549_s0, 5120  }
  0xc5   : > { %6187 = vsyncadd (%p8664_p12), %s549_s0, 4294962176  ;;  %s4700_s16 = sshll.u32 %s550_s14, 8  ;;  %s567_s15 = scalar_lea.sflag [#allocation11], %s550_s14 }
  0xc6   : > { %s6652_s27 = scalar_lea.vmem [#allocation9], %s4700_s16  ;;  %s6654_s21 = scalar_lea.vmem [#allocation10], %s4700_s16 }
  0xc7   : > { %6189 = dma.done.wait (%p8664_p12), %s567_s15, 4096  }
  0xc8   : > { %6191 = vsyncadd (%p8664_p12), %s567_s15, 4294963200  ;;  %s8665_s18 = sld [smem:[#allocation23_spill]]  ;;  %s8666_s28 = sld [smem:[#allocation22_spill]] }
  0xc9   : > { %s8667_s11 = sld [smem:[#allocation37_spill]]  ;;  %s8670_s26 = sld [smem:[#allocation41_spill]] }
  0xca   : > { %s8671_s25 = sld [smem:[#allocation43_spill]]  ;;  %s8672_s3 = sld [smem:[#allocation45_spill]] }
  0xcb   : > { %s8673_s17 = sld [smem:[#allocation46_spill]]  ;;  %s8674_s0 = sld [smem:[#allocation47_spill]] }
  0xcc   : > { %s8675_s2 = sshll.u32 %s6632_s9, 7 }
  0xcd   : > { %s6703_s15 = scalar_lea.vmem [#allocation12], %s8675_s2 }
  0xce   : > { %p651_p1 = scmp.lt.s32.totalorder %s8665_s18, 1  ;;  %p654_p8 = scmp.lt.s32.totalorder %s8666_s28, 1 }
  0xcf   : > { %p4704_p6 = scmp.ne.s32.totalorder %s8666_s28, 0 }
  0xd0   : > { %s8717_s18 = smov (!%p651_p1, %s8665_s18), 1  ;;  %v681_v0 = vld [vmem:[%s6638_s4] sm:$0xff] (!%p4704_p6)  ;;  %v682_v1 = vld [vmem:[%s6638_s4 + $0x8] sm:$0xff] (!%p4704_p6)  ;;  %v683_v2 = vld [vmem:[%s6638_s4 + $0x10] sm:$0xff] (!%p4704_p6) }
  0xd1   : > { %s6664_s20 = scalar_select %p654_p8, %s8666_s28, 1 }
  0xd2   : > { %s6669_s23 = scalar_lea.vmem %s8667_s11, %s8717_s18  ;;  %680 = sbr.rel (%p4704_p6) target bundleno = 218 (0xda), region = 88  ;;  %697 = vst [vmem:[#allocation2] sm:$0xff] (!%p4704_p6), %v681_v0  ;;  %698 = vst [vmem:[#allocation2 + $0x8] sm:$0xff] (!%p4704_p6), %v682_v1  ;;  %v684_v3 = vld [vmem:[%s6638_s4 + $0x18] sm:$0xff] (!%p4704_p6)  ;;  %v685_v4 = vld [vmem:[%s6638_s4 + $0x20] sm:$0xff] (!%p4704_p6) }
  0xd3   : > { %s662_s30 = scalar_lea.vmem %s8670_s26, %s6664_s20  ;;  %s4703_s6 = sshll.u32 %s6664_s20, 2  ;;  %699 = vst [vmem:[#allocation2 + $0x10] sm:$0xff] (!%p4704_p6), %v683_v2  ;;  %v686_v5 = vld [vmem:[%s6638_s4 + $0x28] sm:$0xff] (!%p4704_p6)  ;;  %700 = vst [vmem:[#allocation2 + $0x18] sm:$0xff] (!%p4704_p6), %v684_v3  ;;  %v687_v6 = vld [vmem:[%s6638_s4 + $0x30] sm:$0xff] (!%p4704_p6) }
  0xd4   : > { %s6687_s22 = scalar_lea.vmem %s8671_s25, %s4703_s6  ;;  %s669_s24 = scalar_lea.vmem %s8672_s3, %s6664_s20  ;;  %701 = vst [vmem:[#allocation2 + $0x20] sm:$0xff] (!%p4704_p6), %v685_v4  ;;  %702 = vst [vmem:[#allocation2 + $0x28] sm:$0xff] (!%p4704_p6), %v686_v5  ;;  %v688_v7 = vld [vmem:[%s6638_s4 + $0x38] sm:$0xff] (!%p4704_p6)  ;;  %v689_v8 = vld [vmem:[%s6638_s4 + $0x40] sm:$0xff] (!%p4704_p6) }
  0xd5   : > { %s672_s19 = scalar_lea.vmem %s8673_s17, %s6664_s20  ;;  %s675_s16 = scalar_lea.vmem %s8674_s0, %s6664_s20  ;;  %703 = vst [vmem:[#allocation2 + $0x30] sm:$0xff] (!%p4704_p6), %v687_v6  ;;  %704 = vst [vmem:[#allocation2 + $0x38] sm:$0xff] (!%p4704_p6), %v688_v7  ;;  %v690_v9 = vld [vmem:[%s6638_s4 + $0x48] sm:$0xff] (!%p4704_p6)  ;;  %v691_v10 = vld [vmem:[%s6638_s4 + $0x50] sm:$0xff] (!%p4704_p6) }
  0xd6   : > { %705 = vst [vmem:[#allocation2 + $0x40] sm:$0xff] (!%p4704_p6), %v689_v8  ;;  %v692_v11 = vld [vmem:[%s6638_s4 + $0x58] sm:$0xff] (!%p4704_p6)  ;;  %706 = vst [vmem:[#allocation2 + $0x48] sm:$0xff] (!%p4704_p6), %v690_v9  ;;  %v693_v12 = vld [vmem:[%s6638_s4 + $0x60] sm:$0xff] (!%p4704_p6) }
  0xd7   : > { %707 = vst [vmem:[#allocation2 + $0x50] sm:$0xff] (!%p4704_p6), %v691_v10  ;;  %708 = vst [vmem:[#allocation2 + $0x58] sm:$0xff] (!%p4704_p6), %v692_v11  ;;  %v694_v13 = vld [vmem:[%s6638_s4 + $0x68] sm:$0xff] (!%p4704_p6)  ;;  %v695_v14 = vld [vmem:[%s6638_s4 + $0x70] sm:$0xff] (!%p4704_p6) }
  0xd8   : > { %709 = vst [vmem:[#allocation2 + $0x60] sm:$0xff] (!%p4704_p6), %v693_v12  ;;  %710 = vst [vmem:[#allocation2 + $0x68] sm:$0xff] (!%p4704_p6), %v694_v13  ;;  %v696_v15 = vld [vmem:[%s6638_s4 + $0x78] sm:$0xff] (!%p4704_p6) }
  0xd9   : > { %711 = vst [vmem:[#allocation2 + $0x70] sm:$0xff] %v695_v14  ;;  %712 = vst [vmem:[#allocation2 + $0x78] sm:$0xff] %v696_v15 }
  0xda PF: > { %v713_v16 = vld [vmem:[#allocation2] sm:$0xff]  ;;  %v714_v17 = vld [vmem:[#allocation2 + $0x8] sm:$0xff]  ;;  %vm768_vm0 = vcmask 261120   ;;  %s6250_s3 = smov 96   ;;  %s6251_s6 = smov 64   ;;  %vm1693_vm1 = vcmask 523520  }
  0xdb   : > { %v6722_v18 = vld [vmem:[#allocation2 + $0x10] sm:$0xff]  ;;  %v6724_v19 = vpack.c.bf16 %v714_v17, %v713_v16  ;;  %v6726_v20 = vld [vmem:[#allocation2 + $0x18] sm:$0xff]  ;;  %v729_v21 = vmul.f32 0.088388346, %v713_v16  ;;  %v730_v23 = vmul.f32 0.088388346, %v714_v17 }
  0xdc   : > { %v6730_v22 = vpack.c.bf16 %v6726_v20, %v6722_v18  ;;  %v717_v26 = vld [vmem:[#allocation2 + $0x20] sm:$0xff]  ;;  %v718_v27 = vld [vmem:[#allocation2 + $0x28] sm:$0xff]  ;;  %v731_v51 = vmul.f32 0.088388346, %v6722_v18  ;;  %v732_v52 = vmul.f32 0.088388346, %v6726_v20 }
  0xdd   : > { %5402 = vmatprep.subr.msk.bf16.mxu0 %vm768_vm0, %v6724_v19  ;;  %v794_v24 = vsel %vm768_vm0, %v6724_v19, 0  ;;  %1211 = vrot.lane.b32.xlu0 %v6724_v19, %s6250_s3  ;;  %v6742_v25 = vpack.c.bf16 %v730_v23, %v729_v21  ;;  %v6751_v29 = vpack.c.bf16 %v718_v27, %v717_v26  ;;  %v719_v30 = vld [vmem:[#allocation2 + $0x30] sm:$0xff]  ;;  %v720_v31 = vld [vmem:[#allocation2 + $0x38] sm:$0xff]  ;;  %v733_v53 = vmul.f32 0.088388346, %v717_v26  ;;  %s6252_s8 = smov 32  }
  0xde   : > { %5099 = vmatpush3.bf16.xpose.msra.mxu0 %v794_v24  ;;  %1213 = vrot.lane.b32.xlu1 %v6730_v22, %s6250_s3  ;;  %v797_v28 = vsel %vm768_vm0, %v6730_v22, 0  ;;  %v721_v32 = vld [vmem:[#allocation2 + $0x40] sm:$0xff]  ;;  %v722_v33 = vld [vmem:[#allocation2 + $0x48] sm:$0xff]  ;;  %v6757_v34 = vpack.c.bf16 %v720_v31, %v719_v30  ;;  %v734_v54 = vmul.f32 0.088388346, %v718_v27  ;;  %v6802_v55 = vpack.c.bf16 %v732_v52, %v731_v51  ;;  %s8686_s4 = sld [smem:[#allocation39_spill]] }
  0xdf   : > { %5403 = vmatprep.subr.msk.bf16.mxu0 %vm768_vm0, %v6730_v22  ;;  %5130 = vmatprep.subr.bf16.mxu1 %v6724_v19  ;;  %v723_v35 = vld [vmem:[#allocation2 + $0x50] sm:$0xff]  ;;  %v724_v36 = vld [vmem:[#allocation2 + $0x58] sm:$0xff]  ;;  %v800_v37 = vsel %vm768_vm0, %v6751_v29, 0  ;;  %v6763_v38 = vpack.c.bf16 %v722_v33, %v721_v32  ;;  %v735_v57 = vmul.f32 0.088388346, %v719_v30  ;;  %vm2208_vm2 = vcmask 785920  }
  0xe0   : > { %5131 = vmatpush3.bf16.msra.mxu1 %v6724_v19  ;;  %5114 = vmatprep.mubr.msk.bf16.mxu0 %vm768_vm0, %v6742_v25  ;;  %v725_v39 = vld [vmem:[#allocation2 + $0x60] sm:$0xff]  ;;  %v726_v40 = vld [vmem:[#allocation2 + $0x68] sm:$0xff]  ;;  %v6769_v41 = vpack.c.bf16 %v724_v36, %v723_v35  ;;  %v727_v42 = vld [vmem:[#allocation2 + $0x70] sm:$0xff]  ;;  %v803_v44 = vsel %vm768_vm0, %v6757_v34, 0  ;;  %v6804_v56 = vpack.c.bf16 %v734_v54, %v733_v53  ;;  %v736_v58 = vmul.f32 0.088388346, %v720_v31 }
  0xe1   : > { %5132 = vmatprep.subr.bf16.mxu1 %v6730_v22  ;;  %v728_v43 = vld [vmem:[#allocation2 + $0x78] sm:$0xff]  ;;  %v806_v45 = vsel %vm768_vm0, %v6763_v38, 0  ;;  %v6779_v47 = vpack.c.bf16 %v726_v40, %v725_v39  ;;  %v737_v59 = vmul.f32 0.088388346, %v721_v32  ;;  %v738_v60 = vmul.f32 0.088388346, %v722_v33 }
  0xe2   : > { %v809_v46 = vsel %vm768_vm0, %v6769_v41, 0  ;;  %v6785_v48 = vpack.c.bf16 %v728_v43, %v727_v42  ;;  %v6810_v61 = vpack.c.bf16 %v736_v58, %v735_v57  ;;  %v739_v63 = vmul.f32 0.088388346, %v723_v35  ;;  %v6841_v10 = vld [vmem:[%s6669_s23] ss:$0 sm:$0xff]  ;;  %s4443_s25 = scalar_lea.sflag [#allocation6], %s6632_s9 }
  0xe3   : > { %v812_v49 = vsel %vm768_vm0, %v6779_v47, 0  ;;  %v6812_v62 = vpack.c.bf16 %v738_v60, %v737_v59  ;;  %v740_v0 = vmul.f32 0.088388346, %v724_v36  ;;  %v741_v1 = vmul.f32 0.088388346, %v725_v39  ;;  %p8696_p7 = scmp.ne.s32.totalorder %s8650_s12, 0 }
  0xe4   : > { %5133 = vmatpush3.bf16.msra.mxu1 %v6730_v22  ;;  %v815_v50 = vsel %vm768_vm0, %v6785_v48, 0  ;;  %v742_v2 = vmul.f32 0.088388346, %v726_v40  ;;  %v743_v5 = vmul.f32 0.088388346, %v727_v42  ;;  %vm2723_vm3 = vcmask 1048320  }
  0xe5   : > { %5134 = vmatprep.subr.bf16.mxu1 %v6751_v29  ;;  %v6818_v3 = vpack.c.bf16 %v740_v0, %v739_v63  ;;  %v744_v6 = vmul.f32 0.088388346, %v728_v43 }
  0xe6   : > { %5101 = vmatpush3.bf16.xpose.msra.mxu0 %v797_v28  ;;  %v6820_v4 = vpack.c.bf16 %v742_v2, %v741_v1 }
  0xe7   : > { %5404 = vmatprep.subr.msk.bf16.mxu0 %vm768_vm0, %v6751_v29  ;;  %v6826_v7 = vpack.c.bf16 %v744_v6, %v743_v5 }
  0xe8   : > { %5135 = vmatpush3.bf16.msra.mxu1 %v6751_v29 }
  0xe9   : > { %5136 = vmatprep.subr.bf16.mxu1 %v6757_v34 }
  0xec   : > { %5137 = vmatpush3.bf16.msra.mxu1 %v6757_v34 }
  0xed   : > { %5138 = vmatprep.subr.bf16.mxu1 %v6763_v38 }
  0xee   : > { %5103 = vmatpush3.bf16.xpose.msra.mxu0 %v800_v37 }
  0xef   : > { %5405 = vmatprep.subr.msk.bf16.mxu0 %vm768_vm0, %v6757_v34 }
  0xf0   : > { %5139 = vmatpush3.bf16.msra.mxu1 %v6763_v38 }
  0xf1   : > { %5140 = vmatprep.subr.bf16.mxu1 %v6769_v41 }
  0xf4   : > { %5141 = vmatpush3.bf16.msra.mxu1 %v6769_v41 }
  0xf5   : > { %5142 = vmatprep.subr.bf16.mxu1 %v6779_v47 }
  0xf6   : > { %5105 = vmatpush3.bf16.xpose.msra.mxu0 %v803_v44 }
  0xf7   : > { %5406 = vmatprep.subr.msk.bf16.mxu0 %vm768_vm0, %v6763_v38 }
  0xf8   : > { %5143 = vmatpush3.bf16.msra.mxu1 %v6779_v47 }
  0xf9   : > { %5144 = vmatprep.subr.bf16.mxu1 %v6785_v48 }
  0xfc   : > { %5145 = vmatpush3.bf16.msra.mxu1 %v6785_v48 }
  0xfe   : > { %5107 = vmatpush3.bf16.xpose.msra.mxu0 %v806_v45 }
  0xff   : > { %5407 = vmatprep.subr.msk.bf16.mxu0 %vm768_vm0, %v6769_v41 }
 0x106   : > { %5109 = vmatpush3.bf16.xpose.msra.mxu0 %v809_v46 }
 0x107   : > { %5408 = vmatprep.subr.msk.bf16.mxu0 %vm768_vm0, %v6779_v47 }
 0x10e   : > { %5111 = vmatpush3.bf16.xpose.msra.mxu0 %v812_v49 }
 0x10f   : > { %5409 = vmatprep.subr.msk.bf16.mxu0 %vm768_vm0, %v6785_v48 }
 0x116   : > { %5113 = vmatpush3.bf16.xpose.msra.mxu0 %v815_v50 }
 0x11d   : > { %5115 = vmatmul.mubr.msk.bf16.vlgmr.msra.gmra.mrb[0].mxu0 %vm768_vm0, %v6802_v55 }
 0x11e   : > { %5118 = vmatprep.mubr.msk.bf16.mxu0 %vm768_vm0, %v6804_v56 }
 0x125   : > { %5119 = vmatmul.mubr.msk.bf16.gmra.mrb[4].mxu0 %vm768_vm0, %v6810_v61 }
 0x126   : > { %5122 = vmatprep.mubr.msk.bf16.mxu0 %vm768_vm0, %v6812_v62 }
 0x12d   : > { %5123 = vmatmul.mubr.msk.bf16.gmra.mrb[8].mxu0 %vm768_vm0, %v6818_v3 }
 0x12e   : > { %5126 = vmatprep.mubr.msk.bf16.mxu0 %vm768_vm0, %v6820_v4 }
 0x135   : > { %5127 = vmatmul.mubr.msk.bf16.gmra.mrb[12].mxu0 %vm768_vm0, %v6826_v7 }
 0x14f   : > { %v6830_v8 = vpop.permute.xlu0 %1211 }
 0x150   : > { %5194 = vmatprep.subr.bf16.mxu0 %v6830_v8  ;;  %5410 = vmatprep.subr.msk.bf16.mxu1 %vm768_vm0, %v6830_v8  ;;  %v6836_v9 = vpop.permute.xlu1 %1213 }
 0x151   : > { %5195 = vmatpush3.bf16.msra.mxu0 %v6830_v8 }
 0x152   : > { %5196 = vmatprep.subr.bf16.mxu0 %v6836_v9 }
 0x155   : > { %5197 = vmatpush3.bf16.msra.mxu0 %v6836_v9 }
 0x1f0   : > { %v5116_v11 = vpop.f32.mrb[0].mxu0 }
 0x1f1   : > { %v860_v12 = vadd.f32 %v5116_v11, %v6841_v10  ;;  %v851_v13 = vpop.f32.mrb[1].mxu0 }
 0x1f2   : > { %v852_v14 = vadd.f32 %v6841_v10, %v851_v13  ;;  %v5117_v15 = vpop.f32.mrb[2].mxu0 }
 0x1f3   : > { %918 = vmax.xlane.f32.xlu1 %v860_v12  ;;  %v854_v16 = vpop.f32.mrb[3].mxu0  ;;  %v863_v17 = vadd.f32 %v5117_v15, %v6841_v10 }
 0x1f4   : > { %914 = vmax.xlane.f32.xlu0 %v852_v14  ;;  %v855_v18 = vadd.f32 %v6841_v10, %v854_v16 }
 0x1f7   : > { %920 = vmax.xlane.f32.xlu1 %v863_v17 }
 0x1f8   : > { %v5120_v20 = vpop.f32.mrb[4].mxu0  ;;  %916 = vmax.xlane.f32.xlu0 %v855_v18 }
 0x1f9   : > { %v6848_v21 = vadd.f32 %v5120_v20, %v6841_v10  ;;  %v867_v23 = vpop.f32.mrb[5].mxu0 }
 0x1fa   : > { %v5121_v24 = vpop.f32.mrb[6].mxu0  ;;  %v6854_v28 = vadd.f32 %v6841_v10, %v867_v23 }
 0x1fb   : > { %v6851_v26 = vadd.f32 %v5121_v24, %v6841_v10  ;;  %v870_v27 = vpop.f32.mrb[7].mxu0 }
 0x1fc   : > { %926 = vmax.xlane.f32.xlu0 %v6848_v21  ;;  %v6859_v30 = vadd.f32 %v6841_v10, %v870_v27 }
 0x1fd   : > { %928 = vmax.xlane.f32.xlu1 %v6851_v26 }
 0x200   : > { %v5124_v31 = vpop.f32.mrb[8].mxu0  ;;  %922 = vmax.xlane.f32.xlu0 %v6854_v28 }
 0x201   : > { %v6863_v32 = vadd.f32 %v5124_v31, %v6841_v10  ;;  %v883_v33 = vpop.f32.mrb[9].mxu0  ;;  %924 = vmax.xlane.f32.xlu1 %v6859_v30 }
 0x202   : > { %v5125_v35 = vpop.f32.mrb[10].mxu0  ;;  %v6870_v39 = vadd.f32 %v6841_v10, %v883_v33 }
 0x203   : > { %v6867_v36 = vadd.f32 %v5125_v35, %v6841_v10  ;;  %v886_v37 = vpop.f32.mrb[11].mxu0 }
 0x204   : > { %934 = vmax.xlane.f32.xlu0 %v6863_v32  ;;  %v6875_v40 = vadd.f32 %v6841_v10, %v886_v37 }
 0x205   : > { %936 = vmax.xlane.f32.xlu1 %v6867_v36 }
 0x208   : > { %930 = vmax.xlane.f32.xlu0 %v6870_v39  ;;  %v5128_v42 = vpop.f32.mrb[12].mxu0 }
 0x209   : > { %v6879_v43 = vadd.f32 %v5128_v42, %v6841_v10  ;;  %932 = vmax.xlane.f32.xlu1 %v6875_v40  ;;  %v899_v44 = vpop.f32.mrb[13].mxu0 }
 0x20a   : > { %v5129_v45 = vpop.f32.mrb[14].mxu0  ;;  %v6884_v49 = vadd.f32 %v6841_v10, %v899_v44 }
 0x20b   : > { %v902_v46 = vpop.f32.mrb[15].mxu0  ;;  %v6892_v50 = vadd.f32 %v5129_v45, %v6841_v10 }
 0x20c   : > { %942 = vmax.xlane.f32.xlu0 %v6879_v43  ;;  %v6896_v51 = vadd.f32 %v6841_v10, %v902_v46 }
 0x210   : > { %938 = vmax.xlane.f32.xlu0 %v6884_v49 }
 0x21a   : > { %1217 = vrot.lane.b32.xlu1 %v6757_v34, %s6250_s3 }
 0x226   : > { %1215 = vrot.lane.b32.xlu0 %v6751_v29, %s6250_s3 }
 0x23e   : > { %944 = vmax.xlane.f32.xlu1 %v6892_v50 }
 0x242   : > { %940 = vmax.xlane.f32.xlu1 %v6896_v51 }
 0x280   : > { %v919_v52 = vpop.xlane.xlu1 %918 }
 0x281   : > { %v948_v53 = vsub.f32 %v860_v12, %v919_v52  ;;  %v915_v54 = vpop.xlane.xlu0 %914 }
 0x282   : > { %v946_v57 = vsub.f32 %v852_v14, %v915_v54 }
 0x283   : > { %v966_v58 = vmul.f32 1.442695, %v948_v53 }
 0x284   : > { %v962_v59 = vmul.f32 1.442695, %v946_v57  ;;  %v921_v60 = vpop.xlane.xlu1 %920 }
 0x285   : > { %5651 = vpow2.f32 %v966_v58  ;;  %v949_v63 = vsub.f32 %v863_v17, %v921_v60  ;;  %v917_v0 = vpop.xlane.xlu0 %916 }
 0x286   : > { %v947_v1 = vsub.f32 %v855_v18, %v917_v0  ;;  %5653 = vpow2.f32 %v962_v59 }
 0x287   : > { %v968_v2 = vmul.f32 1.442695, %v949_v63 }
 0x288   : > { %v964_v5 = vmul.f32 1.442695, %v947_v1 }
 0x289   : > { %5655 = vpow2.f32 %v968_v2  ;;  %v927_v6 = vpop.xlane.xlu0 %926 }
 0x28a   : > { %v929_v11 = vpop.xlane.xlu1 %928  ;;  %5657 = vpow2.f32 %v964_v5  ;;  %v952_v37 = vsub.f32 %v6848_v21, %v927_v6 }
 0x28b   : > { %v953_v46 = vsub.f32 %v6851_v26, %v929_v11 }
 0x28c   : > { %v974_v44 = vmul.f32 1.442695, %v952_v37 }
 0x28d   : > { %v923_v13 = vpop.xlane.xlu0 %922  ;;  %v976_v57 = vmul.f32 1.442695, %v953_v46 }
 0x28e   : > { %v925_v12 = vpop.xlane.xlu1 %924  ;;  %v950_v42 = vsub.f32 %v6854_v28, %v923_v13  ;;  %5659 = vpow2.f32 %v974_v44 }
 0x28f   : > { %v6899_v15 = vpop.eup %5651  ;;  %v951_v45 = vsub.f32 %v6859_v30, %v925_v12 }
 0x290   : > { %998 = vadd.xlane.f32.xlu0 %v6899_v15  ;;  %v6902_v16 = vpop.eup %5653  ;;  %v970_v52 = vmul.f32 1.442695, %v950_v42 }
 0x291   : > { %v935_v14 = vpop.xlane.xlu0 %934  ;;  %v972_v53 = vmul.f32 1.442695, %v951_v45 }
 0x292   : > { %v937_v23 = vpop.xlane.xlu1 %936  ;;  %5661 = vpow2.f32 %v970_v52  ;;  %v956_v58 = vsub.f32 %v6863_v32, %v935_v14 }
 0x293   : > { %v6904_v20 = vpop.eup %5655  ;;  %5663 = vpow2.f32 %v972_v53 }
 0x294   : > { %1000 = vadd.xlane.f32.xlu1 %v6904_v20  ;;  %994 = vadd.xlane.f32.xlu0 %v6902_v16  ;;  %v6908_v18 = vpop.eup %5657  ;;  %5665 = vpow2.f32 %v976_v57  ;;  %v982_v28 = vmul.f32 1.442695, %v956_v58 }
 0x295   : > { %v931_v17 = vpop.xlane.xlu0 %930 }
 0x296   : > { %v933_v27 = vpop.xlane.xlu1 %932  ;;  %v954_v60 = vsub.f32 %v6870_v39, %v931_v17 }
 0x297   : > { %v955_v2 = vsub.f32 %v6875_v40, %v933_v27 }
 0x298   : > { %996 = vadd.xlane.f32.xlu1 %v6908_v18  ;;  %v6931_v26 = vpop.eup %5659  ;;  %v978_v63 = vmul.f32 1.442695, %v954_v60 }
 0x299   : > { %v943_v24 = vpop.xlane.xlu0 %942 }
 0x29a   : > { %v6914_v35 = vpop.permute.xlu1 %1217  ;;  %v960_v54 = vsub.f32 %v6879_v43, %v943_v24  ;;  %v957_v43 = vsub.f32 %v6867_v36, %v937_v23 }
 0x29c   : > { %v990_v59 = vmul.f32 1.442695, %v960_v54  ;;  %v6935_v32 = vpop.eup %5661  ;;  %v984_v39 = vmul.f32 1.442695, %v957_v43  ;;  %v1252_v43 = vsel %vm768_vm0, %v6830_v8, 0  ;;  %v1261_v8 = vsel %vm768_vm0, %v6914_v35, 0 }
 0x29d   : > { %v939_v31 = vpop.xlane.xlu0 %938  ;;  %v6937_v1 = vpop.eup %5663 }
 0x29e   : > { %v958_v21 = vsub.f32 %v6884_v49, %v939_v31  ;;  %5667 = vpow2.f32 %v990_v59  ;;  %v6943_v6 = vpop.eup %5665 }
 0x29f   : > { %5669 = vpow2.f32 %v982_v28 }
 0x2a0   : > { %v986_v30 = vmul.f32 1.442695, %v958_v21 }
 0x2a1   : > { %v6911_v33 = vpop.permute.xlu0 %1215 }
 0x2a2   : > { %5198 = vmatprep.subr.bf16.mxu0 %v6911_v33  ;;  %5671 = vpow2.f32 %v986_v30 }
 0x2a3   : > { %5199 = vmatpush3.bf16.msra.mxu0 %v6911_v33  ;;  %5673 = vpow2.f32 %v978_v63 }
 0x2a4   : > { %5200 = vmatprep.subr.bf16.mxu0 %v6914_v35 }
 0x2a7   : > { %5201 = vmatpush3.bf16.msra.mxu0 %v6914_v35 }
 0x2a8   : > { %v6945_v11 = vpop.eup %5667 }
 0x2a9   : > { %1221 = vrot.lane.b32.xlu1 %v6769_v41, %s6250_s3  ;;  %v6950_v12 = vpop.eup %5669 }
 0x2aa   : > { %1219 = vrot.lane.b32.xlu0 %v6763_v38, %s6250_s3 }
 0x2ac   : > { %v6952_v14 = vpop.eup %5671 }
 0x2ad   : > { %v6956_v17 = vpop.eup %5673 }
 0x2c9   : > { %1006 = vadd.xlane.f32.xlu0 %v6931_v26 }
 0x2cb   : > { %v945_v0 = vpop.xlane.xlu1 %944 }
 0x2cc   : > { %v961_v49 = vsub.f32 %v6892_v50, %v945_v0  ;;  %v980_v50 = vmul.f32 1.442695, %v955_v2 }
 0x2cd   : > { %1004 = vadd.xlane.f32.xlu0 %v6937_v1  ;;  %1002 = vadd.xlane.f32.xlu1 %v6935_v32 }
 0x2ce   : > { %v992_v5 = vmul.f32 1.442695, %v961_v49 }
 0x2cf   : > { %v941_v36 = vpop.xlane.xlu1 %940 }
 0x2d0   : > { %5675 = vpow2.f32 %v992_v5  ;;  %v959_v13 = vsub.f32 %v6896_v51, %v941_v36 }
 0x2d1   : > { %1008 = vadd.xlane.f32.xlu1 %v6943_v6  ;;  %1022 = vadd.xlane.f32.xlu0 %v6945_v11  ;;  %5677 = vpow2.f32 %v984_v39 }
 0x2d2   : > { %5679 = vpow2.f32 %v980_v50  ;;  %v988_v40 = vmul.f32 1.442695, %v959_v13 }
 0x2d4   : > { %5681 = vpow2.f32 %v988_v40 }
 0x2d5   : > { %1014 = vadd.xlane.f32.xlu1 %v6950_v12  ;;  %1018 = vadd.xlane.f32.xlu0 %v6952_v14 }
 0x2d9   : > { %1010 = vadd.xlane.f32.xlu1 %v6956_v17 }
 0x2da   : > { %v6959_v23 = vpop.eup %5675 }
 0x2db   : > { %1024 = vadd.xlane.f32.xlu0 %v6959_v23  ;;  %v6962_v51 = vpop.eup %5677 }
 0x2dc   : > { %v6965_v24 = vpop.eup %5679 }
 0x2dd   : > { %1016 = vadd.xlane.f32.xlu1 %v6962_v51 }
 0x2de   : > { %v6968_v27 = vpop.eup %5681 }
 0x2e1   : > { %1012 = vadd.xlane.f32.xlu1 %v6965_v24 }
 0x2e5   : > { %1020 = vadd.xlane.f32.xlu1 %v6968_v27 }
 0x2f1   : > { %1223 = vrot.lane.b32.xlu0 %v6779_v47, %s6250_s3 }
 0x2f5   : > { %1187 = vrot.lane.b32.xlu0 %v6742_v25, %s6250_s3 }
 0x2f6   : > { %1225 = vrot.lane.b32.xlu1 %v6785_v48, %s6250_s3 }
 0x2f9   : > { %1191 = vrot.lane.b32.xlu0 %v6804_v56, %s6250_s3 }
 0x2fa   : > { %1189 = vrot.lane.b32.xlu1 %v6802_v55, %s6250_s3 }
 0x2fd   : > { %1195 = vrot.lane.b32.xlu0 %v6812_v62, %s6250_s3 }
 0x2fe   : > { %1193 = vrot.lane.b32.xlu1 %v6810_v61, %s6250_s3 }
 0x301   : > { %1199 = vrot.lane.b32.xlu0 %v6820_v4, %s6250_s3 }
 0x302   : > { %1197 = vrot.lane.b32.xlu1 %v6818_v3, %s6250_s3 }
 0x305   : > { %1726 = vrot.lane.b32.xlu0 %v6724_v19, %s6251_s6 }
 0x306   : > { %1201 = vrot.lane.b32.xlu1 %v6826_v7, %s6250_s3 }
 0x30a   : > { %1728 = vrot.lane.b32.xlu1 %v6730_v22, %s6251_s6 }
 0x31d   : > { %v999_v31 = vpop.xlane.xlu0 %998 }
 0x321   : > { %v1001_v37 = vpop.xlane.xlu1 %1000  ;;  %v995_v42 = vpop.xlane.xlu0 %994 }
 0x322   : > { %5683 = vrcp.f32 %v1001_v37 }
 0x323   : > { %5685 = vrcp.f32 %v995_v42 }
 0x324   : > { %5687 = vrcp.f32 %v999_v31 }
 0x325   : > { %v997_v44 = vpop.xlane.xlu1 %996  ;;  %v1220_v45 = vpop.permute.xlu0 %1219 }
 0x326   : > { %5689 = vrcp.f32 %v997_v44  ;;  %5202 = vmatprep.subr.bf16.mxu0 %v1220_v45 }
 0x327   : > { %5203 = vmatpush3.bf16.msra.mxu0 %v1220_v45 }
 0x329   : > { %v1222_v46 = vpop.permute.xlu1 %1221 }
 0x32a   : > { %5204 = vmatprep.subr.bf16.mxu0 %v1222_v46  ;;  %v1267_v0 = vsel %vm768_vm0, %v1222_v46, 0 }
 0x32b   : > { %5205 = vmatpush3.bf16.msra.mxu0 %v1222_v46 }
 0x32c   : > { %v5684_v52 = vpop.eup %5683 }
 0x32d   : > { %v5686_v53 = vpop.eup %5685  ;;  %v1045_v58 = vmul.f32 %v5684_v52, %v6904_v20  ;;  %v1255_v20 = vsel %vm768_vm0, %v6836_v9, 0 }
 0x32e   : > { %v5688_v54 = vpop.eup %5687  ;;  %v1042_v59 = vmul.f32 %v5686_v53, %v6902_v16  ;;  %v1264_v16 = vsel %vm768_vm0, %v1220_v45, 0 }
 0x32f   : > { %v1044_v28 = vmul.f32 %v5688_v54, %v6899_v15  ;;  %v1258_v15 = vsel %vm768_vm0, %v6911_v33, 0 }
 0x330   : > { %v5690_v57 = vpop.eup %5689 }
 0x331   : > { %v1043_v21 = vmul.f32 %v5690_v57, %v6908_v18  ;;  %v1059_v30 = vpack.c.bf16 %v1045_v58, %v1044_v28 }
 0x333   : > { %v1058_v60 = vpack.c.bf16 %v1043_v21, %v1042_v59 }
 0x335   : > { %5146 = vmatprep.mubr.bf16.mxu1 %v1058_v60 }
 0x336   : > { %5147 = vmatmul.mubr.bf16.vlgmr.msra.gmra.mrb[0].mxu1 %v1059_v30 }
 0x337   : > { %5163 = vmatpush3.bf16.xpose.msra.mxu1 %v1252_v43 }
 0x338   : > { %5411 = vmatprep.subr.msk.bf16.mxu1 %vm768_vm0, %v6836_v9 }
 0x33f   : > { %5165 = vmatpush3.bf16.xpose.msra.mxu1 %v1255_v20 }
 0x340   : > { %5412 = vmatprep.subr.msk.bf16.mxu1 %vm768_vm0, %v6911_v33 }
 0x347   : > { %5167 = vmatpush3.bf16.xpose.msra.mxu1 %v1258_v15 }
 0x348   : > { %5413 = vmatprep.subr.msk.bf16.mxu1 %vm768_vm0, %v6914_v35 }
 0x34f   : > { %5169 = vmatpush3.bf16.xpose.msra.mxu1 %v1261_v8 }
 0x350   : > { %5414 = vmatprep.subr.msk.bf16.mxu1 %vm768_vm0, %v1220_v45 }
 0x356   : > { %v1007_v9 = vpop.xlane.xlu0 %1006 }
 0x357   : > { %5171 = vmatpush3.bf16.xpose.msra.mxu1 %v1264_v16 }
 0x358   : > { %5415 = vmatprep.subr.msk.bf16.mxu1 %vm768_vm0, %v1222_v46 }
 0x35a   : > { %v1003_v18 = vpop.xlane.xlu1 %1002  ;;  %v1005_v63 = vpop.xlane.xlu0 %1004 }
 0x35b   : > { %5691 = vrcp.f32 %v1003_v18 }
 0x35c   : > { %5693 = vrcp.f32 %v1005_v63 }
 0x35d   : > { %5695 = vrcp.f32 %v1007_v9 }
 0x35e   : > { %v1009_v33 = vpop.xlane.xlu1 %1008  ;;  %v1023_v49 = vpop.xlane.xlu0 %1022 }
 0x35f   : > { %5697 = vrcp.f32 %v1009_v33  ;;  %5173 = vmatpush3.bf16.xpose.msra.mxu1 %v1267_v0 }
 0x362   : > { %v1015_v35 = vpop.xlane.xlu1 %1014  ;;  %v1019_v39 = vpop.xlane.xlu0 %1018 }
 0x365   : > { %v5692_v2 = vpop.eup %5691 }
 0x366   : > { %v5694_v5 = vpop.eup %5693  ;;  %v1011_v36 = vpop.xlane.xlu1 %1010  ;;  %v1046_v50 = vmul.f32 %v5692_v2, %v6935_v32 }
 0x367   : > { %v5696_v13 = vpop.eup %5695  ;;  %v1047_v40 = vmul.f32 %v5694_v5, %v6937_v1 }
 0x368   : > { %v1025_v31 = vpop.xlane.xlu0 %1024  ;;  %v1048_v45 = vmul.f32 %v5696_v13, %v6931_v26 }
 0x369   : > { %v5698_v37 = vpop.eup %5697  ;;  %v1060_v42 = vpack.c.bf16 %v1047_v40, %v1046_v50 }
 0x36a   : > { %v1017_v44 = vpop.xlane.xlu1 %1016  ;;  %v1049_v46 = vmul.f32 %v5698_v37, %v6943_v6 }
 0x36b   : > { %5150 = vmatprep.mubr.bf16.mxu1 %v1060_v42  ;;  %5699 = vrcp.f32 %v1017_v44 }
 0x36c   : > { %v1061_v52 = vpack.c.bf16 %v1049_v46, %v1048_v45  ;;  %v1224_v53 = vpop.permute.xlu0 %1223  ;;  %5701 = vrcp.f32 %v1011_v36 }
 0x36d   : > { %5206 = vmatprep.subr.bf16.mxu0 %v1224_v53  ;;  %5416 = vmatprep.subr.msk.bf16.mxu1 %vm768_vm0, %v1224_v53  ;;  %v1270_v32 = vsel %vm768_vm0, %v1224_v53, 0  ;;  %5703 = vrcp.f32 %v1015_v35 }
 0x36e   : > { %v1013_v1 = vpop.xlane.xlu1 %1012  ;;  %5151 = vmatmul.mubr.bf16.gmra.mrb[4].mxu1 %v1061_v52  ;;  %5207 = vmatpush3.bf16.msra.mxu0 %v1224_v53 }
 0x36f   : > { %5705 = vrcp.f32 %v1013_v1  ;;  %5175 = vmatpush3.bf16.xpose.msra.mxu1 %v1270_v32 }
 0x370   : > { %5707 = vrcp.f32 %v1019_v39 }
 0x372   : > { %v1021_v26 = vpop.xlane.xlu1 %1020 }
 0x373   : > { %5709 = vrcp.f32 %v1021_v26 }
 0x374   : > { %5711 = vrcp.f32 %v1025_v31 }
 0x375   : > { %v5700_v6 = vpop.eup %5699  ;;  %5713 = vrcp.f32 %v1023_v49  ;;  %v1188_v49 = vpop.permute.xlu0 %1187 }
 0x376   : > { %v1226_v54 = vpop.permute.xlu1 %1225  ;;  %v5702_v57 = vpop.eup %5701  ;;  %v1053_v28 = vmul.f32 %v5700_v6, %v6962_v51 }
 0x377   : > { %5208 = vmatprep.subr.bf16.mxu0 %v1226_v54  ;;  %5417 = vmatprep.subr.msk.bf16.mxu1 %vm768_vm0, %v1226_v54  ;;  %v1273_v58 = vsel %vm768_vm0, %v1226_v54, 0  ;;  %v5704_v59 = vpop.eup %5703  ;;  %v1050_v60 = vmul.f32 %v5702_v57, %v6956_v17 }
 0x378   : > { %5209 = vmatpush3.bf16.msra.mxu0 %v1226_v54  ;;  %5177 = vmatpush3.bf16.xpose.msra.mxu1 %v1273_v58  ;;  %v1052_v20 = vmul.f32 %v5704_v59, %v6950_v12 }
 0x379   : > { %v5706_v21 = vpop.eup %5705  ;;  %v1192_v35 = vpop.permute.xlu0 %1191 }
 0x37a   : > { %v1051_v30 = vmul.f32 %v5706_v21, %v6965_v24  ;;  %v5708_v43 = vpop.eup %5707  ;;  %v1063_v16 = vpack.c.bf16 %v1053_v28, %v1052_v20  ;;  %v1190_v12 = vpop.permute.xlu1 %1189 }
 0x37b   : > { %v1054_v18 = vmul.f32 %v5708_v43, %v6952_v14 }
 0x37c   : > { %v1062_v15 = vpack.c.bf16 %v1051_v30, %v1050_v60 }
 0x37d   : > { %v5710_v8 = vpop.eup %5709 }
 0x37e   : > { %v5712_v9 = vpop.eup %5711  ;;  %5154 = vmatprep.mubr.bf16.mxu1 %v1062_v15  ;;  %v1055_v63 = vmul.f32 %v5710_v8, %v6968_v27  ;;  %v1194_v14 = vpop.permute.xlu1 %1193 }
 0x37f   : > { %5155 = vmatmul.mubr.bf16.gmra.mrb[8].mxu1 %v1063_v16  ;;  %v5714_v33 = vpop.eup %5713  ;;  %v1057_v51 = vmul.f32 %v5712_v9, %v6959_v23  ;;  %v1196_v27 = vpop.permute.xlu0 %1195 }
 0x380   : > { %v1064_v0 = vpack.c.bf16 %v1055_v63, %v1054_v18  ;;  %v1056_v17 = vmul.f32 %v5714_v33, %v6945_v11 }
 0x382   : > { %5158 = vmatprep.mubr.bf16.mxu1 %v1064_v0  ;;  %v1065_v24 = vpack.c.bf16 %v1057_v51, %v1056_v17  ;;  %v1198_v23 = vpop.permute.xlu1 %1197 }
 0x383   : > { %v1200_v39 = vpop.permute.xlu0 %1199 }
 0x386   : > { %v1202_v11 = vpop.permute.xlu1 %1201 }
 0x387   : > { %5159 = vmatmul.mubr.bf16.gmra.mrb[12].mxu1 %v1065_v24  ;;  %v7045_v13 = vpop.permute.xlu0 %1726 }
 0x388   : > { %5178 = vmatprep.mubr.msk.bf16.mxu1 %vm768_vm0, %v1188_v49  ;;  %5258 = vmatprep.subr.bf16.mxu1 %v7045_v13 }
 0x389   : > { %5418 = vmatprep.subr.msk.bf16.mxu0 %vm768_vm0, %v7045_v13 }
 0x38a   : > { %v7047_v40 = vpop.permute.xlu1 %1728 }
 0x38f   : > { %5179 = vmatmul.mubr.msk.bf16.vlgmr.msra.gmra.mrb[16].mxu1 %vm768_vm0, %v1190_v12 }
 0x390   : > { %5182 = vmatprep.mubr.msk.bf16.mxu1 %vm768_vm0, %v1192_v35  ;;  %5259 = vmatpush3.bf16.msra.mxu1 %v7045_v13 }
 0x391   : > { %5260 = vmatprep.subr.bf16.mxu1 %v7047_v40 }
 0x394   : > { %5261 = vmatpush3.bf16.msra.mxu1 %v7047_v40 }
 0x397   : > { %5183 = vmatmul.mubr.msk.bf16.gmra.mrb[20].mxu1 %vm768_vm0, %v1194_v14 }
 0x398   : > { %5186 = vmatprep.mubr.msk.bf16.mxu1 %vm768_vm0, %v1196_v27 }
 0x39f   : > { %5187 = vmatmul.mubr.msk.bf16.gmra.mrb[24].mxu1 %vm768_vm0, %v1198_v23 }
 0x3a0   : > { %5190 = vmatprep.mubr.msk.bf16.mxu1 %vm768_vm0, %v1200_v39 }
 0x3a7   : > { %5191 = vmatmul.mubr.msk.bf16.gmra.mrb[28].mxu1 %vm768_vm0, %v1202_v11 }
 0x409   : > { %v5148_v2 = vpop.f32.mrb[0].mxu1 }
 0x40a   : > { %1165 = vst.msk [vmem:[#allocation3 + $0x10] sm:$0xff] %vm768_vm0, %v5148_v2  ;;  %v1100_v5 = vpop.f32.mrb[1].mxu1 }
 0x40b   : > { %1163 = vst.msk [vmem:[#allocation3] sm:$0xff] %vm768_vm0, %v1100_v5  ;;  %v5149_v36 = vpop.f32.mrb[2].mxu1 }
 0x40c   : > { %1166 = vst.msk [vmem:[#allocation3 + $0x18] sm:$0xff] %vm768_vm0, %v5149_v36  ;;  %v1103_v50 = vpop.f32.mrb[3].mxu1 }
 0x40d   : > { %1164 = vst.msk [vmem:[#allocation3 + $0x8] sm:$0xff] %vm768_vm0, %v1103_v50 }
 0x441   : > { %v5152_v31 = vpop.f32.mrb[4].mxu1 }
 0x442   : > { %1169 = vst.msk [vmem:[#allocation3 + $0x30] sm:$0xff] %vm768_vm0, %v5152_v31  ;;  %v1116_v37 = vpop.f32.mrb[5].mxu1 }
 0x443   : > { %1167 = vst.msk [vmem:[#allocation3 + $0x20] sm:$0xff] %vm768_vm0, %v1116_v37  ;;  %v5153_v42 = vpop.f32.mrb[6].mxu1 }
 0x444   : > { %1170 = vst.msk [vmem:[#allocation3 + $0x38] sm:$0xff] %vm768_vm0, %v5153_v42  ;;  %v1119_v44 = vpop.f32.mrb[7].mxu1 }
 0x445   : > { %1168 = vst.msk [vmem:[#allocation3 + $0x28] sm:$0xff] %vm768_vm0, %v1119_v44 }
 0x452   : > { %v5156_v45 = vpop.f32.mrb[8].mxu1 }
 0x453   : > { %1173 = vst.msk [vmem:[#allocation3 + $0x50] sm:$0xff] %vm768_vm0, %v5156_v45  ;;  %v1132_v46 = vpop.f32.mrb[9].mxu1 }
 0x454   : > { %1171 = vst.msk [vmem:[#allocation3 + $0x40] sm:$0xff] %vm768_vm0, %v1132_v46  ;;  %v5157_v52 = vpop.f32.mrb[10].mxu1 }
 0x455   : > { %1174 = vst.msk [vmem:[#allocation3 + $0x58] sm:$0xff] %vm768_vm0, %v5157_v52  ;;  %v1135_v53 = vpop.f32.mrb[11].mxu1 }
 0x456   : > { %1172 = vst.msk [vmem:[#allocation3 + $0x48] sm:$0xff] %vm768_vm0, %v1135_v53 }
 0x45a   : > { %v5160_v32 = vpop.f32.mrb[12].mxu1 }
 0x45b   : > { %1177 = vst.msk [vmem:[#allocation3 + $0x70] sm:$0xff] %vm768_vm0, %v5160_v32  ;;  %v1148_v1 = vpop.f32.mrb[13].mxu1 }
 0x45c   : > { %1175 = vst.msk [vmem:[#allocation3 + $0x60] sm:$0xff] %vm768_vm0, %v1148_v1  ;;  %v5161_v26 = vpop.f32.mrb[14].mxu1 }
 0x45d   : > { %1178 = vst.msk [vmem:[#allocation3 + $0x78] sm:$0xff] %vm768_vm0, %v5161_v26  ;;  %v1151_v6 = vpop.f32.mrb[15].mxu1 }
 0x45e   : > { %1176 = vst.msk [vmem:[#allocation3 + $0x68] sm:$0xff] %vm768_vm0, %v1151_v6 }
 0x462   : > { %v5180_v54 = vpop.f32.mrb[16].mxu1 }
 0x463   : > { %v1318_v57 = vadd.f32 %v5180_v54, %v6841_v10  ;;  %v1309_v58 = vpop.f32.mrb[17].mxu1 }
 0x464   : > { %v5181_v59 = vpop.f32.mrb[18].mxu1  ;;  %v1310_v60 = vadd.f32 %v6841_v10, %v1309_v58 }
 0x465   : > { %1376 = vmax.xlane.f32.xlu0 %v1318_v57  ;;  %v1312_v21 = vpop.f32.mrb[19].mxu1  ;;  %v1321_v43 = vadd.f32 %v5181_v59, %v6841_v10 }
 0x466   : > { %v1313_v28 = vadd.f32 %v6841_v10, %v1312_v21 }
 0x468   : > { %1374 = vmax.xlane.f32.xlu1 %v1313_v28 }
 0x469   : > { %1372 = vmax.xlane.f32.xlu0 %v1310_v60 }
 0x46a   : > { %v5184_v30 = vpop.f32.mrb[20].mxu1 }
 0x46b   : > { %v1325_v20 = vpop.f32.mrb[21].mxu1  ;;  %v7072_v8 = vadd.f32 %v5184_v30, %v6841_v10 }
 0x46c   : > { %v5185_v15 = vpop.f32.mrb[22].mxu1  ;;  %v7082_v63 = vadd.f32 %v6841_v10, %v1325_v20 }
 0x46d   : > { %v7075_v16 = vadd.f32 %v5185_v15, %v6841_v10  ;;  %1378 = vmax.xlane.f32.xlu0 %v1321_v43  ;;  %v1328_v9 = vpop.f32.mrb[23].mxu1 }
 0x46e   : > { %v7079_v18 = vadd.f32 %v6841_v10, %v1328_v9 }
 0x46f   : > { %1386 = vmax.xlane.f32.xlu1 %v7075_v16 }
 0x471   : > { %1384 = vmax.xlane.f32.xlu0 %v7072_v8 }
 0x472   : > { %v5188_v33 = vpop.f32.mrb[24].mxu1 }
 0x473   : > { %1382 = vmax.xlane.f32.xlu1 %v7079_v18  ;;  %v1341_v0 = vpop.f32.mrb[25].mxu1  ;;  %v7087_v17 = vadd.f32 %v5188_v33, %v6841_v10 }
 0x474   : > { %v5189_v51 = vpop.f32.mrb[26].mxu1  ;;  %v7098_v35 = vadd.f32 %v6841_v10, %v1341_v0 }
 0x475   : > { %v7090_v24 = vadd.f32 %v5189_v51, %v6841_v10  ;;  %1380 = vmax.xlane.f32.xlu0 %v7082_v63  ;;  %v1344_v49 = vpop.f32.mrb[27].mxu1 }
 0x476   : > { %v7095_v12 = vadd.f32 %v6841_v10, %v1344_v49 }
 0x477   : > { %1394 = vmax.xlane.f32.xlu1 %v7090_v24 }
 0x479   : > { %1392 = vmax.xlane.f32.xlu0 %v7087_v17 }
 0x47a   : > { %v5192_v14 = vpop.f32.mrb[28].mxu1 }
 0x47b   : > { %1390 = vmax.xlane.f32.xlu1 %v7095_v12  ;;  %v1357_v27 = vpop.f32.mrb[29].mxu1  ;;  %v7104_v39 = vadd.f32 %v5192_v14, %v6841_v10 }
 0x47c   : > { %v5193_v23 = vpop.f32.mrb[30].mxu1  ;;  %v7108_v2 = vadd.f32 %v6841_v10, %v1357_v27 }
 0x47d   : > { %1388 = vmax.xlane.f32.xlu0 %v7098_v35  ;;  %v1360_v11 = vpop.f32.mrb[31].mxu1  ;;  %v7116_v5 = vadd.f32 %v5193_v23, %v6841_v10 }
 0x47e   : > { %v7120_v36 = vadd.f32 %v6841_v10, %v1360_v11 }
 0x481   : > { %1400 = vmax.xlane.f32.xlu0 %v7104_v39 }
 0x485   : > { %1396 = vmax.xlane.f32.xlu0 %v7108_v2 }
 0x48c   : > { %1732 = vrot.lane.b32.xlu1 %v6757_v34, %s6251_s6 }
 0x49b   : > { %1730 = vrot.lane.b32.xlu0 %v6751_v29, %s6251_s6 }
 0x4b0   : > { %1402 = vmax.xlane.f32.xlu1 %v7116_v5 }
 0x4b4   : > { %1398 = vmax.xlane.f32.xlu1 %v7120_v36 }
 0x4f2   : > { %v1377_v50 = vpop.xlane.xlu0 %1376 }
 0x4f3   : > { %v1406_v31 = vsub.f32 %v1318_v57, %v1377_v50 }
 0x4f5   : > { %v1424_v37 = vmul.f32 1.442695, %v1406_v31  ;;  %v1375_v45 = vpop.xlane.xlu1 %1374 }
 0x4f6   : > { %v1373_v42 = vpop.xlane.xlu0 %1372  ;;  %v1405_v53 = vsub.f32 %v1313_v28, %v1375_v45 }
 0x4f7   : > { %5715 = vpow2.f32 %v1424_v37  ;;  %v1404_v44 = vsub.f32 %v1310_v60, %v1373_v42 }
 0x4f8   : > { %v1422_v6 = vmul.f32 1.442695, %v1405_v53 }
 0x4f9   : > { %v1420_v46 = vmul.f32 1.442695, %v1404_v44 }
 0x4fa   : > { %v1379_v52 = vpop.xlane.xlu0 %1378 }
 0x4fb   : > { %5717 = vpow2.f32 %v1420_v46  ;;  %v1407_v32 = vsub.f32 %v1321_v43, %v1379_v52 }
 0x4fc   : > { %v1387_v10 = vpop.xlane.xlu1 %1386 }
 0x4fd   : > { %v1426_v1 = vmul.f32 1.442695, %v1407_v32  ;;  %v1411_v50 = vsub.f32 %v7075_v16, %v1387_v10 }
 0x4fe   : > { %v1385_v26 = vpop.xlane.xlu0 %1384 }
 0x4ff   : > { %5719 = vpow2.f32 %v1426_v1  ;;  %v1410_v51 = vsub.f32 %v7072_v8, %v1385_v26  ;;  %v1434_v44 = vmul.f32 1.442695, %v1411_v50 }
 0x500   : > { %5721 = vpow2.f32 %v1422_v6  ;;  %v1383_v59 = vpop.xlane.xlu1 %1382 }
 0x501   : > { %v7123_v54 = vpop.eup %5715  ;;  %v1432_v49 = vmul.f32 1.442695, %v1410_v51  ;;  %v1409_v14 = vsub.f32 %v7079_v18, %v1383_v59 }
 0x502   : > { %1456 = vadd.xlane.f32.xlu0 %v7123_v54  ;;  %v1381_v57 = vpop.xlane.xlu0 %1380 }
 0x503   : > { %v1408_v27 = vsub.f32 %v7082_v63, %v1381_v57  ;;  %5723 = vpow2.f32 %v1432_v49  ;;  %v1430_v23 = vmul.f32 1.442695, %v1409_v14 }
 0x504   : > { %v1395_v30 = vpop.xlane.xlu1 %1394 }
 0x505   : > { %v7126_v58 = vpop.eup %5717  ;;  %v1428_v31 = vmul.f32 1.442695, %v1408_v27  ;;  %5725 = vpow2.f32 %v1430_v23 }
 0x506   : > { %1452 = vadd.xlane.f32.xlu0 %v7126_v58  ;;  %v1393_v21 = vpop.xlane.xlu0 %1392 }
 0x507   : > { %5727 = vpow2.f32 %v1428_v31  ;;  %v1414_v8 = vsub.f32 %v7087_v17, %v1393_v21  ;;  %v1415_v17 = vsub.f32 %v7090_v24, %v1395_v30 }
 0x508   : > { %v1391_v15 = vpop.xlane.xlu1 %1390 }
 0x509   : > { %v7129_v28 = vpop.eup %5719  ;;  %v1440_v63 = vmul.f32 1.442695, %v1414_v8  ;;  %v1413_v26 = vsub.f32 %v7095_v12, %v1391_v15 }
 0x50a   : > { %1458 = vadd.xlane.f32.xlu1 %v7129_v28  ;;  %v1389_v60 = vpop.xlane.xlu0 %1388  ;;  %v7132_v43 = vpop.eup %5721 }
 0x50b   : > { %v1438_v10 = vmul.f32 1.442695, %v1413_v26 }
 0x50c   : > { %v7138_v0 = vpop.permute.xlu1 %1732 }
 0x50d   : > { %v7154_v18 = vpop.eup %5723 }
 0x50e   : > { %1454 = vadd.xlane.f32.xlu1 %v7132_v43  ;;  %v1401_v20 = vpop.xlane.xlu0 %1400 }
 0x50f   : > { %v1418_v11 = vsub.f32 %v7104_v39, %v1401_v20  ;;  %v1412_v39 = vsub.f32 %v7098_v35, %v1389_v60  ;;  %v7158_v46 = vpop.eup %5725  ;;  %v1442_v35 = vmul.f32 1.442695, %v1415_v17 }
 0x511   : > { %v1448_v37 = vmul.f32 1.442695, %v1418_v11  ;;  %v1436_v52 = vmul.f32 1.442695, %v1412_v39  ;;  %v7163_v32 = vpop.eup %5727  ;;  %v1767_v39 = vsel %vm768_vm0, %v7045_v13, 0  ;;  %v1776_v13 = vsel %vm768_vm0, %v7138_v0, 0 }
 0x512   : > { %v1397_v9 = vpop.xlane.xlu0 %1396 }
 0x513   : > { %v1416_v42 = vsub.f32 %v7108_v2, %v1397_v9  ;;  %5729 = vpow2.f32 %v1448_v37 }
 0x514   : > { %5731 = vpow2.f32 %v1434_v44 }
 0x515   : > { %v1444_v45 = vmul.f32 1.442695, %v1416_v42 }
 0x516   : > { %v7135_v33 = vpop.permute.xlu0 %1730 }
 0x517   : > { %5262 = vmatprep.subr.bf16.mxu1 %v7135_v33  ;;  %5733 = vpow2.f32 %v1444_v45 }
 0x518   : > { %5263 = vmatpush3.bf16.msra.mxu1 %v7135_v33  ;;  %5735 = vpow2.f32 %v1440_v63 }
 0x519   : > { %5264 = vmatprep.subr.bf16.mxu1 %v7138_v0 }
 0x51c   : > { %1734 = vrot.lane.b32.xlu0 %v6763_v38, %s6251_s6  ;;  %5265 = vmatpush3.bf16.msra.mxu1 %v7138_v0 }
 0x51d   : > { %v7165_v1 = vpop.eup %5729 }
 0x51f   : > { %1736 = vrot.lane.b32.xlu1 %v6769_v41, %s6251_s6 }
 0x53b   : > { %1464 = vadd.xlane.f32.xlu0 %v7154_v18 }
 0x53d   : > { %v1403_v16 = vpop.xlane.xlu1 %1402 }
 0x53e   : > { %v1419_v2 = vsub.f32 %v7116_v5, %v1403_v16  ;;  %v7170_v5 = vpop.eup %5731 }
 0x53f   : > { %1462 = vadd.xlane.f32.xlu0 %v7158_v46  ;;  %v7172_v24 = vpop.eup %5733 }
 0x540   : > { %v1450_v53 = vmul.f32 1.442695, %v1419_v2  ;;  %v7177_v59 = vpop.eup %5735 }
 0x541   : > { %v1399_v6 = vpop.xlane.xlu1 %1398 }
 0x542   : > { %5737 = vpow2.f32 %v1450_v53  ;;  %v1417_v57 = vsub.f32 %v7120_v36, %v1399_v6 }
 0x543   : > { %1460 = vadd.xlane.f32.xlu1 %v7163_v32  ;;  %1480 = vadd.xlane.f32.xlu0 %v7165_v1  ;;  %5739 = vpow2.f32 %v1436_v52 }
 0x544   : > { %5741 = vpow2.f32 %v1442_v35  ;;  %v1446_v12 = vmul.f32 1.442695, %v1417_v57 }
 0x545   : > { %5743 = vpow2.f32 %v1438_v10 }
 0x546   : > { %5745 = vpow2.f32 %v1446_v12 }
 0x547   : > { %1466 = vadd.xlane.f32.xlu1 %v7170_v5  ;;  %1476 = vadd.xlane.f32.xlu0 %v7172_v24 }
 0x54b   : > { %1472 = vadd.xlane.f32.xlu1 %v7177_v59 }
 0x54c   : > { %v7180_v21 = vpop.eup %5737 }
 0x54d   : > { %1482 = vadd.xlane.f32.xlu0 %v7180_v21  ;;  %v7183_v60 = vpop.eup %5739 }
 0x54e   : > { %v7186_v30 = vpop.eup %5741 }
 0x54f   : > { %1468 = vadd.xlane.f32.xlu1 %v7183_v60  ;;  %v7189_v36 = vpop.eup %5743 }
 0x550   : > { %v7192_v20 = vpop.eup %5745 }
 0x553   : > { %1474 = vadd.xlane.f32.xlu1 %v7186_v30 }
 0x557   : > { %1470 = vadd.xlane.f32.xlu1 %v7189_v36 }
 0x55b   : > { %1478 = vadd.xlane.f32.xlu1 %v7192_v20 }
 0x563   : > { %1738 = vrot.lane.b32.xlu0 %v6779_v47, %s6251_s6 }
 0x567   : > { %1710 = vrot.lane.b32.xlu0 %v6742_v25, %s6251_s6 }
 0x56b   : > { %1714 = vrot.lane.b32.xlu0 %v6804_v56, %s6251_s6 }
 0x56c   : > { %1740 = vrot.lane.b32.xlu1 %v6785_v48, %s6251_s6 }
 0x56f   : > { %1718 = vrot.lane.b32.xlu0 %v6812_v62, %s6251_s6 }
 0x570   : > { %1712 = vrot.lane.b32.xlu1 %v6802_v55, %s6251_s6 }
 0x573   : > { %1722 = vrot.lane.b32.xlu0 %v6820_v4, %s6251_s6 }
 0x574   : > { %1716 = vrot.lane.b32.xlu1 %v6810_v61, %s6251_s6 }
 0x577   : > { %2241 = vrot.lane.b32.xlu0 %v6724_v19, %s6252_s8 }
 0x578   : > { %1720 = vrot.lane.b32.xlu1 %v6818_v3, %s6251_s6 }
 0x57c   : > { %1724 = vrot.lane.b32.xlu1 %v6826_v7, %s6251_s6 }
 0x580   : > { %2243 = vrot.lane.b32.xlu1 %v6730_v22, %s6252_s8 }
 0x58f   : > { %v1457_v15 = vpop.xlane.xlu0 %1456 }
 0x593   : > { %v1453_v9 = vpop.xlane.xlu0 %1452 }
 0x597   : > { %v1459_v51 = vpop.xlane.xlu1 %1458  ;;  %v1735_v49 = vpop.permute.xlu0 %1734 }
 0x598   : > { %5266 = vmatprep.subr.bf16.mxu1 %v1735_v49  ;;  %5747 = vrcp.f32 %v1459_v51 }
 0x599   : > { %5267 = vmatpush3.bf16.msra.mxu1 %v1735_v49  ;;  %5749 = vrcp.f32 %v1453_v9 }
 0x59a   : > { %5751 = vrcp.f32 %v1457_v15 }
 0x59b   : > { %v1455_v14 = vpop.xlane.xlu1 %1454 }
 0x59c   : > { %5753 = vrcp.f32 %v1455_v14 }
 0x59f   : > { %v1737_v27 = vpop.permute.xlu1 %1736 }
 0x5a0   : > { %5268 = vmatprep.subr.bf16.mxu1 %v1737_v27  ;;  %v1782_v17 = vsel %vm768_vm0, %v1737_v27, 0 }
 0x5a1   : > { %5269 = vmatpush3.bf16.msra.mxu1 %v1737_v27 }
 0x5a2   : > { %v5748_v23 = vpop.eup %5747 }
 0x5a3   : > { %v5750_v11 = vpop.eup %5749  ;;  %v1503_v37 = vmul.f32 %v5748_v23, %v7129_v28  ;;  %v1770_v28 = vsel %vm768_vm0, %v7047_v40, 0 }
 0x5a4   : > { %v5752_v50 = vpop.eup %5751  ;;  %v1500_v42 = vmul.f32 %v5750_v11, %v7126_v58 }
 0x5a5   : > { %v1502_v8 = vmul.f32 %v5752_v50, %v7123_v54  ;;  %v1773_v54 = vsel %vm768_vm0, %v7135_v33, 0 }
 0x5a6   : > { %v5754_v31 = vpop.eup %5753 }
 0x5a7   : > { %v1501_v44 = vmul.f32 %v5754_v31, %v7132_v43  ;;  %v1517_v63 = vpack.c.bf16 %v1503_v37, %v1502_v8 }
 0x5a9   : > { %v1516_v45 = vpack.c.bf16 %v1501_v44, %v1500_v42 }
 0x5ab   : > { %5210 = vmatprep.mubr.bf16.mxu0 %v1516_v45 }
 0x5ac   : > { %5211 = vmatmul.mubr.bf16.vlgmr.msra.gmra.mrb[16].mxu0 %v1517_v63 }
 0x5ad   : > { %5227 = vmatpush3.bf16.xpose.msra.mxu0 %v1767_v39 }
 0x5ae   : > { %5419 = vmatprep.subr.msk.bf16.mxu0 %vm768_vm0, %v7047_v40  ;;  %v1779_v40 = vsel %vm768_vm0, %v1735_v49, 0 }
 0x5b5   : > { %5229 = vmatpush3.bf16.xpose.msra.mxu0 %v1770_v28 }
 0x5b6   : > { %5420 = vmatprep.subr.msk.bf16.mxu0 %vm768_vm0, %v7135_v33 }
 0x5bd   : > { %5231 = vmatpush3.bf16.xpose.msra.mxu0 %v1773_v54 }
 0x5be   : > { %5421 = vmatprep.subr.msk.bf16.mxu0 %vm768_vm0, %v7138_v0 }
 0x5c5   : > { %5233 = vmatpush3.bf16.xpose.msra.mxu0 %v1776_v13 }
 0x5c6   : > { %5422 = vmatprep.subr.msk.bf16.mxu0 %vm768_vm0, %v1735_v49 }
 0x5c8   : > { %v1465_v58 = vpop.xlane.xlu0 %1464 }
 0x5cc   : > { %v1463_v43 = vpop.xlane.xlu0 %1462 }
 0x5cd   : > { %5235 = vmatpush3.bf16.xpose.msra.mxu0 %v1779_v40  ;;  %5755 = vrcp.f32 %v1463_v43 }
 0x5ce   : > { %5423 = vmatprep.subr.msk.bf16.mxu0 %vm768_vm0, %v1737_v27 }
 0x5d0   : > { %v1461_v16 = vpop.xlane.xlu1 %1460  ;;  %v1481_v33 = vpop.xlane.xlu0 %1480 }
 0x5d1   : > { %5757 = vrcp.f32 %v1461_v16 }
 0x5d2   : > { %5759 = vrcp.f32 %v1465_v58 }
 0x5d4   : > { %v1467_v2 = vpop.xlane.xlu1 %1466  ;;  %v1477_v0 = vpop.xlane.xlu0 %1476 }
 0x5d5   : > { %5761 = vrcp.f32 %v1467_v2  ;;  %5237 = vmatpush3.bf16.xpose.msra.mxu0 %v1782_v17 }
 0x5d7   : > { %v5756_v53 = vpop.eup %5755 }
 0x5d8   : > { %v1473_v52 = vpop.xlane.xlu1 %1472  ;;  %v1505_v57 = vmul.f32 %v5756_v53, %v7158_v46 }
 0x5da   : > { %v1483_v35 = vpop.xlane.xlu0 %1482 }
 0x5db   : > { %v5758_v26 = vpop.eup %5757 }
 0x5dc   : > { %v1469_v6 = vpop.xlane.xlu1 %1468  ;;  %v1504_v10 = vmul.f32 %v5758_v26, %v7163_v32  ;;  %v5760_v12 = vpop.eup %5759 }
 0x5dd   : > { %v1506_v27 = vmul.f32 %v5760_v12, %v7154_v18 }
 0x5de   : > { %v1518_v15 = vpack.c.bf16 %v1505_v57, %v1504_v10  ;;  %v1739_v9 = vpop.permute.xlu0 %1738 }
 0x5df   : > { %v5762_v51 = vpop.eup %5761  ;;  %5270 = vmatprep.subr.bf16.mxu1 %v1739_v9  ;;  %5424 = vmatprep.subr.msk.bf16.mxu0 %vm768_vm0, %v1739_v9  ;;  %v1785_v49 = vsel %vm768_vm0, %v1739_v9, 0 }
 0x5e0   : > { %v1475_v14 = vpop.xlane.xlu1 %1474  ;;  %5214 = vmatprep.mubr.bf16.mxu0 %v1518_v15  ;;  %v1507_v23 = vmul.f32 %v5762_v51, %v7170_v5  ;;  %5271 = vmatpush3.bf16.msra.mxu1 %v1739_v9 }
 0x5e1   : > { %5239 = vmatpush3.bf16.xpose.msra.mxu0 %v1785_v49  ;;  %5763 = vrcp.f32 %v1475_v14 }
 0x5e2   : > { %v1519_v32 = vpack.c.bf16 %v1507_v23, %v1506_v27  ;;  %5765 = vrcp.f32 %v1469_v6  ;;  %v1711_v2 = vpop.permute.xlu0 %1710 }
 0x5e3   : > { %5767 = vrcp.f32 %v1473_v52 }
 0x5e4   : > { %v1471_v46 = vpop.xlane.xlu1 %1470  ;;  %5215 = vmatmul.mubr.bf16.gmra.mrb[20].mxu0 %v1519_v32 }
 0x5e5   : > { %5769 = vrcp.f32 %v1471_v46 }
 0x5e6   : > { %5771 = vrcp.f32 %v1477_v0  ;;  %v1715_v17 = vpop.permute.xlu0 %1714 }
 0x5e8   : > { %v1479_v11 = vpop.xlane.xlu1 %1478 }
 0x5e9   : > { %5773 = vrcp.f32 %v1479_v11  ;;  %v7308_v11 = vld [vmem:[%s6669_s23] ss:$0 sm:$0xff]  ;;  %s8688_s23 = sld [smem:[#allocation40_spill]] }
 0x5ea   : > { %5775 = vrcp.f32 %v1483_v35 }
 0x5eb   : > { %v5764_v50 = vpop.eup %5763  ;;  %5777 = vrcp.f32 %v1481_v33 }
 0x5ec   : > { %v1741_v31 = vpop.permute.xlu1 %1740  ;;  %v5766_v37 = vpop.eup %5765  ;;  %v1511_v44 = vmul.f32 %v5764_v50, %v7186_v30 }
 0x5ed   : > { %5272 = vmatprep.subr.bf16.mxu1 %v1741_v31  ;;  %5425 = vmatprep.subr.msk.bf16.mxu0 %vm768_vm0, %v1741_v31  ;;  %v1788_v18 = vsel %vm768_vm0, %v1741_v31, 0  ;;  %v5768_v5 = vpop.eup %5767  ;;  %v1508_v8 = vmul.f32 %v5766_v37, %v7183_v60 }
 0x5ee   : > { %5273 = vmatpush3.bf16.msra.mxu1 %v1741_v31  ;;  %5241 = vmatpush3.bf16.xpose.msra.mxu0 %v1788_v18  ;;  %v1510_v39 = vmul.f32 %v5768_v5, %v7177_v59 }
 0x5ef   : > { %v5770_v42 = vpop.eup %5769  ;;  %s8689_s26 = scalar_lea.vmem %s8688_s23, %s6664_s20 }
 0x5f0   : > { %v1509_v45 = vmul.f32 %v5770_v42, %v7189_v36  ;;  %v5772_v63 = vpop.eup %5771  ;;  %v1521_v13 = vpack.c.bf16 %v1511_v44, %v1510_v39  ;;  %v1713_v59 = vpop.permute.xlu1 %1712 }
 0x5f1   : > { %v1512_v40 = vmul.f32 %v5772_v63, %v7172_v24 }
 0x5f2   : > { %v1520_v28 = vpack.c.bf16 %v1509_v45, %v1508_v8 }
 0x5f3   : > { %v5774_v54 = vpop.eup %5773 }
 0x5f4   : > { %v5776_v58 = vpop.eup %5775  ;;  %5218 = vmatprep.mubr.bf16.mxu0 %v1520_v28  ;;  %v1513_v43 = vmul.f32 %v5774_v54, %v7192_v20  ;;  %v1717_v24 = vpop.permute.xlu1 %1716 }
 0x5f5   : > { %5219 = vmatmul.mubr.bf16.gmra.mrb[24].mxu0 %v1521_v13  ;;  %v5778_v16 = vpop.eup %5777  ;;  %v1515_v30 = vmul.f32 %v5776_v58, %v7180_v21  ;;  %v1719_v20 = vpop.permute.xlu0 %1718 }
 0x5f6   : > { %v1522_v33 = vpack.c.bf16 %v1513_v43, %v1512_v40  ;;  %v1514_v60 = vmul.f32 %v5778_v16, %v7165_v1 }
 0x5f8   : > { %5222 = vmatprep.mubr.bf16.mxu0 %v1522_v33  ;;  %v1523_v36 = vpack.c.bf16 %v1515_v30, %v1514_v60  ;;  %v1721_v21 = vpop.permute.xlu1 %1720 }
 0x5f9   : > { %v1723_v0 = vpop.permute.xlu0 %1722 }
 0x5fc   : > { %v1725_v1 = vpop.permute.xlu1 %1724 }
 0x5fd   : > { %5223 = vmatmul.mubr.bf16.gmra.mrb[28].mxu0 %v1523_v36  ;;  %v7273_v6 = vpop.permute.xlu0 %2241 }
 0x5fe   : > { %5242 = vmatprep.mubr.msk.bf16.mxu0 %vm768_vm0, %v1711_v2  ;;  %5322 = vmatprep.subr.bf16.mxu0 %v7273_v6 }
 0x5ff   : > { %5426 = vmatprep.subr.msk.bf16.mxu1 %vm768_vm0, %v7273_v6 }
 0x600   : > { %v7275_v10 = vpop.permute.xlu1 %2243 }
 0x605   : > { %5243 = vmatmul.mubr.msk.bf16.vlgmr.msra.gmra.mrb[32].mxu0 %vm768_vm0, %v1713_v59 }
 0x606   : > { %5246 = vmatprep.mubr.msk.bf16.mxu0 %vm768_vm0, %v1715_v17  ;;  %5323 = vmatpush3.bf16.msra.mxu0 %v7273_v6 }
 0x607   : > { %5324 = vmatprep.subr.bf16.mxu0 %v7275_v10 }
 0x60a   : > { %5325 = vmatpush3.bf16.msra.mxu0 %v7275_v10 }
 0x60d   : > { %5247 = vmatmul.mubr.msk.bf16.gmra.mrb[36].mxu0 %vm768_vm0, %v1717_v24 }
 0x60e   : > { %5250 = vmatprep.mubr.msk.bf16.mxu0 %vm768_vm0, %v1719_v20 }
 0x615   : > { %5251 = vmatmul.mubr.msk.bf16.gmra.mrb[40].mxu0 %vm768_vm0, %v1721_v21 }
 0x616   : > { %5254 = vmatprep.mubr.msk.bf16.mxu0 %vm768_vm0, %v1723_v0 }
 0x61d   : > { %5255 = vmatmul.mubr.msk.bf16.gmra.mrb[44].mxu0 %vm768_vm0, %v1725_v1 }
 0x67f   : > { %v7265_v52 = vpop.f32.mrb[16].mxu0 }
 0x680   : > { %v7267_v53 = vpop.f32.mrb[17].mxu0 }
 0x681   : > { %v7269_v35 = vpop.f32.mrb[18].mxu0 }
 0x682   : > { %v7271_v26 = vpop.f32.mrb[19].mxu0 }
 0x6b7   : > { %v7283_v19 = vpop.f32.mrb[20].mxu0 }
 0x6b8   : > { %v7285_v22 = vpop.f32.mrb[21].mxu0 }
 0x6b9   : > { %v7287_v57 = vpop.f32.mrb[22].mxu0 }
 0x6ba   : > { %v7289_v12 = vpop.f32.mrb[23].mxu0 }
 0x6c8   : > { %v7291_v15 = vpop.f32.mrb[24].mxu0 }
 0x6c9   : > { %v7293_v9 = vpop.f32.mrb[25].mxu0 }
 0x6ca   : > { %v7295_v51 = vpop.f32.mrb[26].mxu0 }
 0x6cb   : > { %8676 = vst [vmem:[#allocation31_spill] sm:$0xff] %v7295_v51  ;;  %v7297_v49 = vpop.f32.mrb[27].mxu0 }
 0x6d0   : > { %v7299_v14 = vpop.f32.mrb[28].mxu0 }
 0x6d1   : > { %8677 = vst [vmem:[#allocation32_spill] sm:$0xff] %v7299_v14  ;;  %v7301_v27 = vpop.f32.mrb[29].mxu0 }
 0x6d2   : > { %8678 = vst [vmem:[#allocation33_spill] sm:$0xff] %v7301_v27  ;;  %v7303_v23 = vpop.f32.mrb[30].mxu0 }
 0x6d3   : > { %8679 = vst [vmem:[#allocation34_spill] sm:$0xff] %v7303_v23  ;;  %v7305_v32 = vpop.f32.mrb[31].mxu0 }
 0x6d4   : > { %8680 = vst [vmem:[#allocation35_spill] sm:$0xff] %v7305_v32 }
 0x6d8   : > { %v5244_v46 = vpop.f32.mrb[32].mxu0 }
 0x6d9   : > { %v1833_v50 = vadd.f32 %v7308_v11, %v5244_v46  ;;  %v1824_v31 = vpop.f32.mrb[33].mxu0 }
 0x6da   : > { %v5245_v37 = vpop.f32.mrb[34].mxu0  ;;  %v1825_v42 = vadd.f32 %v7308_v11, %v1824_v31 }
 0x6db   : > { %1891 = vmax.xlane.f32.xlu0 %v1833_v50  ;;  %v1827_v18 = vpop.f32.mrb[35].mxu0  ;;  %v1836_v8 = vadd.f32 %v7308_v11, %v5245_v37 }
 0x6dc   : > { %v1828_v5 = vadd.f32 %v7308_v11, %v1827_v18 }
 0x6de   : > { %1889 = vmax.xlane.f32.xlu1 %v1828_v5 }
 0x6df   : > { %1887 = vmax.xlane.f32.xlu0 %v1825_v42 }
 0x6e0   : > { %v5248_v44 = vpop.f32.mrb[36].mxu0 }
 0x6e1   : > { %v1840_v45 = vpop.f32.mrb[37].mxu0  ;;  %v7315_v39 = vadd.f32 %v7308_v11, %v5248_v44 }
 0x6e2   : > { %v5249_v63 = vpop.f32.mrb[38].mxu0  ;;  %v7325_v58 = vadd.f32 %v7308_v11, %v1840_v45 }
 0x6e3   : > { %v7318_v28 = vadd.f32 %v7308_v11, %v5249_v63  ;;  %1893 = vmax.xlane.f32.xlu0 %v1836_v8  ;;  %v1843_v54 = vpop.f32.mrb[39].mxu0 }
 0x6e4   : > { %v7322_v13 = vadd.f32 %v7308_v11, %v1843_v54 }
 0x6e5   : > { %1901 = vmax.xlane.f32.xlu1 %v7318_v28 }
 0x6e7   : > { %1899 = vmax.xlane.f32.xlu0 %v7315_v39 }
 0x6e8   : > { %v5252_v40 = vpop.f32.mrb[40].mxu0 }
 0x6e9   : > { %1897 = vmax.xlane.f32.xlu1 %v7322_v13  ;;  %v1856_v43 = vpop.f32.mrb[41].mxu0  ;;  %v7330_v33 = vadd.f32 %v7308_v11, %v5252_v40 }
 0x6ea   : > { %v5253_v16 = vpop.f32.mrb[42].mxu0  ;;  %v7341_v2 = vadd.f32 %v7308_v11, %v1856_v43 }
 0x6eb   : > { %v7333_v30 = vadd.f32 %v7308_v11, %v5253_v16  ;;  %1895 = vmax.xlane.f32.xlu0 %v7325_v58  ;;  %v1859_v60 = vpop.f32.mrb[43].mxu0 }
 0x6ec   : > { %v7338_v36 = vadd.f32 %v7308_v11, %v1859_v60 }
 0x6ed   : > { %1909 = vmax.xlane.f32.xlu1 %v7333_v30 }
 0x6ef   : > { %1907 = vmax.xlane.f32.xlu0 %v7330_v33 }
 0x6f0   : > { %v5256_v59 = vpop.f32.mrb[44].mxu0 }
 0x6f1   : > { %1905 = vmax.xlane.f32.xlu1 %v7338_v36  ;;  %v1872_v17 = vpop.f32.mrb[45].mxu0  ;;  %v7347_v20 = vadd.f32 %v7308_v11, %v5256_v59 }
 0x6f2   : > { %v5257_v24 = vpop.f32.mrb[46].mxu0  ;;  %v7351_v0 = vadd.f32 %v7308_v11, %v1872_v17 }
 0x6f3   : > { %1903 = vmax.xlane.f32.xlu0 %v7341_v2  ;;  %v1875_v21 = vpop.f32.mrb[47].mxu0  ;;  %v7359_v1 = vadd.f32 %v7308_v11, %v5257_v24 }
 0x6f4   : > { %v7363_v46 = vadd.f32 %v7308_v11, %v1875_v21 }
 0x6f7   : > { %1915 = vmax.xlane.f32.xlu0 %v7347_v20 }
 0x6fb   : > { %1911 = vmax.xlane.f32.xlu0 %v7351_v0 }
 0x702   : > { %2247 = vrot.lane.b32.xlu1 %v6757_v34, %s6252_s8 }
 0x711   : > { %2245 = vrot.lane.b32.xlu0 %v6751_v29, %s6252_s8 }
 0x726   : > { %1917 = vmax.xlane.f32.xlu1 %v7359_v1 }
 0x72a   : > { %1913 = vmax.xlane.f32.xlu1 %v7363_v46 }
 0x768   : > { %v1892_v31 = vpop.xlane.xlu0 %1891 }
 0x769   : > { %v1921_v37 = vsub.f32 %v1833_v50, %v1892_v31 }
 0x76b   : > { %v1939_v18 = vmul.f32 1.442695, %v1921_v37  ;;  %v1890_v34 = vpop.xlane.xlu1 %1889 }
 0x76c   : > { %v1888_v44 = vpop.xlane.xlu0 %1887  ;;  %v1920_v29 = vsub.f32 %v1828_v5, %v1890_v34 }
 0x76d   : > { %5779 = vpow2.f32 %v1939_v18  ;;  %v1919_v45 = vsub.f32 %v1825_v42, %v1888_v44 }
 0x76e   : > { %v1937_v60 = vmul.f32 1.442695, %v1920_v29 }
 0x76f   : > { %v1935_v63 = vmul.f32 1.442695, %v1919_v45 }
 0x770   : > { %v1894_v54 = vpop.xlane.xlu0 %1893 }
 0x771   : > { %5781 = vpow2.f32 %v1935_v63  ;;  %v1922_v40 = vsub.f32 %v1836_v8, %v1894_v54 }
 0x772   : > { %v1902_v59 = vpop.xlane.xlu1 %1901 }
 0x773   : > { %v1941_v43 = vmul.f32 1.442695, %v1922_v40  ;;  %v1926_v14 = vsub.f32 %v7318_v28, %v1902_v59 }
 0x774   : > { %v1900_v16 = vpop.xlane.xlu0 %1899 }
 0x775   : > { %5783 = vpow2.f32 %v1941_v43  ;;  %v1925_v54 = vsub.f32 %v7315_v39, %v1900_v16  ;;  %v1949_v51 = vmul.f32 1.442695, %v1926_v14 }
 0x776   : > { %5785 = vpow2.f32 %v1937_v60  ;;  %v1898_v42 = vpop.xlane.xlu1 %1897 }
 0x777   : > { %v7366_v17 = vpop.eup %5779  ;;  %v1947_v29 = vmul.f32 1.442695, %v1925_v54  ;;  %v1924_v40 = vsub.f32 %v7322_v13, %v1898_v42 }
 0x778   : > { %1971 = vadd.xlane.f32.xlu0 %v7366_v17  ;;  %v1896_v50 = vpop.xlane.xlu0 %1895 }
 0x779   : > { %v1923_v43 = vsub.f32 %v7325_v58, %v1896_v50  ;;  %5787 = vpow2.f32 %v1947_v29  ;;  %v1945_v60 = vmul.f32 1.442695, %v1924_v40 }
 0x77a   : > { %v1910_v31 = vpop.xlane.xlu1 %1909 }
 0x77b   : > { %v7369_v24 = vpop.eup %5781  ;;  %v1943_v32 = vmul.f32 1.442695, %v1923_v43  ;;  %5789 = vpow2.f32 %v1945_v60  ;;  %v1930_v14 = vsub.f32 %v7333_v30, %v1910_v31 }
 0x77c   : > { %1967 = vadd.xlane.f32.xlu0 %v7369_v24  ;;  %v1908_v21 = vpop.xlane.xlu0 %1907 }
 0x77d   : > { %5791 = vpow2.f32 %v1943_v32 }
 0x77e   : > { %v1906_v44 = vpop.xlane.xlu1 %1905 }
 0x77f   : > { %v7372_v5 = vpop.eup %5783 }
 0x780   : > { %1973 = vadd.xlane.f32.xlu1 %v7372_v5  ;;  %v1904_v8 = vpop.xlane.xlu0 %1903  ;;  %v7375_v37 = vpop.eup %5785 }
 0x782   : > { %v7381_v63 = vpop.permute.xlu1 %2247 }
 0x783   : > { %v7397_v13 = vpop.eup %5787 }
 0x784   : > { %1969 = vadd.xlane.f32.xlu1 %v7375_v37  ;;  %v1916_v18 = vpop.xlane.xlu0 %1915 }
 0x785   : > { %v1933_v23 = vsub.f32 %v7347_v20, %v1916_v18  ;;  %v1927_v20 = vsub.f32 %v7341_v2, %v1904_v8  ;;  %v7401_v16 = vpop.eup %5789  ;;  %v1957_v2 = vmul.f32 1.442695, %v1930_v14 }
 0x788   : > { %v1912_v45 = vpop.xlane.xlu0 %1911 }
 0x789   : > { %v1931_v27 = vsub.f32 %v7351_v0, %v1912_v45  ;;  %v1928_v0 = vsub.f32 %v7338_v36, %v1906_v44 }
 0x78b   : > { %v1959_v39 = vmul.f32 1.442695, %v1931_v27  ;;  %v1951_v27 = vmul.f32 1.442695, %v1927_v20  ;;  %v1953_v50 = vmul.f32 1.442695, %v1928_v0 }
 0x78c   : > { %v7378_v34 = vpop.permute.xlu0 %2245 }
 0x78d   : > { %5326 = vmatprep.subr.bf16.mxu0 %v7378_v34 }
 0x78e   : > { %5327 = vmatpush3.bf16.msra.mxu0 %v7378_v34 }
 0x78f   : > { %5328 = vmatprep.subr.bf16.mxu0 %v7381_v63 }
 0x792   : > { %2249 = vrot.lane.b32.xlu0 %v6763_v38, %s6252_s8  ;;  %5329 = vmatpush3.bf16.msra.mxu0 %v7381_v63  ;;  %v1963_v38 = vmul.f32 1.442695, %v1933_v23 }
 0x794   : > { %5793 = vpow2.f32 %v1963_v38  ;;  %v2282_v38 = vsel %vm768_vm0, %v7273_v6, 0  ;;  %v2291_v6 = vsel %vm768_vm0, %v7381_v63, 0 }
 0x795   : > { %2251 = vrot.lane.b32.xlu1 %v6769_v41, %s6252_s8  ;;  %v1929_v41 = vsub.f32 %v7330_v33, %v1908_v21  ;;  %5795 = vpow2.f32 %v1949_v51  ;;  %v7406_v33 = vpop.eup %5791 }
 0x796   : > { %5797 = vpow2.f32 %v1959_v39 }
 0x797   : > { %v1955_v58 = vmul.f32 1.442695, %v1929_v41 }
 0x799   : > { %5799 = vpow2.f32 %v1955_v58 }
 0x79e   : > { %v7408_v51 = vpop.eup %5793 }
 0x7b1   : > { %1979 = vadd.xlane.f32.xlu0 %v7397_v13 }
 0x7b3   : > { %v1918_v28 = vpop.xlane.xlu1 %1917 }
 0x7b4   : > { %v1934_v23 = vsub.f32 %v7359_v1, %v1918_v28  ;;  %v7413_v1 = vpop.eup %5795 }
 0x7b5   : > { %1977 = vadd.xlane.f32.xlu0 %v7401_v16  ;;  %v7415_v30 = vpop.eup %5797 }
 0x7b6   : > { %v1965_v32 = vmul.f32 1.442695, %v1934_v23  ;;  %v7420_v21 = vpop.eup %5799 }
 0x7b7   : > { %v1914_v59 = vpop.xlane.xlu1 %1913 }
 0x7b8   : > { %5801 = vpow2.f32 %v1965_v32  ;;  %v1932_v42 = vsub.f32 %v7363_v46, %v1914_v59 }
 0x7b9   : > { %1975 = vadd.xlane.f32.xlu1 %v7406_v33  ;;  %1995 = vadd.xlane.f32.xlu0 %v7408_v51  ;;  %5803 = vpow2.f32 %v1951_v27 }
 0x7ba   : > { %5805 = vpow2.f32 %v1957_v2  ;;  %v1961_v36 = vmul.f32 1.442695, %v1932_v42 }
 0x7bb   : > { %5807 = vpow2.f32 %v1953_v50 }
 0x7bc   : > { %5809 = vpow2.f32 %v1961_v36 }
 0x7bd   : > { %1981 = vadd.xlane.f32.xlu1 %v7413_v1  ;;  %1991 = vadd.xlane.f32.xlu0 %v7415_v30 }
 0x7c1   : > { %1987 = vadd.xlane.f32.xlu1 %v7420_v21 }
 0x7c2   : > { %v7423_v8 = vpop.eup %5801 }
 0x7c3   : > { %1997 = vadd.xlane.f32.xlu0 %v7423_v8  ;;  %v7426_v31 = vpop.eup %5803 }
 0x7c4   : > { %v7429_v18 = vpop.eup %5805 }
 0x7c5   : > { %1983 = vadd.xlane.f32.xlu1 %v7426_v31  ;;  %v7432_v46 = vpop.eup %5807 }
 0x7c6   : > { %v7435_v44 = vpop.eup %5809 }
 0x7c9   : > { %1989 = vadd.xlane.f32.xlu1 %v7429_v18 }
 0x7cd   : > { %1985 = vadd.xlane.f32.xlu1 %v7432_v46 }
 0x7d1   : > { %1993 = vadd.xlane.f32.xlu1 %v7435_v44 }
 0x7d9   : > { %2253 = vrot.lane.b32.xlu0 %v6779_v47, %s6252_s8 }
 0x7dd   : > { %2225 = vrot.lane.b32.xlu0 %v6742_v25, %s6252_s8 }
 0x7e1   : > { %2229 = vrot.lane.b32.xlu0 %v6804_v56, %s6252_s8 }
 0x7e2   : > { %2255 = vrot.lane.b32.xlu1 %v6785_v48, %s6252_s8 }
 0x7e5   : > { %2233 = vrot.lane.b32.xlu0 %v6812_v62, %s6252_s8 }
 0x7e6   : > { %2227 = vrot.lane.b32.xlu1 %v6802_v55, %s6252_s8 }
 0x7e9   : > { %2237 = vrot.lane.b32.xlu0 %v6820_v4, %s6252_s8 }
 0x7ea   : > { %2231 = vrot.lane.b32.xlu1 %v6810_v61, %s6252_s8 }
 0x7ee   : > { %2235 = vrot.lane.b32.xlu1 %v6818_v3, %s6252_s8 }
 0x7f2   : > { %2239 = vrot.lane.b32.xlu1 %v6826_v7, %s6252_s8 }
 0x805   : > { %v1972_v25 = vpop.xlane.xlu0 %1971 }
 0x809   : > { %v1968_v47 = vpop.xlane.xlu0 %1967 }
 0x80d   : > { %v1974_v48 = vpop.xlane.xlu1 %1973  ;;  %v2250_v56 = vpop.permute.xlu0 %2249 }
 0x80e   : > { %5330 = vmatprep.subr.bf16.mxu0 %v2250_v56  ;;  %5811 = vrcp.f32 %v1974_v48 }
 0x80f   : > { %5331 = vmatpush3.bf16.msra.mxu0 %v2250_v56  ;;  %5813 = vrcp.f32 %v1968_v47 }
 0x810   : > { %5815 = vrcp.f32 %v1972_v25 }
 0x811   : > { %v1970_v55 = vpop.xlane.xlu1 %1969 }
 0x812   : > { %5817 = vrcp.f32 %v1970_v55 }
 0x815   : > { %v2252_v62 = vpop.permute.xlu1 %2251 }
 0x816   : > { %5332 = vmatprep.subr.bf16.mxu0 %v2252_v62  ;;  %v2297_v58 = vsel %vm768_vm0, %v2252_v62, 0 }
 0x817   : > { %5333 = vmatpush3.bf16.msra.mxu0 %v2252_v62 }
 0x818   : > { %v5812_v61 = vpop.eup %5811 }
 0x819   : > { %v5814_v4 = vpop.eup %5813  ;;  %v2018_v7 = vmul.f32 %v5812_v61, %v7372_v5  ;;  %v2285_v5 = vsel %vm768_vm0, %v7275_v10, 0 }
 0x81a   : > { %v5816_v3 = vpop.eup %5815  ;;  %v2015_v54 = vmul.f32 %v5814_v4, %v7369_v24 }
 0x81b   : > { %v2017_v40 = vmul.f32 %v5816_v3, %v7366_v17  ;;  %v2288_v17 = vsel %vm768_vm0, %v7378_v34, 0 }
 0x81c   : > { %v5818_v45 = vpop.eup %5817 }
 0x81d   : > { %v2016_v29 = vmul.f32 %v5818_v45, %v7375_v37  ;;  %v2032_v60 = vpack.c.bf16 %v2018_v7, %v2017_v40 }
 0x81f   : > { %v2031_v43 = vpack.c.bf16 %v2016_v29, %v2015_v54 }
 0x821   : > { %5274 = vmatprep.mubr.bf16.mxu1 %v2031_v43 }
 0x822   : > { %5275 = vmatmul.mubr.bf16.vlgmr.msra.gmra.mrb[32].mxu1 %v2032_v60 }
 0x823   : > { %5291 = vmatpush3.bf16.xpose.msra.mxu1 %v2282_v38 }
 0x824   : > { %5427 = vmatprep.subr.msk.bf16.mxu1 %vm768_vm0, %v7275_v10  ;;  %v2294_v10 = vsel %vm768_vm0, %v2250_v56, 0 }
 0x82b   : > { %5293 = vmatpush3.bf16.xpose.msra.mxu1 %v2285_v5 }
 0x82c   : > { %5428 = vmatprep.subr.msk.bf16.mxu1 %vm768_vm0, %v7378_v34 }
 0x833   : > { %5295 = vmatpush3.bf16.xpose.msra.mxu1 %v2288_v17 }
 0x834   : > { %5429 = vmatprep.subr.msk.bf16.mxu1 %vm768_vm0, %v7381_v63 }
 0x83b   : > { %5297 = vmatpush3.bf16.xpose.msra.mxu1 %v2291_v6 }
 0x83c   : > { %5430 = vmatprep.subr.msk.bf16.mxu1 %vm768_vm0, %v2250_v56 }
 0x83e   : > { %v1980_v24 = vpop.xlane.xlu0 %1979 }
 0x842   : > { %v1978_v37 = vpop.xlane.xlu0 %1977 }
 0x843   : > { %5299 = vmatpush3.bf16.xpose.msra.mxu1 %v2294_v10  ;;  %5819 = vrcp.f32 %v1978_v37 }
 0x844   : > { %5431 = vmatprep.subr.msk.bf16.mxu1 %vm768_vm0, %v2252_v62 }
 0x846   : > { %v1976_v41 = vpop.xlane.xlu1 %1975  ;;  %v1996_v34 = vpop.xlane.xlu0 %1995 }
 0x847   : > { %5821 = vrcp.f32 %v1976_v41 }
 0x848   : > { %5823 = vrcp.f32 %v1980_v24 }
 0x84a   : > { %v1982_v39 = vpop.xlane.xlu1 %1981  ;;  %v1992_v63 = vpop.xlane.xlu0 %1991 }
 0x84b   : > { %5825 = vrcp.f32 %v1982_v39  ;;  %5301 = vmatpush3.bf16.xpose.msra.mxu1 %v2297_v58 }
 0x84d   : > { %v5820_v28 = vpop.eup %5819 }
 0x84e   : > { %v1988_v20 = vpop.xlane.xlu1 %1987  ;;  %v2020_v2 = vmul.f32 %v5820_v28, %v7401_v16 }
 0x850   : > { %v1998_v23 = vpop.xlane.xlu0 %1997 }
 0x851   : > { %v5822_v14 = vpop.eup %5821 }
 0x852   : > { %v1984_v27 = vpop.xlane.xlu1 %1983  ;;  %v2019_v32 = vmul.f32 %v5822_v14, %v7406_v33  ;;  %v5824_v0 = vpop.eup %5823 }
 0x853   : > { %v2021_v47 = vmul.f32 %v5824_v0, %v7397_v13 }
 0x854   : > { %v2033_v59 = vpack.c.bf16 %v2020_v2, %v2019_v32  ;;  %v2254_v50 = vpop.permute.xlu0 %2253 }
 0x855   : > { %v5826_v42 = vpop.eup %5825  ;;  %5334 = vmatprep.subr.bf16.mxu0 %v2254_v50  ;;  %5432 = vmatprep.subr.msk.bf16.mxu1 %vm768_vm0, %v2254_v50  ;;  %v2300_v36 = vsel %vm768_vm0, %v2254_v50, 0 }
 0x856   : > { %v1990_v25 = vpop.xlane.xlu1 %1989  ;;  %5278 = vmatprep.mubr.bf16.mxu1 %v2033_v59  ;;  %v2022_v48 = vmul.f32 %v5826_v42, %v7413_v1  ;;  %5335 = vmatpush3.bf16.msra.mxu0 %v2254_v50 }
 0x857   : > { %5303 = vmatpush3.bf16.xpose.msra.mxu1 %v2300_v36  ;;  %5827 = vrcp.f32 %v1990_v25 }
 0x858   : > { %v2034_v33 = vpack.c.bf16 %v2022_v48, %v2021_v47  ;;  %5829 = vrcp.f32 %v1984_v27  ;;  %v2226_v10 = vpop.permute.xlu0 %2225 }
 0x859   : > { %5831 = vrcp.f32 %v1988_v20 }
 0x85a   : > { %v1986_v16 = vpop.xlane.xlu1 %1985  ;;  %5279 = vmatmul.mubr.bf16.gmra.mrb[36].mxu1 %v2034_v33 }
 0x85b   : > { %5833 = vrcp.f32 %v1986_v16 }
 0x85c   : > { %5835 = vrcp.f32 %v1992_v63  ;;  %v2230_v37 = vpop.permute.xlu0 %2229 }
 0x85e   : > { %v1994_v56 = vpop.xlane.xlu1 %1993 }
 0x85f   : > { %5837 = vrcp.f32 %v1994_v56 }
 0x860   : > { %5839 = vrcp.f32 %v1998_v23 }
 0x861   : > { %v5828_v55 = vpop.eup %5827  ;;  %5841 = vrcp.f32 %v1996_v34 }
 0x862   : > { %v2256_v62 = vpop.permute.xlu1 %2255  ;;  %v5830_v61 = vpop.eup %5829  ;;  %v2026_v3 = vmul.f32 %v5828_v55, %v7429_v18 }
 0x863   : > { %5336 = vmatprep.subr.bf16.mxu0 %v2256_v62  ;;  %5433 = vmatprep.subr.msk.bf16.mxu1 %vm768_vm0, %v2256_v62  ;;  %v2303_v13 = vsel %vm768_vm0, %v2256_v62, 0  ;;  %v5832_v1 = vpop.eup %5831  ;;  %v2023_v45 = vmul.f32 %v5830_v61, %v7426_v31 }
 0x864   : > { %5337 = vmatpush3.bf16.msra.mxu0 %v2256_v62  ;;  %5305 = vmatpush3.bf16.xpose.msra.mxu1 %v2303_v13  ;;  %v2025_v29 = vmul.f32 %v5832_v1, %v7420_v21 }
 0x865   : > { %v5834_v4 = vpop.eup %5833 }
 0x866   : > { %v2024_v7 = vmul.f32 %v5834_v4, %v7432_v46  ;;  %v5836_v54 = vpop.eup %5835  ;;  %v2036_v60 = vpack.c.bf16 %v2026_v3, %v2025_v29  ;;  %v2228_v21 = vpop.permute.xlu1 %2227 }
 0x867   : > { %v2027_v5 = vmul.f32 %v5836_v54, %v7415_v30 }
 0x868   : > { %v2035_v40 = vpack.c.bf16 %v2024_v7, %v2023_v45 }
 0x869   : > { %v5838_v43 = vpop.eup %5837 }
 0x86a   : > { %v5840_v38 = vpop.eup %5839  ;;  %5282 = vmatprep.mubr.bf16.mxu1 %v2035_v40  ;;  %v2028_v17 = vmul.f32 %v5838_v43, %v7435_v44  ;;  %v2232_v30 = vpop.permute.xlu1 %2231 }
 0x86b   : > { %5283 = vmatmul.mubr.bf16.gmra.mrb[40].mxu1 %v2036_v60  ;;  %v5842_v6 = vpop.eup %5841  ;;  %v2030_v18 = vmul.f32 %v5840_v38, %v7423_v8  ;;  %v2234_v44 = vpop.permute.xlu0 %2233 }
 0x86c   : > { %v2037_v24 = vpack.c.bf16 %v2028_v17, %v2027_v5  ;;  %v2029_v31 = vmul.f32 %v5842_v6, %v7408_v51 }
 0x86e   : > { %5286 = vmatprep.mubr.bf16.mxu1 %v2037_v24  ;;  %v2038_v46 = vpack.c.bf16 %v2030_v18, %v2029_v31  ;;  %v2236_v8 = vpop.permute.xlu1 %2235 }
 0x86f   : > { %v2238_v41 = vpop.permute.xlu0 %2237 }
 0x872   : > { %v2240_v51 = vpop.permute.xlu1 %2239 }
 0x873   : > { %5287 = vmatmul.mubr.bf16.gmra.mrb[44].mxu1 %v2038_v46 }
 0x874   : > { %5306 = vmatprep.mubr.msk.bf16.mxu1 %vm768_vm0, %v2226_v10 }
 0x87b   : > { %5307 = vmatmul.mubr.msk.bf16.vlgmr.msra.gmra.mrb[48].mxu1 %vm768_vm0, %v2228_v21 }
 0x87c   : > { %5310 = vmatprep.mubr.msk.bf16.mxu1 %vm768_vm0, %v2230_v37 }
 0x883   : > { %5311 = vmatmul.mubr.msk.bf16.gmra.mrb[52].mxu1 %vm768_vm0, %v2232_v30 }
 0x884   : > { %5314 = vmatprep.mubr.msk.bf16.mxu1 %vm768_vm0, %v2234_v44 }
 0x88b   : > { %5315 = vmatmul.mubr.msk.bf16.gmra.mrb[56].mxu1 %vm768_vm0, %v2236_v8 }
 0x88c   : > { %5318 = vmatprep.mubr.msk.bf16.mxu1 %vm768_vm0, %v2238_v41 }
 0x893   : > { %5319 = vmatmul.mubr.msk.bf16.gmra.mrb[60].mxu1 %vm768_vm0, %v2240_v51 }
 0x8f5   : > { %v7504_v34 = vpop.f32.mrb[32].mxu1 }
 0x8f6   : > { %v7506_v39 = vpop.f32.mrb[33].mxu1 }
 0x8f7   : > { %v7508_v58 = vpop.f32.mrb[34].mxu1 }
 0x8f8   : > { %v7510_v63 = vpop.f32.mrb[35].mxu1 }
 0x92d   : > { %v7512_v20 = vpop.f32.mrb[36].mxu1 }
 0x92e   : > { %v7514_v28 = vpop.f32.mrb[37].mxu1 }
 0x92f   : > { %v7516_v23 = vpop.f32.mrb[38].mxu1 }
 0x930   : > { %v7518_v14 = vpop.f32.mrb[39].mxu1 }
 0x93e   : > { %v7520_v27 = vpop.f32.mrb[40].mxu1 }
 0x93f   : > { %v7522_v32 = vpop.f32.mrb[41].mxu1 }
 0x940   : > { %v7524_v2 = vpop.f32.mrb[42].mxu1 }
 0x941   : > { %v7526_v0 = vpop.f32.mrb[43].mxu1 }
 0x946   : > { %v7528_v59 = vpop.f32.mrb[44].mxu1 }
 0x947   : > { %v7530_v50 = vpop.f32.mrb[45].mxu1 }
 0x948   : > { %v7532_v42 = vpop.f32.mrb[46].mxu1 }
 0x949   : > { %v7534_v36 = vpop.f32.mrb[47].mxu1 }
 0x94e   : > { %v5308_v25 = vpop.f32.mrb[48].mxu1 }
 0x94f   : > { %v2339_v47 = vpop.f32.mrb[49].mxu1  ;;  %v2348_v55 = vadd.f32 %v7308_v11, %v5308_v25 }
 0x950   : > { %v2340_v48 = vadd.f32 %v7308_v11, %v2339_v47  ;;  %v5309_v33 = vpop.f32.mrb[50].mxu1 }
 0x951   : > { %v2342_v16 = vpop.f32.mrb[51].mxu1  ;;  %v2351_v13 = vadd.f32 %v7308_v11, %v5309_v33 }
 0x952   : > { %v2343_v56 = vadd.f32 %v7308_v11, %v2342_v16  ;;  %2402 = vmax.xlane.f32.xlu0 %v2340_v48 }
 0x954   : > { %2404 = vmax.xlane.f32.xlu1 %v2343_v56 }
 0x956   : > { %2406 = vmax.xlane.f32.xlu0 %v2348_v55  ;;  %v5312_v62 = vpop.f32.mrb[52].mxu1 }
 0x957   : > { %v2355_v61 = vpop.f32.mrb[53].mxu1  ;;  %v7544_v54 = vadd.f32 %v7308_v11, %v5312_v62 }
 0x958   : > { %v5313_v1 = vpop.f32.mrb[54].mxu1  ;;  %v2356_v3 = vadd.f32 %v7308_v11, %v2355_v61 }
 0x959   : > { %v2358_v4 = vpop.f32.mrb[55].mxu1  ;;  %v2367_v7 = vadd.f32 %v7308_v11, %v5313_v1 }
 0x95a   : > { %v2359_v45 = vadd.f32 %v7308_v11, %v2358_v4  ;;  %2408 = vmax.xlane.f32.xlu0 %v2351_v13 }
 0x95c   : > { %2412 = vmax.xlane.f32.xlu1 %v2359_v45 }
 0x95e   : > { %2410 = vmax.xlane.f32.xlu0 %v2356_v3  ;;  %v5316_v29 = vpop.f32.mrb[56].mxu1 }
 0x95f   : > { %v2371_v40 = vpop.f32.mrb[57].mxu1  ;;  %v7555_v6 = vadd.f32 %v7308_v11, %v5316_v29 }
 0x960   : > { %2416 = vmax.xlane.f32.xlu1 %v2367_v7  ;;  %v5317_v43 = vpop.f32.mrb[58].mxu1  ;;  %v7547_v38 = vadd.f32 %v7308_v11, %v2371_v40 }
 0x961   : > { %v2374_v60 = vpop.f32.mrb[59].mxu1  ;;  %v7552_v17 = vadd.f32 %v7308_v11, %v5317_v43 }
 0x962   : > { %v2375_v5 = vadd.f32 %v7308_v11, %v2374_v60  ;;  %2414 = vmax.xlane.f32.xlu0 %v7544_v54 }
 0x964   : > { %2420 = vmax.xlane.f32.xlu1 %v2375_v5 }
 0x966   : > { %2418 = vmax.xlane.f32.xlu0 %v7547_v38  ;;  %v5320_v24 = vpop.f32.mrb[60].mxu1 }
 0x967   : > { %v2387_v18 = vpop.f32.mrb[61].mxu1  ;;  %v7571_v30 = vadd.f32 %v7308_v11, %v5320_v24 }
 0x968   : > { %2424 = vmax.xlane.f32.xlu1 %v7552_v17  ;;  %v5321_v31 = vpop.f32.mrb[62].mxu1  ;;  %v7560_v10 = vadd.f32 %v7308_v11, %v2387_v18 }
 0x969   : > { %v2390_v46 = vpop.f32.mrb[63].mxu1  ;;  %v7567_v37 = vadd.f32 %v7308_v11, %v5321_v31 }
 0x96a   : > { %v7563_v21 = vadd.f32 %v7308_v11, %v2390_v46  ;;  %2422 = vmax.xlane.f32.xlu0 %v7555_v6 }
 0x96c   : > { %2428 = vmax.xlane.f32.xlu1 %v7563_v21 }
 0x96e   : > { %2426 = vmax.xlane.f32.xlu0 %v7560_v10 }
 0x970   : > { %2432 = vmax.xlane.f32.xlu1 %v7567_v37 }
 0x972   : > { %2430 = vmax.xlane.f32.xlu0 %v7571_v30 }
 0x9df   : > { %v2403_v44 = vpop.xlane.xlu0 %2402 }
 0x9e0   : > { %v2434_v8 = vsub.f32 %v2340_v48, %v2403_v44 }
 0x9e1   : > { %v2405_v41 = vpop.xlane.xlu1 %2404 }
 0x9e2   : > { %v2450_v51 = vmul.f32 1.442695, %v2434_v8  ;;  %v2435_v25 = vsub.f32 %v2343_v56, %v2405_v41 }
 0x9e3   : > { %v2407_v47 = vpop.xlane.xlu0 %2406 }
 0x9e4   : > { %5843 = vpow2.f32 %v2450_v51  ;;  %v2452_v33 = vmul.f32 1.442695, %v2435_v25  ;;  %v2436_v16 = vsub.f32 %v2348_v55, %v2407_v47 }
 0x9e6   : > { %5845 = vpow2.f32 %v2452_v33  ;;  %v2454_v62 = vmul.f32 1.442695, %v2436_v16 }
 0x9e7   : > { %v2409_v61 = vpop.xlane.xlu0 %2408 }
 0x9e8   : > { %5847 = vpow2.f32 %v2454_v62  ;;  %v2437_v11 = vsub.f32 %v2351_v13, %v2409_v61 }
 0x9e9   : > { %v2413_v1 = vpop.xlane.xlu1 %2412 }
 0x9ea   : > { %v2456_v4 = vmul.f32 1.442695, %v2437_v11  ;;  %v2439_v29 = vsub.f32 %v2359_v45, %v2413_v1 }
 0x9eb   : > { %v2411_v40 = vpop.xlane.xlu0 %2410 }
 0x9ec   : > { %5849 = vpow2.f32 %v2456_v4  ;;  %v2460_v43 = vmul.f32 1.442695, %v2439_v29  ;;  %v2438_v60 = vsub.f32 %v2356_v3, %v2411_v40 }
 0x9ed   : > { %v2417_v48 = vpop.xlane.xlu1 %2416 }
 0x9ee   : > { %v7576_v24 = vpop.eup %5843  ;;  %v2458_v56 = vmul.f32 1.442695, %v2438_v60  ;;  %v2441_v18 = vsub.f32 %v2367_v7, %v2417_v48  ;;  %5851 = vpow2.f32 %v2460_v43 }
 0x9ef   : > { %2482 = vadd.xlane.f32.xlu0 %v7576_v24  ;;  %v2415_v55 = vpop.xlane.xlu0 %2414 }
 0x9f0   : > { %v7579_v31 = vpop.eup %5845  ;;  %5853 = vpow2.f32 %v2458_v56  ;;  %v2464_v13 = vmul.f32 1.442695, %v2441_v18  ;;  %v2440_v46 = vsub.f32 %v7544_v54, %v2415_v55 }
 0x9f1   : > { %v2421_v45 = vpop.xlane.xlu1 %2420  ;;  %2484 = vadd.xlane.f32.xlu1 %v7579_v31 }
 0x9f2   : > { %v7583_v44 = vpop.eup %5847  ;;  %v2462_v3 = vmul.f32 1.442695, %v2440_v46  ;;  %v2443_v8 = vsub.f32 %v2375_v5, %v2421_v45  ;;  %5855 = vpow2.f32 %v2464_v13 }
 0x9f3   : > { %2486 = vadd.xlane.f32.xlu0 %v7583_v44  ;;  %v2419_v7 = vpop.xlane.xlu0 %2418 }
 0x9f4   : > { %5857 = vpow2.f32 %v2462_v3  ;;  %v2468_v41 = vmul.f32 1.442695, %v2443_v8  ;;  %v2442_v51 = vsub.f32 %v7547_v38, %v2419_v7 }
 0x9f5   : > { %v2425_v25 = vpop.xlane.xlu1 %2424 }
 0x9f6   : > { %v7587_v47 = vpop.eup %5849  ;;  %v2466_v33 = vmul.f32 1.442695, %v2442_v51  ;;  %v2445_v54 = vsub.f32 %v7552_v17, %v2425_v25  ;;  %5859 = vpow2.f32 %v2468_v41 }
 0x9f7   : > { %2488 = vadd.xlane.f32.xlu1 %v7587_v47  ;;  %v2423_v16 = vpop.xlane.xlu0 %2422 }
 0x9f8   : > { %5861 = vpow2.f32 %v2466_v33  ;;  %v2472_v5 = vmul.f32 1.442695, %v2445_v54  ;;  %v2444_v62 = vsub.f32 %v7555_v6, %v2423_v16  ;;  %v7592_v61 = vpop.eup %5851 }
 0x9f9   : > { %v2429_v11 = vpop.xlane.xlu1 %2428 }
 0x9fa   : > { %v7594_v1 = vpop.eup %5853  ;;  %v2470_v38 = vmul.f32 1.442695, %v2444_v62  ;;  %v2447_v4 = vsub.f32 %v7563_v21, %v2429_v11  ;;  %5863 = vpow2.f32 %v2472_v5 }
 0x9fb   : > { %2492 = vadd.xlane.f32.xlu1 %v7592_v61  ;;  %2490 = vadd.xlane.f32.xlu0 %v7594_v1  ;;  %v2427_v17 = vpop.xlane.xlu0 %2426 }
 0x9fc   : > { %5865 = vpow2.f32 %v2470_v38  ;;  %v2476_v29 = vmul.f32 1.442695, %v2447_v4  ;;  %v2446_v40 = vsub.f32 %v7560_v10, %v2427_v17  ;;  %v7600_v43 = vpop.eup %5855 }
 0x9fd   : > { %v2433_v6 = vpop.xlane.xlu1 %2432 }
 0x9fe   : > { %v7602_v60 = vpop.eup %5857  ;;  %v2474_v48 = vmul.f32 1.442695, %v2446_v40  ;;  %v2449_v56 = vsub.f32 %v7567_v37, %v2433_v6  ;;  %5867 = vpow2.f32 %v2476_v29 }
 0x9ff   : > { %2496 = vadd.xlane.f32.xlu1 %v7600_v43  ;;  %2494 = vadd.xlane.f32.xlu0 %v7602_v60  ;;  %v2431_v21 = vpop.xlane.xlu0 %2430 }
 0xa00   : > { %5869 = vpow2.f32 %v2474_v48  ;;  %v2480_v18 = vmul.f32 1.442695, %v2449_v56  ;;  %v2448_v55 = vsub.f32 %v7571_v30, %v2431_v21  ;;  %v7608_v13 = vpop.eup %5859 }
 0xa02   : > { %v7610_v10 = vpop.eup %5861  ;;  %v2478_v46 = vmul.f32 1.442695, %v2448_v55  ;;  %5871 = vpow2.f32 %v2480_v18 }
 0xa03   : > { %2500 = vadd.xlane.f32.xlu1 %v7608_v13  ;;  %2498 = vadd.xlane.f32.xlu0 %v7610_v10 }
 0xa04   : > { %5873 = vpow2.f32 %v2478_v46  ;;  %v7614_v37 = vpop.eup %5863 }
 0xa06   : > { %v7616_v45 = vpop.eup %5865 }
 0xa07   : > { %2504 = vadd.xlane.f32.xlu1 %v7614_v37  ;;  %2502 = vadd.xlane.f32.xlu0 %v7616_v45 }
 0xa08   : > { %v7620_v30 = vpop.eup %5867 }
 0xa0a   : > { %v7622_v3 = vpop.eup %5869 }
 0xa0b   : > { %2508 = vadd.xlane.f32.xlu1 %v7620_v30  ;;  %2506 = vadd.xlane.f32.xlu0 %v7622_v3 }
 0xa0c   : > { %v7626_v8 = vpop.eup %5871 }
 0xa0e   : > { %v7628_v7 = vpop.eup %5873 }
 0xa0f   : > { %2512 = vadd.xlane.f32.xlu1 %v7626_v8  ;;  %2510 = vadd.xlane.f32.xlu0 %v7628_v7 }
 0xa20   : > { %1647 = vrot.lane.b32.xlu1 %v7271_v26, %s6252_s8 }
 0xa24   : > { %1649 = vrot.lane.b32.xlu1 %v7265_v52, %s6252_s8 }
 0xa25   : > { %1645 = vrot.lane.b32.xlu0 %v7267_v53, %s6252_s8 }
 0xa28   : > { %1651 = vrot.lane.b32.xlu1 %v7269_v35, %s6252_s8 }
 0xa29   : > { %2160 = vrot.lane.b32.xlu0 %v7506_v39, %s6251_s6 }
 0xa2c   : > { %2162 = vrot.lane.b32.xlu1 %v7510_v63, %s6251_s6 }
 0xa2d   : > { %2164 = vrot.lane.b32.xlu0 %v7504_v34, %s6251_s6 }
 0xa30   : > { %2166 = vrot.lane.b32.xlu1 %v7508_v58, %s6251_s6 }
 0xa31   : > { %1653 = vrot.lane.b32.xlu0 %v7285_v22, %s6252_s8 }
 0xa34   : > { %1655 = vrot.lane.b32.xlu1 %v7289_v12, %s6252_s8 }
 0xa35   : > { %1657 = vrot.lane.b32.xlu0 %v7283_v19, %s6252_s8 }
 0xa38   : > { %1659 = vrot.lane.b32.xlu1 %v7287_v57, %s6252_s8 }
 0xa39   : > { %2168 = vrot.lane.b32.xlu0 %v7514_v28, %s6251_s6 }
 0xa3c   : > { %2170 = vrot.lane.b32.xlu1 %v7518_v14, %s6251_s6 }
 0xa3d   : > { %2172 = vrot.lane.b32.xlu0 %v7512_v20, %s6251_s6 }
 0xa40   : > { %2174 = vrot.lane.b32.xlu1 %v7516_v23, %s6251_s6 }
 0xa41   : > { %1661 = vrot.lane.b32.xlu0 %v7293_v9, %s6252_s8 }
 0xa44   : > { %1663 = vrot.lane.b32.xlu1 %v7297_v49, %s6252_s8 }
 0xa7c   : > { %v2483_v52 = vpop.xlane.xlu0 %2482 }
 0xa7d   : > { %5875 = vrcp.f32 %v2483_v52 }
 0xa7e   : > { %v2485_v53 = vpop.xlane.xlu1 %2484 }
 0xa7f   : > { %5877 = vrcp.f32 %v2485_v53 }
 0xa80   : > { %v2487_v35 = vpop.xlane.xlu0 %2486 }
 0xa81   : > { %5879 = vrcp.f32 %v2487_v35 }
 0xa84   : > { %v2489_v26 = vpop.xlane.xlu1 %2488 }
 0xa85   : > { %5881 = vrcp.f32 %v2489_v26 }
 0xa87   : > { %v5876_v19 = vpop.eup %5875 }
 0xa88   : > { %v2493_v22 = vpop.xlane.xlu1 %2492  ;;  %v2491_v57 = vpop.xlane.xlu0 %2490  ;;  %v2530_v34 = vmul.f32 %v5876_v19, %v7576_v24 }
 0xa89   : > { %v5878_v12 = vpop.eup %5877  ;;  %5883 = vrcp.f32 %v2493_v22 }
 0xa8a   : > { %5885 = vrcp.f32 %v2491_v57  ;;  %v2531_v9 = vmul.f32 %v5878_v12, %v7579_v31 }
 0xa8b   : > { %v5880_v63 = vpop.eup %5879 }
 0xa8c   : > { %v2497_v39 = vpop.xlane.xlu1 %2496  ;;  %v2495_v49 = vpop.xlane.xlu0 %2494  ;;  %v2546_v58 = vpack.c.bf16 %v2531_v9, %v2530_v34  ;;  %v2532_v28 = vmul.f32 %v5880_v63, %v7583_v44 }
 0xa8d   : > { %5887 = vrcp.f32 %v2497_v39 }
 0xa8e   : > { %5889 = vrcp.f32 %v2495_v49  ;;  %5338 = vmatprep.mubr.bf16.mxu0 %v2546_v58 }
 0xa8f   : > { %v5882_v20 = vpop.eup %5881 }
 0xa90   : > { %v2533_v23 = vmul.f32 %v5882_v20, %v7587_v47  ;;  %v2501_v14 = vpop.xlane.xlu1 %2500  ;;  %v2499_v41 = vpop.xlane.xlu0 %2498 }
 0xa91   : > { %5891 = vrcp.f32 %v2501_v14 }
 0xa92   : > { %5893 = vrcp.f32 %v2499_v41  ;;  %v2547_v51 = vpack.c.bf16 %v2533_v23, %v2532_v28 }
 0xa93   : > { %v5884_v24 = vpop.eup %5883 }
 0xa94   : > { %v5886_v25 = vpop.eup %5885  ;;  %v2505_v31 = vpop.xlane.xlu1 %2504  ;;  %5339 = vmatmul.mubr.bf16.vlgmr.msra.gmra.mrb[48].mxu0 %v2547_v51  ;;  %v2535_v54 = vmul.f32 %v5884_v24, %v7592_v61  ;;  %v5563_v51 = vld [vmem:[%s6646_s7] sm:$0xff]   ;;  %v5564_v24 = vld [vmem:[%s6646_s7 + $0x8] sm:$0xff]  }
 0xa95   : > { %v2503_v33 = vpop.xlane.xlu0 %2502  ;;  %5895 = vrcp.f32 %v2505_v31  ;;  %v2534_v16 = vmul.f32 %v5886_v25, %v7594_v1  ;;  %5354 = vmatprep.subr.bf16.mxu0 %v5563_v51  ;;  %v5565_v25 = vld [vmem:[%s6646_s7 + $0x10] sm:$0xff]   ;;  %v5566_v31 = vld [vmem:[%s6646_s7 + $0x18] sm:$0xff]  }
 0xa96   : > { %5897 = vrcp.f32 %v2503_v33  ;;  %5355 = vmatpush3.bf16.msra.mxu0 %v5563_v51  ;;  %v5567_v33 = vld [vmem:[%s6646_s7 + $0x20] sm:$0xff]  }
 0xa97   : > { %v5888_v5 = vpop.eup %5887  ;;  %v2548_v44 = vpack.c.bf16 %v2535_v54, %v2534_v16  ;;  %5356 = vmatprep.subr.bf16.mxu0 %v5564_v24  ;;  %v5568_v54 = vld [vmem:[%s6646_s7 + $0x28] sm:$0xff]   ;;  %v5569_v16 = vld [vmem:[%s6646_s7 + $0x30] sm:$0xff]  }
 0xa98   : > { %v5890_v62 = vpop.eup %5889  ;;  %v2509_v47 = vpop.xlane.xlu1 %2508  ;;  %v2537_v38 = vmul.f32 %v5888_v5, %v7600_v43 }
 0xa99   : > { %v2507_v11 = vpop.xlane.xlu0 %2506  ;;  %5899 = vrcp.f32 %v2509_v47  ;;  %5342 = vmatprep.mubr.bf16.mxu0 %v2548_v44  ;;  %v2536_v4 = vmul.f32 %v5890_v62, %v7602_v60  ;;  %v5570_v44 = vld [vmem:[%s6646_s7 + $0x38] sm:$0xff]   ;;  %s8687_s7 = scalar_lea.vmem %s8686_s4, %s6664_s20  ;;  %s8694_s20 = sld [smem:[#allocation23_spill]] }
 0xa9a   : > { %5901 = vrcp.f32 %v2507_v11  ;;  %5357 = vmatpush3.bf16.msra.mxu0 %v5564_v24  ;;  %s6254_s4 = smov [#allocation12]  }
 0xa9b   : > { %v5892_v17 = vpop.eup %5891  ;;  %v2549_v29 = vpack.c.bf16 %v2537_v38, %v2536_v4  ;;  %5358 = vmatprep.subr.bf16.mxu0 %v5565_v25 }
 0xa9c   : > { %v5894_v40 = vpop.eup %5893  ;;  %v2513_v61 = vpop.xlane.xlu1 %2512  ;;  %v2539_v1 = vmul.f32 %v5892_v17, %v7608_v13 }
 0xa9d   : > { %v2511_v6 = vpop.xlane.xlu0 %2510  ;;  %5903 = vrcp.f32 %v2513_v61  ;;  %5343 = vmatmul.mubr.bf16.gmra.mrb[52].mxu0 %v2549_v29  ;;  %v2538_v48 = vmul.f32 %v5894_v40, %v7610_v10  ;;  %v8681_v29 = vld [vmem:[#allocation31_spill] sm:$0xff] }
 0xa9e   : > { %5905 = vrcp.f32 %v2511_v6  ;;  %5359 = vmatpush3.bf16.msra.mxu0 %v5565_v25 }
 0xa9f   : > { %v5896_v56 = vpop.eup %5895  ;;  %v2550_v43 = vpack.c.bf16 %v2539_v1, %v2538_v48  ;;  %5360 = vmatprep.subr.bf16.mxu0 %v5566_v31 }
 0xaa0   : > { %v5898_v21 = vpop.eup %5897  ;;  %v1648_v18 = vpop.permute.xlu1 %1647  ;;  %v2541_v60 = vmul.f32 %v5896_v56, %v7614_v37 }
 0xaa1   : > { %v1646_v55 = vpop.permute.xlu0 %1645  ;;  %1695 = vst.msk [vmem:[#allocation3 + $0x8] sm:$0xff] %vm1693_vm1, %v1648_v18  ;;  %5346 = vmatprep.mubr.bf16.mxu0 %v2550_v43  ;;  %v2540_v13 = vmul.f32 %v5898_v21, %v7616_v45  ;;  %v8682_v43 = vld [vmem:[#allocation33_spill] sm:$0xff]  ;;  %v8683_v21 = vld [vmem:[#allocation35_spill] sm:$0xff] }
 0xaa2   : > { %1694 = vst.msk [vmem:[#allocation3] sm:$0xff] %vm1693_vm1, %v1646_v55  ;;  %5361 = vmatpush3.bf16.msra.mxu0 %v5566_v31 }
 0xaa3   : > { %v5900_v46 = vpop.eup %5899  ;;  %v2551_v52 = vpack.c.bf16 %v2541_v60, %v2540_v13  ;;  %5362 = vmatprep.subr.bf16.mxu0 %v5567_v33 }
 0xaa4   : > { %v5902_v10 = vpop.eup %5901  ;;  %v1650_v53 = vpop.permute.xlu1 %1649  ;;  %v2543_v26 = vmul.f32 %v5900_v46, %v7620_v30 }
 0xaa5   : > { %v2161_v35 = vpop.permute.xlu0 %2160  ;;  %1696 = vst.msk [vmem:[#allocation3 + $0x10] sm:$0xff] %vm1693_vm1, %v1650_v53  ;;  %5347 = vmatmul.mubr.bf16.gmra.mrb[56].mxu0 %v2551_v52  ;;  %v2542_v37 = vmul.f32 %v5902_v10, %v7622_v3 }
 0xaa6   : > { %2209 = vst.msk [vmem:[#allocation3] sm:$0xff] %vm2208_vm2, %v2161_v35  ;;  %5363 = vmatpush3.bf16.msra.mxu0 %v5567_v33 }
 0xaa7   : > { %v5904_v19 = vpop.eup %5903  ;;  %v2552_v22 = vpack.c.bf16 %v2543_v26, %v2542_v37  ;;  %5364 = vmatprep.subr.bf16.mxu0 %v5568_v54 }
 0xaa8   : > { %v5906_v57 = vpop.eup %5905  ;;  %v1652_v12 = vpop.permute.xlu1 %1651  ;;  %v2545_v34 = vmul.f32 %v5904_v19, %v7626_v8 }
 0xaa9   : > { %v2165_v45 = vpop.permute.xlu0 %2164  ;;  %1697 = vst.msk [vmem:[#allocation3 + $0x18] sm:$0xff] %vm1693_vm1, %v1652_v12  ;;  %5350 = vmatprep.mubr.bf16.mxu0 %v2552_v22  ;;  %v2544_v30 = vmul.f32 %v5906_v57, %v7628_v7 }
 0xaaa   : > { %2211 = vst.msk [vmem:[#allocation3 + $0x10] sm:$0xff] %vm2208_vm2, %v2165_v45  ;;  %5365 = vmatpush3.bf16.msra.mxu0 %v5568_v54 }
 0xaab   : > { %v2553_v9 = vpack.c.bf16 %v2545_v34, %v2544_v30  ;;  %5366 = vmatprep.subr.bf16.mxu0 %v5569_v16 }
 0xaac   : > { %v2163_v39 = vpop.permute.xlu1 %2162 }
 0xaad   : > { %v1654_v49 = vpop.permute.xlu0 %1653  ;;  %2210 = vst.msk [vmem:[#allocation3 + $0x8] sm:$0xff] %vm2208_vm2, %v2163_v39  ;;  %5351 = vmatmul.mubr.bf16.gmra.mrb[60].mxu0 %v2553_v9 }
 0xaae   : > { %1698 = vst.msk [vmem:[#allocation3 + $0x20] sm:$0xff] %vm1693_vm1, %v1654_v49  ;;  %5367 = vmatpush3.bf16.msra.mxu0 %v5569_v16 }
 0xaaf   : > { %5368 = vmatprep.subr.bf16.mxu0 %v5570_v44 }
 0xab0   : > { %v2167_v3 = vpop.permute.xlu1 %2166 }
 0xab1   : > { %v1658_v58 = vpop.permute.xlu0 %1657  ;;  %2212 = vst.msk [vmem:[#allocation3 + $0x18] sm:$0xff] %vm2208_vm2, %v2167_v3 }
 0xab2   : > { %1700 = vst.msk [vmem:[#allocation3 + $0x30] sm:$0xff] %vm1693_vm1, %v1658_v58  ;;  %5369 = vmatpush3.bf16.msra.mxu0 %v5570_v44 }
 0xab4   : > { %v1656_v8 = vpop.permute.xlu1 %1655 }
 0xab5   : > { %v2169_v63 = vpop.permute.xlu0 %2168  ;;  %1699 = vst.msk [vmem:[#allocation3 + $0x28] sm:$0xff] %vm1693_vm1, %v1656_v8 }
 0xab6   : > { %2213 = vst.msk [vmem:[#allocation3 + $0x20] sm:$0xff] %vm2208_vm2, %v2169_v63 }
 0xab8   : > { %v1660_v7 = vpop.permute.xlu1 %1659 }
 0xab9   : > { %v2173_v20 = vpop.permute.xlu0 %2172  ;;  %1701 = vst.msk [vmem:[#allocation3 + $0x38] sm:$0xff] %vm1693_vm1, %v1660_v7 }
 0xaba   : > { %2215 = vst.msk [vmem:[#allocation3 + $0x30] sm:$0xff] %vm2208_vm2, %v2173_v20 }
 0xabc   : > { %v2171_v28 = vpop.permute.xlu1 %2170 }
 0xabd   : > { %v1662_v23 = vpop.permute.xlu0 %1661  ;;  %2214 = vst.msk [vmem:[#allocation3 + $0x28] sm:$0xff] %vm2208_vm2, %v2171_v28 }
 0xabe   : > { %1702 = vst.msk [vmem:[#allocation3 + $0x40] sm:$0xff] %vm1693_vm1, %v1662_v23 }
 0xac0   : > { %v2175_v14 = vpop.permute.xlu1 %2174 }
 0xac1   : > { %2216 = vst.msk [vmem:[#allocation3 + $0x38] sm:$0xff] %vm2208_vm2, %v2175_v14 }
 0xac4   : > { %v1664_v41 = vpop.permute.xlu1 %1663 }
 0xac5   : > { %1703 = vst.msk [vmem:[#allocation3 + $0x48] sm:$0xff] %vm1693_vm1, %v1664_v41 }
 0xb67   : > { %v5340_v5 = vpop.f32.mrb[48].mxu0 }
 0xb68   : > { %2679 = vrot.lane.b32.xlu0 %v5340_v5, %s6250_s3  ;;  %v2596_v62 = vpop.f32.mrb[49].mxu0 }
 0xb69   : > { %v5341_v47 = vpop.f32.mrb[50].mxu0 }
 0xb6a   : > { %2681 = vrot.lane.b32.xlu1 %v5341_v47, %s6250_s3  ;;  %v2599_v11 = vpop.f32.mrb[51].mxu0 }
 0xb6c   : > { %2675 = vrot.lane.b32.xlu0 %v2596_v62, %s6250_s3 }
 0xb6e   : > { %2677 = vrot.lane.b32.xlu1 %v2599_v11, %s6250_s3 }
 0xb70   : > { %v5344_v38 = vpop.f32.mrb[52].mxu0  ;;  %1665 = vrot.lane.b32.xlu0 %v7291_v15, %s6252_s8 }
 0xb71   : > { %v2612_v4 = vpop.f32.mrb[53].mxu0 }
 0xb72   : > { %v5345_v17 = vpop.f32.mrb[54].mxu0  ;;  %1667 = vrot.lane.b32.xlu1 %v8681_v29, %s6252_s8 }
 0xb73   : > { %v2615_v40 = vpop.f32.mrb[55].mxu0 }
 0xb74   : > { %2176 = vrot.lane.b32.xlu0 %v7522_v32, %s6251_s6 }
 0xb76   : > { %2178 = vrot.lane.b32.xlu1 %v7526_v0, %s6251_s6 }
 0xb78   : > { %v5348_v61 = vpop.f32.mrb[56].mxu0  ;;  %2687 = vrot.lane.b32.xlu0 %v5344_v38, %s6250_s3 }
 0xb79   : > { %v2628_v6 = vpop.f32.mrb[57].mxu0 }
 0xb7a   : > { %v5349_v1 = vpop.f32.mrb[58].mxu0  ;;  %2689 = vrot.lane.b32.xlu1 %v5345_v17, %s6250_s3 }
 0xb7b   : > { %v2631_v15 = vpop.f32.mrb[59].mxu0 }
 0xb7c   : > { %2683 = vrot.lane.b32.xlu0 %v2612_v4, %s6250_s3 }
 0xb7e   : > { %2685 = vrot.lane.b32.xlu1 %v2615_v40, %s6250_s3 }
 0xb80   : > { %v5352_v48 = vpop.f32.mrb[60].mxu0  ;;  %2180 = vrot.lane.b32.xlu0 %v7520_v27, %s6251_s6  ;;  %v8684_v27 = vld [vmem:[#allocation32_spill] sm:$0xff] }
 0xb81   : > { %v2644_v32 = vpop.f32.mrb[61].mxu0 }
 0xb82   : > { %v5353_v56 = vpop.f32.mrb[62].mxu0  ;;  %2182 = vrot.lane.b32.xlu1 %v7524_v2, %s6251_s6  ;;  %v8685_v2 = vld [vmem:[#allocation34_spill] sm:$0xff] }
 0xb83   : > { %v2647_v0 = vpop.f32.mrb[63].mxu0 }
 0xb84   : > { %1669 = vrot.lane.b32.xlu0 %v8682_v43, %s6252_s8 }
 0xb86   : > { %1671 = vrot.lane.b32.xlu1 %v8683_v21, %s6252_s8  ;;  %v5972_v21 = vld [vmem:[#allocation2] sm:$0xff] }
 0xb88   : > { %2695 = vrot.lane.b32.xlu0 %v5348_v61, %s6250_s3 }
 0xb8a   : > { %2697 = vrot.lane.b32.xlu1 %v5349_v1, %s6250_s3  ;;  %v7789_v1 = vld [vmem:[%s8687_s7] ss:$0 sm:$0xff]  ;;  %s6112_s7 = sshll.u32 %s6254_s4, 4  ;;  %s6113_s7 = int_to_ptr.vmem [resolvable:$false] %s6112_s7 }
 0xb8c   : > { %2691 = vrot.lane.b32.xlu0 %v2628_v6, %s6250_s3 }
 0xb8e   : > { %2693 = vrot.lane.b32.xlu1 %v2631_v15, %s6250_s3 }
 0xb90   : > { %1673 = vrot.lane.b32.xlu0 %v8684_v27, %s6252_s8 }
 0xb92   : > { %1675 = vrot.lane.b32.xlu1 %v8685_v2, %s6252_s8 }
 0xb94   : > { %2184 = vrot.lane.b32.xlu0 %v7530_v50, %s6251_s6 }
 0xb96   : > { %2186 = vrot.lane.b32.xlu1 %v7534_v36, %s6251_s6 }
 0xb98   : > { %2188 = vrot.lane.b32.xlu0 %v7528_v59, %s6251_s6 }
 0xb9a   : > { %2190 = vrot.lane.b32.xlu1 %v7532_v42, %s6251_s6  ;;  %s8695_s6 = sld [smem:[#allocation48_spill]] }
 0xb9c   : > { %2699 = vrot.lane.b32.xlu0 %v2644_v32, %s6250_s3 }
 0xb9e   : > { %2701 = vrot.lane.b32.xlu1 %v2647_v0, %s6250_s3 }
 0xba0   : > { %2703 = vrot.lane.b32.xlu0 %v5352_v48, %s6250_s3 }
 0xba2   : > { %2705 = vrot.lane.b32.xlu1 %v5353_v56, %s6250_s3 }
 0xbda   : > { %v2680_v18 = vpop.permute.xlu0 %2679 }
 0xbdb   : > { %2726 = vst.msk [vmem:[#allocation3 + $0x10] sm:$0xff] %vm2723_vm3, %v2680_v18  ;;  %v5973_v18 = vld [vmem:[#allocation2 + $0x8] sm:$0xff] }
 0xbdc   : > { %v2682_v50 = vpop.permute.xlu1 %2681 }
 0xbdd   : > { %2727 = vst.msk [vmem:[#allocation3 + $0x18] sm:$0xff] %vm2723_vm3, %v2682_v50 }
 0xbde   : > { %v2676_v36 = vpop.permute.xlu0 %2675 }
 0xbdf   : > { %2724 = vst.msk [vmem:[#allocation3] sm:$0xff] %vm2723_vm3, %v2676_v36  ;;  %v5974_v36 = vld [vmem:[#allocation2 + $0x10] sm:$0xff] }
 0xbe0   : > { %v2678_v59 = vpop.permute.xlu1 %2677 }
 0xbe1   : > { %2725 = vst.msk [vmem:[#allocation3 + $0x8] sm:$0xff] %vm2723_vm3, %v2678_v59 }
 0xbe2   : > { %v1666_v42 = vpop.permute.xlu0 %1665  ;;  %v2742_v35 = vld [vmem:[#allocation3 + $0x10] sm:$0xff] }
 0xbe3   : > { %1704 = vst.msk [vmem:[#allocation3 + $0x50] sm:$0xff] %vm1693_vm1, %v1666_v42 }
 0xbe4   : > { %v1668_v55 = vpop.permute.xlu1 %1667  ;;  %v2743_v13 = vld [vmem:[#allocation3 + $0x18] sm:$0xff] }
 0xbe5   : > { %1705 = vst.msk [vmem:[#allocation3 + $0x58] sm:$0xff] %vm1693_vm1, %v1668_v55  ;;  %v2757_v37 = vpack.c.bf16 %v2743_v13, %v2742_v35  ;;  %v5975_v55 = vld [vmem:[#allocation2 + $0x18] sm:$0xff] }
 0xbe6   : > { %v2177_v60 = vpop.permute.xlu0 %2176  ;;  %v2740_v52 = vld [vmem:[#allocation3] sm:$0xff] }
 0xbe7   : > { %2217 = vst.msk [vmem:[#allocation3 + $0x40] sm:$0xff] %vm2208_vm2, %v2177_v60 }
 0xbe8   : > { %v2179_v46 = vpop.permute.xlu1 %2178  ;;  %v2741_v10 = vld [vmem:[#allocation3 + $0x8] sm:$0xff] }
 0xbe9   : > { %2218 = vst.msk [vmem:[#allocation3 + $0x48] sm:$0xff] %vm2208_vm2, %v2179_v46  ;;  %v2756_v53 = vpack.c.bf16 %v2741_v10, %v2740_v52 }
 0xbea   : > { %v2688_v26 = vpop.permute.xlu0 %2687 }
 0xbeb   : > { %2730 = vst.msk [vmem:[#allocation3 + $0x30] sm:$0xff] %vm2723_vm3, %v2688_v26  ;;  %5370 = vmatprep.mubr.bf16.mxu0 %v2756_v53  ;;  %v5976_v26 = vld [vmem:[#allocation2 + $0x20] sm:$0xff] }
 0xbec   : > { %v2690_v19 = vpop.permute.xlu1 %2689  ;;  %5371 = vmatmul.mubr.bf16.vlgmr.msra.gmra.mrb[64].mxu0 %v2757_v37 }
 0xbed   : > { %2731 = vst.msk [vmem:[#allocation3 + $0x38] sm:$0xff] %vm2723_vm3, %v2690_v19 }
 0xbee   : > { %v2684_v22 = vpop.permute.xlu0 %2683 }
 0xbef   : > { %2728 = vst.msk [vmem:[#allocation3 + $0x20] sm:$0xff] %vm2723_vm3, %v2684_v22 }
 0xbf0   : > { %v2686_v57 = vpop.permute.xlu1 %2685 }
 0xbf1   : > { %2729 = vst.msk [vmem:[#allocation3 + $0x28] sm:$0xff] %vm2723_vm3, %v2686_v57  ;;  %v5977_v57 = vld [vmem:[#allocation2 + $0x28] sm:$0xff] }
 0xbf2   : > { %v2181_v12 = vpop.permute.xlu0 %2180  ;;  %v2746_v58 = vld [vmem:[#allocation3 + $0x30] sm:$0xff] }
 0xbf3   : > { %2219 = vst.msk [vmem:[#allocation3 + $0x50] sm:$0xff] %vm2208_vm2, %v2181_v12 }
 0xbf4   : > { %v2183_v45 = vpop.permute.xlu1 %2182  ;;  %v2747_v30 = vld [vmem:[#allocation3 + $0x38] sm:$0xff] }
 0xbf5   : > { %2220 = vst.msk [vmem:[#allocation3 + $0x58] sm:$0xff] %vm2208_vm2, %v2183_v45  ;;  %v2759_v63 = vpack.c.bf16 %v2747_v30, %v2746_v58  ;;  %v5978_v45 = vld [vmem:[#allocation2 + $0x30] sm:$0xff]  ;;  %v5979_v30 = vld [vmem:[#allocation2 + $0x38] sm:$0xff] }
 0xbf6   : > { %v1670_v34 = vpop.permute.xlu0 %1669  ;;  %v2744_v39 = vld [vmem:[#allocation3 + $0x20] sm:$0xff] }
 0xbf7   : > { %1706 = vst.msk [vmem:[#allocation3 + $0x60] sm:$0xff] %vm1693_vm1, %v1670_v34 }
 0xbf8   : > { %v1672_v9 = vpop.permute.xlu1 %1671  ;;  %v2745_v49 = vld [vmem:[#allocation3 + $0x28] sm:$0xff] }
 0xbf9   : > { %1707 = vst.msk [vmem:[#allocation3 + $0x68] sm:$0xff] %vm1693_vm1, %v1672_v9  ;;  %v2758_v3 = vpack.c.bf16 %v2745_v49, %v2744_v39 }
 0xbfa   : > { %v2696_v8 = vpop.permute.xlu0 %2695 }
 0xbfb   : > { %2734 = vst.msk [vmem:[#allocation3 + $0x50] sm:$0xff] %vm2723_vm3, %v2696_v8  ;;  %5374 = vmatprep.mubr.bf16.mxu0 %v2758_v3 }
 0xbfc   : > { %v2698_v7 = vpop.permute.xlu1 %2697  ;;  %5375 = vmatmul.mubr.bf16.gmra.mrb[68].mxu0 %v2759_v63 }
 0xbfd   : > { %2735 = vst.msk [vmem:[#allocation3 + $0x58] sm:$0xff] %vm2723_vm3, %v2698_v7  ;;  %v5980_v7 = vld [vmem:[#allocation2 + $0x40] sm:$0xff] }
 0xbfe   : > { %v2692_v20 = vpop.permute.xlu0 %2691 }
 0xbff   : > { %2732 = vst.msk [vmem:[#allocation3 + $0x40] sm:$0xff] %vm2723_vm3, %v2692_v20 }
 0xc00   : > { %v2694_v28 = vpop.permute.xlu1 %2693 }
 0xc01   : > { %2733 = vst.msk [vmem:[#allocation3 + $0x48] sm:$0xff] %vm2723_vm3, %v2694_v28 }
 0xc02   : > { %v1674_v23 = vpop.permute.xlu0 %1673  ;;  %v2750_v54 = vld [vmem:[#allocation3 + $0x50] sm:$0xff] }
 0xc03   : > { %1708 = vst.msk [vmem:[#allocation3 + $0x70] sm:$0xff] %vm1693_vm1, %v1674_v23 }
 0xc04   : > { %v1676_v14 = vpop.permute.xlu1 %1675  ;;  %v2751_v51 = vld [vmem:[#allocation3 + $0x58] sm:$0xff] }
 0xc05   : > { %1709 = vst.msk [vmem:[#allocation3 + $0x78] sm:$0xff] %vm1693_vm1, %v1676_v14  ;;  %v2761_v5 = vpack.c.bf16 %v2751_v51, %v2750_v54  ;;  %v5981_v14 = vld [vmem:[#allocation2 + $0x48] sm:$0xff]  ;;  %v5982_v51 = vld [vmem:[#allocation2 + $0x50] sm:$0xff] }
 0xc06   : > { %v2185_v41 = vpop.permute.xlu0 %2184  ;;  %v2748_v25 = vld [vmem:[#allocation3 + $0x40] sm:$0xff] }
 0xc07   : > { %2221 = vst.msk [vmem:[#allocation3 + $0x60] sm:$0xff] %vm2208_vm2, %v2185_v41 }
 0xc08   : > { %v2187_v24 = vpop.permute.xlu1 %2186  ;;  %v2749_v31 = vld [vmem:[#allocation3 + $0x48] sm:$0xff] }
 0xc09   : > { %2222 = vst.msk [vmem:[#allocation3 + $0x68] sm:$0xff] %vm2208_vm2, %v2187_v24  ;;  %v2760_v33 = vpack.c.bf16 %v2749_v31, %v2748_v25  ;;  %v5983_v25 = vld [vmem:[#allocation2 + $0x58] sm:$0xff] }
 0xc0a   : > { %v2189_v16 = vpop.permute.xlu0 %2188 }
 0xc0b   : > { %2223 = vst.msk [vmem:[#allocation3 + $0x70] sm:$0xff] %vm2208_vm2, %v2189_v16  ;;  %5378 = vmatprep.mubr.bf16.mxu0 %v2760_v33 }
 0xc0c   : > { %v2191_v44 = vpop.permute.xlu1 %2190  ;;  %5379 = vmatmul.mubr.bf16.gmra.mrb[72].mxu0 %v2761_v5 }
 0xc0d   : > { %2224 = vst.msk [vmem:[#allocation3 + $0x78] sm:$0xff] %vm2208_vm2, %v2191_v44 }
 0xc0e   : > { %v2700_v62 = vpop.permute.xlu0 %2699 }
 0xc0f   : > { %2736 = vst.msk [vmem:[#allocation3 + $0x60] sm:$0xff] %vm2723_vm3, %v2700_v62 }
 0xc10   : > { %v2702_v47 = vpop.permute.xlu1 %2701 }
 0xc11   : > { %2737 = vst.msk [vmem:[#allocation3 + $0x68] sm:$0xff] %vm2723_vm3, %v2702_v47  ;;  %v5984_v47 = vld [vmem:[#allocation2 + $0x60] sm:$0xff] }
 0xc12   : > { %v2704_v11 = vpop.permute.xlu0 %2703 }
 0xc13   : > { %2738 = vst.msk [vmem:[#allocation3 + $0x70] sm:$0xff] %vm2723_vm3, %v2704_v11 }
 0xc14   : > { %v2706_v38 = vpop.permute.xlu1 %2705 }
 0xc15   : > { %2739 = vst.msk [vmem:[#allocation3 + $0x78] sm:$0xff] %vm2723_vm3, %v2706_v38 }
 0xc16   : > { %v2752_v4 = vld [vmem:[#allocation3 + $0x60] sm:$0xff] }
 0xc18   : > { %v2753_v17 = vld [vmem:[#allocation3 + $0x68] sm:$0xff] }
 0xc19   : > { %v2762_v29 = vpack.c.bf16 %v2753_v17, %v2752_v4  ;;  %v5985_v17 = vld [vmem:[#allocation2 + $0x68] sm:$0xff] }
 0xc1a   : > { %v2754_v40 = vld [vmem:[#allocation3 + $0x70] sm:$0xff] }
 0xc1b   : > { %5382 = vmatprep.mubr.bf16.mxu0 %v2762_v29 }
 0xc1c   : > { %v2755_v61 = vld [vmem:[#allocation3 + $0x78] sm:$0xff] }
 0xc1d   : > { %v2763_v6 = vpack.c.bf16 %v2755_v61, %v2754_v40  ;;  %v5986_v40 = vld [vmem:[#allocation2 + $0x70] sm:$0xff] }
 0xc1f   : > { %5383 = vmatmul.mubr.bf16.gmra.mrb[76].mxu0 %v2763_v6  ;;  %v5987_v6 = vld [vmem:[#allocation2 + $0x78] sm:$0xff] }
 0xcbf   : > { %v5372_v15 = vpop.f32.mrb[64].mxu0 }
 0xcc0   : > { %v2869_v48 = vpop.f32.mrb[65].mxu0  ;;  %v2878_v43 = vadd.f32 %v5372_v15, %v7789_v1 }
 0xcc1   : > { %v2870_v32 = vadd.f32 %v7789_v1, %v2869_v48  ;;  %v5373_v56 = vpop.f32.mrb[66].mxu0  ;;  %v5573_v48 = vld [vmem:[%s6652_s27 + $0x4] ss:$16 sps:$4 sm:$0xff]  }
 0xcc2   : > { %v2872_v0 = vpop.f32.mrb[67].mxu0  ;;  %v7799_v59 = vadd.f32 %v5974_v36, %v2878_v43  ;;  %v2881_v42 = vadd.f32 %v5373_v56, %v7789_v1  ;;  %v5576_v56 = vld [vmem:[%s6652_s27 + $0xc] ss:$16 sps:$4 sm:$0xff]   ;;  %3393 = vmatprep.subr.bf16.mxu1 %v5573_v48  ;;  %v5601_v48 = vld [vmem:[%s6652_s27 + $0xa0] ss:$16 sps:$4 sm:$0xff]  }
 0xcc3   : > { %v7793_v27 = vadd.f32 %v5972_v21, %v2870_v32  ;;  %v2873_v2 = vadd.f32 %v7789_v1, %v2872_v0  ;;  %v5574_v32 = vld [vmem:[%s6652_s27 + $0x8] ss:$16 sps:$4 sm:$0xff]   ;;  %v5579_v0 = vld [vmem:[%s6652_s27 + $0x24] ss:$16 sps:$4 sm:$0xff]   ;;  %v5582_v43 = vld [vmem:[%s6652_s27 + $0x2c] ss:$16 sps:$4 sm:$0xff]   ;;  %3506 = vmatprep.subr.bf16.mxu0 %v5576_v56 }
 0xcc4   : > { %v7804_v60 = vadd.f32 %v5975_v55, %v2881_v42  ;;  %v5577_v21 = vld [vmem:[%s6652_s27 + $0x20] ss:$16 sps:$4 sm:$0xff]   ;;  %3507 = vmatpush1.bf16.msra.mxu0 %v5574_v32  ;;  %v5604_v32 = vld [vmem:[%s6652_s27 + $0xa8] ss:$16 sps:$4 sm:$0xff]  }
 0xcc5   : > { %v7796_v50 = vadd.f32 %v5973_v18, %v2873_v2  ;;  %2950 = vadd.xlane.f32.xlu0 %v7793_v27  ;;  %v5580_v2 = vld [vmem:[%s6652_s27 + $0x28] ss:$16 sps:$4 sm:$0xff]   ;;  %3508 = vmatprep.subr.bf16.mxu0 %v5582_v43 }
 0xcc7   : > { %2952 = vadd.xlane.f32.xlu1 %v7796_v50 }
 0xcc8   : > { %3509 = vmatpush1.bf16.msra.mxu0 %v5580_v2 }
 0xcc9   : > { %2954 = vadd.xlane.f32.xlu0 %v7799_v59 }
 0xccd   : > { %2956 = vadd.xlane.f32.xlu0 %v7804_v60 }
 0xccf   : > { %v5376_v13 = vpop.f32.mrb[68].mxu0 }
 0xcd0   : > { %v2885_v46 = vpop.f32.mrb[69].mxu0  ;;  %v2894_v35 = vadd.f32 %v5376_v13, %v7789_v1 }
 0xcd1   : > { %v2886_v52 = vadd.f32 %v7789_v1, %v2885_v46  ;;  %v5377_v10 = vpop.f32.mrb[70].mxu0 }
 0xcd2   : > { %v2888_v53 = vpop.f32.mrb[71].mxu0  ;;  %v2897_v22 = vadd.f32 %v5377_v10, %v7789_v1  ;;  %v7816_v34 = vadd.f32 %v5978_v45, %v2894_v35 }
 0xcd3   : > { %v7809_v37 = vadd.f32 %v5976_v26, %v2886_v52  ;;  %v2889_v19 = vadd.f32 %v7789_v1, %v2888_v53 }
 0xcd4   : > { %v7819_v9 = vadd.f32 %v5979_v30, %v2897_v22 }
 0xcd5   : > { %v7813_v12 = vadd.f32 %v5977_v57, %v2889_v19  ;;  %2958 = vadd.xlane.f32.xlu0 %v7809_v37 }
 0xcd7   : > { %2960 = vadd.xlane.f32.xlu1 %v7813_v12 }
 0xcd9   : > { %2962 = vadd.xlane.f32.xlu0 %v7816_v34 }
 0xcdb   : > { %2964 = vadd.xlane.f32.xlu1 %v7819_v9 }
 0xcdf   : > { %v5380_v39 = vpop.f32.mrb[72].mxu0 }
 0xce0   : > { %v2901_v49 = vpop.f32.mrb[73].mxu0  ;;  %v2910_v63 = vadd.f32 %v5380_v39, %v7789_v1 }
 0xce1   : > { %v2902_v3 = vadd.f32 %v7789_v1, %v2901_v49  ;;  %v5381_v58 = vpop.f32.mrb[74].mxu0 }
 0xce2   : > { %v2904_v8 = vpop.f32.mrb[75].mxu0  ;;  %v2913_v23 = vadd.f32 %v5381_v58, %v7789_v1  ;;  %v7832_v24 = vadd.f32 %v5982_v51, %v2910_v63  ;;  %v5585_v63 = vld [vmem:[%s6652_s27 + $0x44] ss:$16 sps:$4 sm:$0xff]  }
 0xce3   : > { %v7825_v20 = vadd.f32 %v5980_v7, %v2902_v3  ;;  %v2905_v28 = vadd.f32 %v7789_v1, %v2904_v8  ;;  %v5588_v7 = vld [vmem:[%s6652_s27 + $0x4c] ss:$16 sps:$4 sm:$0xff]  }
 0xce4   : > { %v7835_v31 = vadd.f32 %v5983_v25, %v2913_v23  ;;  %v5583_v23 = vld [vmem:[%s6652_s27 + $0x40] ss:$16 sps:$4 sm:$0xff]   ;;  %3510 = vmatprep.subr.bf16.mxu0 %v5588_v7 }
 0xce5   : > { %v7829_v41 = vadd.f32 %v5981_v14, %v2905_v28  ;;  %2966 = vadd.xlane.f32.xlu0 %v7825_v20  ;;  %v5586_v14 = vld [vmem:[%s6652_s27 + $0x48] ss:$16 sps:$4 sm:$0xff]  }
 0xce6   : > { %3511 = vmatpush1.bf16.msra.mxu0 %v5586_v14 }
 0xce7   : > { %2968 = vadd.xlane.f32.xlu1 %v7829_v41 }
 0xce9   : > { %2970 = vadd.xlane.f32.xlu0 %v7832_v24 }
 0xceb   : > { %2972 = vadd.xlane.f32.xlu1 %v7835_v31 }
 0xcf2   : > { %v5384_v33 = vpop.f32.mrb[76].mxu0 }
 0xcf3   : > { %v2917_v54 = vpop.f32.mrb[77].mxu0  ;;  %v2926_v62 = vadd.f32 %v5384_v33, %v7789_v1 }
 0xcf4   : > { %v2918_v16 = vadd.f32 %v7789_v1, %v2917_v54  ;;  %v5385_v5 = vpop.f32.mrb[78].mxu0  ;;  %v5594_v54 = vld [vmem:[%s6652_s27 + $0x6c] ss:$16 sps:$4 sm:$0xff]  }
 0xcf5   : > { %v2920_v44 = vpop.f32.mrb[79].mxu0  ;;  %v2929_v4 = vadd.f32 %v5385_v5, %v7789_v1  ;;  %v7848_v61 = vadd.f32 %v5986_v40, %v2926_v62  ;;  %v5592_v5 = vld [vmem:[%s6652_s27 + $0x68] ss:$16 sps:$4 sm:$0xff]   ;;  %3512 = vmatprep.subr.bf16.mxu0 %v5594_v54  ;;  %v5600_v62 = vld [vmem:[%s6652_s27 + $0x8c] ss:$16 sps:$4 sm:$0xff]  }
 0xcf6   : > { %v7841_v11 = vadd.f32 %v5984_v47, %v2918_v16  ;;  %v2921_v38 = vadd.f32 %v7789_v1, %v2920_v44  ;;  %v5571_v1 = vld [vmem:[%s6652_s27] ss:$16 sps:$4 sm:$0xff]   ;;  %3513 = vmatpush1.bf16.msra.mxu0 %v5592_v5  ;;  %v5603_v40 = vld [vmem:[%s6652_s27 + $0xa4] ss:$16 sps:$4 sm:$0xff]  }
 0xcf7   : > { %v7851_v15 = vadd.f32 %v5987_v6, %v2929_v4  ;;  %3394 = vmatpush1.bf16.msra.mxu1 %v5571_v1  ;;  %v5589_v16 = vld [vmem:[%s6652_s27 + $0x60] ss:$16 sps:$4 sm:$0xff]   ;;  %3514 = vmatprep.subr.bf16.mxu0 %v5600_v62  ;;  %v5606_v6 = vld [vmem:[%s6652_s27 + $0xac] ss:$16 sps:$4 sm:$0xff]  }
 0xcf8   : > { %v7845_v29 = vadd.f32 %v5985_v17, %v2921_v38  ;;  %2974 = vadd.xlane.f32.xlu0 %v7841_v11  ;;  %3395 = vmatprep.subr.bf16.mxu1 %v5579_v0  ;;  %v5595_v47 = vld [vmem:[%s6652_s27 + $0x80] ss:$16 sps:$4 sm:$0xff]   ;;  %v5598_v38 = vld [vmem:[%s6652_s27 + $0x88] ss:$16 sps:$4 sm:$0xff]  }
 0xcfa   : > { %2976 = vadd.xlane.f32.xlu1 %v7845_v29  ;;  %3515 = vmatpush1.bf16.msra.mxu0 %v5598_v38 }
 0xcfb   : > { %3396 = vmatpush1.bf16.msra.mxu1 %v5577_v21  ;;  %3516 = vmatprep.subr.bf16.mxu0 %v5606_v6 }
 0xcfc   : > { %2978 = vadd.xlane.f32.xlu0 %v7848_v61  ;;  %3397 = vmatprep.subr.bf16.mxu1 %v5585_v63 }
 0xcfe   : > { %2980 = vadd.xlane.f32.xlu1 %v7851_v15  ;;  %3517 = vmatpush1.bf16.msra.mxu0 %v5604_v32 }
 0xcff   : > { %3398 = vmatpush1.bf16.msra.mxu1 %v5583_v23 }
 0xd52   : > { %v2951_v18 = vpop.xlane.xlu0 %2950 }
 0xd53   : > { %v2983_v36 = vmul.f32 0.0078125, %v2951_v18 }
 0xd54   : > { %v2953_v42 = vpop.xlane.xlu1 %2952 }
 0xd55   : > { %v7864_v55 = vsub.f32 %v7793_v27, %v2983_v36  ;;  %v2984_v13 = vmul.f32 0.0078125, %v2953_v42  ;;  %v5609_v36 = vld [vmem:[%s6652_s27 + $0xc4] ss:$16 sps:$4 sm:$0xff]   ;;  %v5612_v42 = vld [vmem:[%s6652_s27 + $0xcc] ss:$16 sps:$4 sm:$0xff]  }
 0xd56   : > { %v2955_v46 = vpop.xlane.xlu0 %2954  ;;  %3518 = vmatprep.subr.bf16.mxu0 %v5612_v42 }
 0xd57   : > { %v7867_v52 = vsub.f32 %v7796_v50, %v2984_v13  ;;  %v2985_v10 = vmul.f32 0.0078125, %v2955_v46  ;;  %v3015_v53 = vmul.f32 %v7864_v55, %v7864_v55  ;;  %v5610_v46 = vld [vmem:[%s6652_s27 + $0xc8] ss:$16 sps:$4 sm:$0xff]  }
 0xd58   : > { %3519 = vmatpush1.bf16.msra.mxu0 %v5610_v46  ;;  %v7989_v46 = vld [vmem:[%s662_s30] ss:$0 sm:$0xff] }
 0xd59   : > { %v7872_v35 = vsub.f32 %v7799_v59, %v2985_v10  ;;  %3031 = vadd.xlane.f32.xlu0 %v3015_v53  ;;  %v3016_v26 = vmul.f32 %v7867_v52, %v7867_v52 }
 0xd5a   : > { %v2957_v19 = vpop.xlane.xlu0 %2956 }
 0xd5b   : > { %v2986_v22 = vmul.f32 0.0078125, %v2957_v19  ;;  %3033 = vadd.xlane.f32.xlu1 %v3016_v26  ;;  %v3017_v27 = vmul.f32 %v7872_v35, %v7872_v35 }
 0xd5d   : > { %v7879_v50 = vsub.f32 %v7804_v60, %v2986_v22  ;;  %3035 = vadd.xlane.f32.xlu0 %v3017_v27  ;;  %v5615_v22 = vld [vmem:[%s6652_s27 + $0xe4] ss:$16 sps:$4 sm:$0xff]   ;;  %v5618_v27 = vld [vmem:[%s6652_s27 + $0xec] ss:$16 sps:$4 sm:$0xff]  }
 0xd5e   : > { %3520 = vmatprep.subr.bf16.mxu0 %v5618_v27 }
 0xd5f   : > { %v3018_v59 = vmul.f32 %v7879_v50, %v7879_v50 }
 0xd61   : > { %3037 = vadd.xlane.f32.xlu1 %v3018_v59  ;;  %v5616_v59 = vld [vmem:[%s6652_s27 + $0xe8] ss:$16 sps:$4 sm:$0xff]  }
 0xd62   : > { %v2959_v57 = vpop.xlane.xlu0 %2958  ;;  %3521 = vmatpush1.bf16.msra.mxu0 %v5616_v59 }
 0xd63   : > { %v2987_v45 = vmul.f32 0.0078125, %v2959_v57 }
 0xd64   : > { %v2961_v30 = vpop.xlane.xlu1 %2960 }
 0xd65   : > { %v7884_v39 = vsub.f32 %v7809_v37, %v2987_v45  ;;  %v2988_v49 = vmul.f32 0.0078125, %v2961_v30 }
 0xd66   : > { %v2963_v3 = vpop.xlane.xlu0 %2962 }
 0xd67   : > { %v7887_v58 = vsub.f32 %v7813_v12, %v2988_v49  ;;  %v2989_v60 = vmul.f32 0.0078125, %v2963_v3  ;;  %v3019_v8 = vmul.f32 %v7884_v39, %v7884_v39 }
 0xd68   : > { %v2965_v28 = vpop.xlane.xlu1 %2964 }
 0xd69   : > { %v7896_v37 = vsub.f32 %v7816_v34, %v2989_v60  ;;  %v2990_v51 = vmul.f32 0.0078125, %v2965_v28  ;;  %3039 = vadd.xlane.f32.xlu0 %v3019_v8  ;;  %v3020_v12 = vmul.f32 %v7887_v58, %v7887_v58  ;;  %v5591_v34 = vld [vmem:[%s6652_s27 + $0x64] ss:$16 sps:$4 sm:$0xff]  }
 0xd6a   : > { %3399 = vmatprep.subr.bf16.mxu1 %v5591_v34  ;;  %v5619_v34 = vld [vmem:[%s6654_s21 + $0x40] sm:$0xff]  }
 0xd6b   : > { %v7901_v25 = vsub.f32 %v7819_v9, %v2990_v51  ;;  %3041 = vadd.xlane.f32.xlu1 %v3020_v12  ;;  %v3021_v33 = vmul.f32 %v7896_v37, %v7896_v37  ;;  %3400 = vmatpush1.bf16.msra.mxu1 %v5589_v16  ;;  %v5597_v9 = vld [vmem:[%s6652_s27 + $0x84] ss:$16 sps:$4 sm:$0xff]  }
 0xd6c   : > { %3401 = vmatprep.subr.bf16.mxu1 %v5597_v9 }
 0xd6d   : > { %3043 = vadd.xlane.f32.xlu0 %v3021_v33  ;;  %v3022_v44 = vmul.f32 %v7901_v25, %v7901_v25 }
 0xd6f   : > { %3045 = vadd.xlane.f32.xlu1 %v3022_v44  ;;  %3402 = vmatpush1.bf16.msra.mxu1 %v5595_v47 }
 0xd70   : > { %3403 = vmatprep.subr.bf16.mxu1 %v5603_v40 }
 0xd72   : > { %v2967_v4 = vpop.xlane.xlu0 %2966 }
 0xd73   : > { %v2991_v17 = vmul.f32 0.0078125, %v2967_v4  ;;  %3404 = vmatpush1.bf16.msra.mxu1 %v5601_v48 }
 0xd74   : > { %v2969_v1 = vpop.xlane.xlu1 %2968  ;;  %3405 = vmatprep.subr.bf16.mxu1 %v5609_v36 }
 0xd75   : > { %v7920_v56 = vsub.f32 %v7825_v20, %v2991_v17  ;;  %v2992_v0 = vmul.f32 0.0078125, %v2969_v1  ;;  %v5607_v20 = vld [vmem:[%s6652_s27 + $0xc0] ss:$16 sps:$4 sm:$0xff]  }
 0xd76   : > { %v2971_v43 = vpop.xlane.xlu0 %2970  ;;  %v7979_v1 = vld [vmem:[%s8689_s26] ss:$0 sm:$0xff] }
 0xd77   : > { %v7923_v21 = vsub.f32 %v7829_v41, %v2992_v0  ;;  %v2993_v2 = vmul.f32 0.0078125, %v2971_v43  ;;  %v3023_v18 = vmul.f32 %v7920_v56, %v7920_v56  ;;  %3406 = vmatpush1.bf16.msra.mxu1 %v5607_v20 }
 0xd78   : > { %v2973_v13 = vpop.xlane.xlu1 %2972  ;;  %3407 = vmatprep.subr.bf16.mxu1 %v5615_v22 }
 0xd79   : > { %v7932_v10 = vsub.f32 %v7832_v24, %v2993_v2  ;;  %v2994_v53 = vmul.f32 0.0078125, %v2973_v13  ;;  %3047 = vadd.xlane.f32.xlu0 %v3023_v18  ;;  %v3024_v41 = vmul.f32 %v7923_v21, %v7923_v21  ;;  %v5613_v24 = vld [vmem:[%s6652_s27 + $0xe0] ss:$16 sps:$4 sm:$0xff]   ;;  %s6114_s27 = scalar_lea.vmem %s6113_s7, 4096 }
 0xd7b   : > { %v7937_v26 = vsub.f32 %v7835_v31, %v2994_v53  ;;  %3049 = vadd.xlane.f32.xlu1 %v3024_v41  ;;  %v3025_v19 = vmul.f32 %v7932_v10, %v7932_v10  ;;  %3408 = vmatpush1.bf16.msra.mxu1 %v5613_v24  ;;  %v6253_v31 = vmov 0  }
 0xd7c   : > { %3425 = vmatprep.mubr.bf16.mxu1 %v6253_v31  ;;  %3538 = vmatprep.mubr.bf16.mxu0 %v6253_v31 }
 0xd7d   : > { %3051 = vadd.xlane.f32.xlu0 %v3025_v19  ;;  %v3026_v57 = vmul.f32 %v7937_v26, %v7937_v26  ;;  %4970 = vmatprep.subr.bf16.mxu1 %v5619_v34  ;;  %v8025_v34 = vld [vmem:[%s6654_s21 + $0xd0] sm:$0xff]  }
 0xd7f   : > { %3053 = vadd.xlane.f32.xlu1 %v3026_v57 }
 0xd85   : > { %v2975_v45 = vpop.xlane.xlu0 %2974 }
 0xd86   : > { %v2995_v30 = vmul.f32 0.0078125, %v2975_v45 }
 0xd87   : > { %v2977_v49 = vpop.xlane.xlu1 %2976 }
 0xd88   : > { %v7950_v3 = vsub.f32 %v7841_v11, %v2995_v30  ;;  %v2996_v60 = vmul.f32 0.0078125, %v2977_v49 }
 0xd89   : > { %v2979_v8 = vpop.xlane.xlu0 %2978 }
 0xd8a   : > { %v7953_v63 = vsub.f32 %v7845_v29, %v2996_v60  ;;  %v2997_v7 = vmul.f32 0.0078125, %v2979_v8  ;;  %v3027_v28 = vmul.f32 %v7950_v3, %v7950_v3  ;;  %v5620_v60 = vld [vmem:[%s6654_s21] sm:$0xff]  }
 0xd8b   : > { %v2981_v23 = vpop.xlane.xlu1 %2980  ;;  %v8004_v8 = vld [vmem:[%s6654_s21 + $0x80] sm:$0xff]  }
 0xd8c   : > { %v7958_v14 = vsub.f32 %v7848_v61, %v2997_v7  ;;  %v2998_v51 = vmul.f32 0.0078125, %v2981_v23  ;;  %3055 = vadd.xlane.f32.xlu0 %v3027_v28  ;;  %v3028_v11 = vmul.f32 %v7953_v63, %v7953_v63  ;;  %v7971_v61 = vld [vmem:[%s6654_s21 + $0xc0] sm:$0xff]   ;;  %v5621_v28 = vld [vmem:[%s6654_s21 + $0x48] sm:$0xff]  }
 0xd8d   : > { %5034 = vmatprep.subr.bf16.mxu0 %v7971_v61  ;;  %v8008_v23 = vld [vmem:[%s6654_s21 + $0xc8] sm:$0xff]  }
 0xd8e   : > { %v7963_v12 = vsub.f32 %v7851_v15, %v2998_v51  ;;  %3057 = vadd.xlane.f32.xlu1 %v3028_v11  ;;  %v3029_v29 = vmul.f32 %v7958_v14, %v7958_v14  ;;  %v5622_v11 = vld [vmem:[%s6654_s21 + $0x8] sm:$0xff]  }
 0xd90   : > { %3059 = vadd.xlane.f32.xlu0 %v3029_v29  ;;  %v3030_v33 = vmul.f32 %v7963_v12, %v7963_v12  ;;  %v8020_v29 = vld [vmem:[%s6654_s21 + $0x88] sm:$0xff]  }
 0xd92   : > { %3061 = vadd.xlane.f32.xlu1 %v3030_v33  ;;  %v5623_v33 = vld [vmem:[%s6654_s21 + $0x50] sm:$0xff]  }
 0xde6   : > { %v3032_v54 = vpop.xlane.xlu0 %3031 }
 0xde7   : > { %v3063_v16 = vmul.f32 0.0078125, %v3032_v54 }
 0xde8   : > { %v3034_v15 = vpop.xlane.xlu1 %3033 }
 0xde9   : > { %v3079_v5 = vadd.f32 1e-05, %v3063_v16  ;;  %v3064_v44 = vmul.f32 0.0078125, %v3034_v15 }
 0xdea   : > { %v3036_v9 = vpop.xlane.xlu0 %3035 }
 0xdeb   : > { %5907 = vrsqrt.f32 %v3079_v5  ;;  %v3080_v62 = vadd.f32 1e-05, %v3064_v44  ;;  %v3065_v47 = vmul.f32 0.0078125, %v3036_v9  ;;  %v5624_v9 = vld [vmem:[%s6654_s21 + $0x10] sm:$0xff]  }
 0xded   : > { %5909 = vrsqrt.f32 %v3080_v62  ;;  %v3081_v38 = vadd.f32 1e-05, %v3065_v47  ;;  %v8036_v62 = vld [vmem:[%s6654_s21 + $0x90] sm:$0xff]  }
 0xdee   : > { %v3038_v4 = vpop.xlane.xlu1 %3037 }
 0xdef   : > { %5911 = vrsqrt.f32 %v3081_v38  ;;  %v3066_v17 = vmul.f32 0.0078125, %v3038_v4  ;;  %v5625_v4 = vld [vmem:[%s6654_s21 + $0x58] sm:$0xff]  }
 0xdf1   : > { %v3082_v40 = vadd.f32 1e-05, %v3066_v17  ;;  %v8041_v17 = vld [vmem:[%s6654_s21 + $0xd8] sm:$0xff]  }
 0xdf3   : > { %5913 = vrsqrt.f32 %v3082_v40 }
 0xdf5   : > { %v5908_v6 = vpop.eup %5907 }
 0xdf6   : > { %v3111_v48 = vmul.f32 %v5908_v6, %v7864_v55  ;;  %v3040_v32 = vpop.xlane.xlu0 %3039 }
 0xdf7   : > { %v5910_v0 = vpop.eup %5909  ;;  %v3067_v43 = vmul.f32 0.0078125, %v3040_v32 }
 0xdf8   : > { %v3133_v2 = vmul.f32 %v7979_v1, %v3111_v48  ;;  %v3112_v18 = vmul.f32 %v5910_v0, %v7867_v52  ;;  %v3042_v36 = vpop.xlane.xlu1 %3041 }
 0xdf9   : > { %v5912_v42 = vpop.eup %5911  ;;  %v3083_v13 = vadd.f32 1e-05, %v3067_v43  ;;  %v3068_v20 = vmul.f32 0.0078125, %v3042_v36  ;;  %v8051_v36 = vld [vmem:[%s6654_s21 + $0x98] sm:$0xff]  }
 0xdfa   : > { %v3134_v55 = vmul.f32 %v7979_v1, %v3112_v18  ;;  %v3044_v53 = vpop.xlane.xlu0 %3043  ;;  %v7993_v22 = vadd.f32 %v7989_v46, %v3133_v2  ;;  %v3113_v24 = vmul.f32 %v5912_v42, %v7872_v35  ;;  %v5627_v18 = vld [vmem:[%s6654_s21 + $0x18] sm:$0xff]  }
 0xdfb   : > { %5915 = vrsqrt.f32 %v3083_v13  ;;  %v3084_v41 = vadd.f32 1e-05, %v3068_v20  ;;  %v3069_v19 = vmul.f32 0.0078125, %v3044_v53  ;;  %v5629_v20 = vld [vmem:[%s6654_s21 + $0x60] sm:$0xff]  }
 0xdfc   : > { %v3046_v52 = vpop.xlane.xlu1 %3045  ;;  %v7996_v27 = vadd.f32 %v7989_v46, %v3134_v55  ;;  %v3135_v35 = vmul.f32 %v7979_v1, %v3113_v24  ;;  %v8056_v55 = vld [vmem:[%s6654_s21 + $0xe0] sm:$0xff]  }
 0xdfd   : > { %v5914_v59 = vpop.eup %5913  ;;  %5917 = vrsqrt.f32 %v3084_v41  ;;  %v3085_v57 = vadd.f32 1e-05, %v3069_v19  ;;  %v3070_v45 = vmul.f32 0.0078125, %v3046_v52 }
 0xdfe   : > { %v3171_v30 = vpack.c.bf16 %v7996_v27, %v7993_v22  ;;  %v3114_v49 = vmul.f32 %v5914_v59, %v7879_v50  ;;  %v8028_v54 = vadd.f32 %v7989_v46, %v3135_v35 }
 0xdff   : > { %5919 = vrsqrt.f32 %v3085_v57  ;;  %v3086_v7 = vadd.f32 1e-05, %v3070_v45 }
 0xe00   : > { %3426 = vmatmul.mubr.bf16.vlgmr.msra.gmra.mrb[64].mxu1 %v3171_v30  ;;  %3539 = vmatmul.mubr.bf16.vlgmr.msra.gmra.mrb[80].mxu0 %v3171_v30  ;;  %v3136_v51 = vmul.f32 %v7979_v1, %v3114_v49  ;;  %v5631_v49 = vld [vmem:[%s6654_s21 + $0x20] sm:$0xff]  }
 0xe01   : > { %5921 = vrsqrt.f32 %v3086_v7  ;;  %3435 = vmatprep.mubr.bf16.mxu1 %v6253_v31  ;;  %3548 = vmatprep.mubr.bf16.mxu0 %v6253_v31  ;;  %v8077_v7 = vld [vmem:[%s6654_s21 + $0xe8] sm:$0xff]  }
 0xe02   : > { %v8015_v50 = vadd.f32 %v7989_v46, %v3136_v51  ;;  %4971 = vmatpush3.bf16.msra.mxu1 %v5620_v60  ;;  %5035 = vmatpush3.bf16.msra.mxu0 %v8004_v8  ;;  %v8072_v60 = vld [vmem:[%s6654_s21 + $0xa0] sm:$0xff]   ;;  %v5636_v51 = vld [vmem:[%s6654_s21 + $0x28] sm:$0xff]  }
 0xe03   : > { %4972 = vmatprep.subr.bf16.mxu1 %v5621_v28  ;;  %5036 = vmatprep.subr.bf16.mxu0 %v8008_v23 }
 0xe04   : > { %v3172_v5 = vpack.c.bf16 %v8015_v50, %v8028_v54 }
 0xe05   : > { %v5916_v16 = vpop.eup %5915 }
 0xe06   : > { %v3048_v15 = vpop.xlane.xlu0 %3047  ;;  %v3115_v44 = vmul.f32 %v5916_v16, %v7884_v39  ;;  %4973 = vmatpush3.bf16.msra.mxu1 %v5622_v11  ;;  %5037 = vmatpush3.bf16.msra.mxu0 %v8020_v29  ;;  %v5641_v11 = vld [vmem:[%s6654_s21 + $0x70] sm:$0xff]  }
 0xe07   : > { %v5918_v47 = vpop.eup %5917  ;;  %v3071_v38 = vmul.f32 0.0078125, %v3048_v15  ;;  %4974 = vmatprep.subr.bf16.mxu1 %v5623_v33  ;;  %5038 = vmatprep.subr.bf16.mxu0 %v8025_v34 }
 0xe08   : > { %v3050_v40 = vpop.xlane.xlu1 %3049  ;;  %3436 = vmatmul.mubr.bf16.gmra.mrb[68].mxu1 %v3172_v5  ;;  %3549 = vmatmul.mubr.bf16.gmra.mrb[84].mxu0 %v3172_v5  ;;  %v3116_v39 = vmul.f32 %v5918_v47, %v7887_v58  ;;  %v3137_v6 = vmul.f32 %v7979_v1, %v3115_v44  ;;  %v5642_v44 = vld [vmem:[%s6654_s21 + $0x30] sm:$0xff]  }
 0xe09   : > { %v5920_v48 = vpop.eup %5919  ;;  %v3087_v32 = vadd.f32 1e-05, %v3071_v38  ;;  %v3072_v0 = vmul.f32 0.0078125, %v3050_v40  ;;  %3445 = vmatprep.mubr.bf16.mxu1 %v6253_v31  ;;  %3558 = vmatprep.mubr.bf16.mxu0 %v6253_v31 }
 0xe0a   : > { %v3052_v43 = vpop.xlane.xlu0 %3051  ;;  %v3138_v2 = vmul.f32 %v7979_v1, %v3116_v39  ;;  %4975 = vmatpush3.bf16.msra.mxu1 %v5624_v9  ;;  %5039 = vmatpush3.bf16.msra.mxu0 %v8036_v62  ;;  %v8059_v41 = vadd.f32 %v7989_v46, %v3137_v6  ;;  %v3117_v52 = vmul.f32 %v5920_v48, %v7896_v37 }
 0xe0b   : > { %v5922_v58 = vpop.eup %5921  ;;  %5923 = vrsqrt.f32 %v3087_v32  ;;  %v3088_v42 = vadd.f32 1e-05, %v3072_v0  ;;  %v3073_v13 = vmul.f32 0.0078125, %v3052_v43  ;;  %4976 = vmatprep.subr.bf16.mxu1 %v5625_v4  ;;  %5040 = vmatprep.subr.bf16.mxu0 %v8041_v17 }
 0xe0c   : > { %v3054_v53 = vpop.xlane.xlu1 %3053  ;;  %v8062_v19 = vadd.f32 %v7989_v46, %v3138_v2  ;;  %v3118_v24 = vmul.f32 %v5922_v58, %v7901_v25  ;;  %v5635_v25 = vld [vmem:[%s6654_s21 + $0x68] sm:$0xff]   ;;  %v3139_v28 = vmul.f32 %v7979_v1, %v3117_v52 }
 0xe0d   : > { %5925 = vrsqrt.f32 %v3088_v42  ;;  %v3089_v59 = vadd.f32 1e-05, %v3073_v13  ;;  %v3074_v57 = vmul.f32 0.0078125, %v3054_v53 }
 0xe0e   : > { %v3173_v45 = vpack.c.bf16 %v8062_v19, %v8059_v41  ;;  %v3140_v30 = vmul.f32 %v7979_v1, %v3118_v24  ;;  %4977 = vmatpush3.bf16.msra.mxu1 %v5627_v18  ;;  %5041 = vmatpush3.bf16.msra.mxu0 %v8051_v36  ;;  %v8090_v33 = vadd.f32 %v7989_v46, %v3139_v28 }
 0xe0f   : > { %5927 = vrsqrt.f32 %v3089_v59  ;;  %v3090_v37 = vadd.f32 1e-05, %v3074_v57  ;;  %4978 = vmatprep.subr.bf16.mxu1 %v5629_v20  ;;  %5042 = vmatprep.subr.bf16.mxu0 %v8056_v55 }
 0xe10   : > { %3446 = vmatmul.mubr.bf16.gmra.mrb[72].mxu1 %v3173_v45  ;;  %3559 = vmatmul.mubr.bf16.gmra.mrb[88].mxu0 %v3173_v45  ;;  %v8083_v35 = vadd.f32 %v7989_v46, %v3140_v30 }
 0xe11   : > { %5929 = vrsqrt.f32 %v3090_v37  ;;  %3455 = vmatprep.mubr.bf16.mxu1 %v6253_v31  ;;  %3568 = vmatprep.mubr.bf16.mxu0 %v6253_v31 }
 0xe12   : > { %4979 = vmatpush3.bf16.msra.mxu1 %v5631_v49  ;;  %5043 = vmatpush3.bf16.msra.mxu0 %v8072_v60  ;;  %v3174_v15 = vpack.c.bf16 %v8083_v35, %v8090_v33 }
 0xe13   : > { %4980 = vmatprep.subr.bf16.mxu1 %v5635_v25  ;;  %5044 = vmatprep.subr.bf16.mxu0 %v8077_v7 }
 0xe15   : > { %v5924_v16 = vpop.eup %5923 }
 0xe16   : > { %v3119_v5 = vmul.f32 %v5924_v16, %v7920_v56  ;;  %4981 = vmatpush3.bf16.msra.mxu1 %v5636_v51 }
 0xe17   : > { %v5926_v9 = vpop.eup %5925  ;;  %4982 = vmatprep.subr.bf16.mxu1 %v5641_v11 }
 0xe18   : > { %3456 = vmatmul.mubr.bf16.gmra.mrb[76].mxu1 %v3174_v15  ;;  %3569 = vmatmul.mubr.bf16.gmra.mrb[92].mxu0 %v3174_v15  ;;  %v3120_v47 = vmul.f32 %v5926_v9, %v7923_v21  ;;  %v3141_v38 = vmul.f32 %v7979_v1, %v3119_v5 }
 0xe19   : > { %v5928_v4 = vpop.eup %5927  ;;  %v3056_v40 = vpop.xlane.xlu0 %3055  ;;  %3465 = vmatprep.mubr.bf16.mxu1 %v6253_v31  ;;  %3578 = vmatprep.mubr.bf16.mxu0 %v6253_v31 }
 0xe1a   : > { %v3075_v39 = vmul.f32 0.0078125, %v3056_v40  ;;  %v3142_v6 = vmul.f32 %v7979_v1, %v3120_v47  ;;  %4983 = vmatpush3.bf16.msra.mxu1 %v5642_v44  ;;  %v8102_v32 = vadd.f32 %v7989_v46, %v3141_v38  ;;  %v3121_v0 = vmul.f32 %v5928_v4, %v7932_v10  ;;  %v8152_v40 = vld [vmem:[%s6654_s21 + $0xa8] sm:$0xff]  }
 0xe1b   : > { %v5930_v56 = vpop.eup %5929  ;;  %v3058_v48 = vpop.xlane.xlu1 %3057  ;;  %5045 = vmatpush3.bf16.msra.mxu0 %v8152_v40 }
 0xe1c   : > { %v3091_v21 = vadd.f32 1e-05, %v3075_v39  ;;  %v3076_v43 = vmul.f32 0.0078125, %v3058_v48  ;;  %v8106_v2 = vadd.f32 %v7989_v46, %v3142_v6  ;;  %v3122_v18 = vmul.f32 %v5930_v56, %v7937_v26  ;;  %v8159_v39 = vld [vmem:[%s6654_s21 + $0xb0] sm:$0xff]   ;;  %v5648_v6 = vld [vmem:[%s6654_s21 + $0x38] sm:$0xff]  }
 0xe1d   : > { %v3060_v58 = vpop.xlane.xlu0 %3059  ;;  %v3143_v59 = vmul.f32 %v7979_v1, %v3121_v0  ;;  %v8169_v56 = vld [vmem:[%s6654_s21 + $0xb8] sm:$0xff]   ;;  %v3213_v48 = vlaneseq }
 0xe1e   : > { %5931 = vrsqrt.f32 %v3091_v21  ;;  %v3092_v42 = vadd.f32 1e-05, %v3076_v43  ;;  %v3077_v13 = vmul.f32 0.0078125, %v3060_v58  ;;  %v3175_v20 = vpack.c.bf16 %v8106_v2, %v8102_v32 }
 0xe1f   : > { %v3062_v53 = vpop.xlane.xlu1 %3061  ;;  %v3144_v52 = vmul.f32 %v7979_v1, %v3122_v18  ;;  %v8119_v45 = vadd.f32 %v7989_v46, %v3143_v59  ;;  %v3214_v0 = vshrl.u32 %v3213_v48, 7  ;;  %v3211_v18 = vld [vmem:[%s6687_s22] sm:$0xf] }
 0xe20   : > { %5933 = vrsqrt.f32 %v3092_v42  ;;  %v3093_v24 = vadd.f32 1e-05, %v3077_v13  ;;  %v3078_v10 = vmul.f32 0.0078125, %v3062_v53  ;;  %3466 = vmatmul.mubr.bf16.gmra.mrb[80].mxu1 %v3175_v20  ;;  %3579 = vmatmul.mubr.bf16.gmra.mrb[96].mxu0 %v3175_v20 }
 0xe21   : > { %3475 = vmatprep.mubr.bf16.mxu1 %v6253_v31  ;;  %3588 = vmatprep.mubr.bf16.mxu0 %v6253_v31  ;;  %v8116_v57 = vadd.f32 %v7989_v46, %v3144_v52  ;;  %v3215_v21 = vsub.s32 0, %v3214_v0  ;;  %v3223_v43 = vsub.s32 2, %v3214_v0  ;;  %v3219_v58 = vsub.s32 1, %v3214_v0 }
 0xe22   : > { %5935 = vrsqrt.f32 %v3093_v24  ;;  %v3094_v26 = vadd.f32 1e-05, %v3078_v10  ;;  %v3227_v42 = vsub.s32 3, %v3214_v0 }
 0xe23   : > { %v3176_v30 = vpack.c.bf16 %v8116_v57, %v8119_v45  ;;  %v8175_v13 = vrot.slane %v3211_v18, %v3215_v21  ;;  %v8177_v20 = vrot.slane %v3211_v18, %v3223_v43  ;;  %v8179_v53 = vrot.slane %v3211_v18, %v3219_v58 }
 0xe24   : > { %5937 = vrsqrt.f32 %v3094_v26  ;;  %v8181_v52 = vrot.slane %v3211_v18, %v3227_v42 }
 0xe28   : > { %v5932_v49 = vpop.eup %5931  ;;  %3476 = vmatmul.mubr.bf16.gmra.mrb[84].mxu1 %v3176_v30  ;;  %3589 = vmatmul.mubr.bf16.gmra.mrb[100].mxu0 %v3176_v30 }
 0xe29   : > { %3485 = vmatprep.mubr.bf16.mxu1 %v6253_v31  ;;  %3598 = vmatprep.mubr.bf16.mxu0 %v6253_v31  ;;  %v3123_v37 = vmul.f32 %v5932_v49, %v7950_v3 }
 0xe2a   : > { %v5934_v25 = vpop.eup %5933 }
 0xe2b   : > { %v3124_v28 = vmul.f32 %v5934_v25, %v7953_v63  ;;  %v3145_v51 = vmul.f32 %v7979_v1, %v3123_v37 }
 0xe2c   : > { %v5936_v11 = vpop.eup %5935 }
 0xe2d   : > { %v3146_v16 = vmul.f32 %v7979_v1, %v3124_v28  ;;  %v8130_v5 = vadd.f32 %v7989_v46, %v3145_v51  ;;  %v3125_v9 = vmul.f32 %v5936_v11, %v7958_v14 }
 0xe2e   : > { %v5938_v15 = vpop.eup %5937 }
 0xe2f   : > { %v8133_v44 = vadd.f32 %v7989_v46, %v3146_v16  ;;  %v3126_v3 = vmul.f32 %v5938_v15, %v7963_v12  ;;  %v3147_v38 = vmul.f32 %v7979_v1, %v3125_v9 }
 0xe31   : > { %v3177_v63 = vpack.c.bf16 %v8133_v44, %v8130_v5  ;;  %v3148_v47 = vmul.f32 %v7979_v1, %v3126_v3  ;;  %v8147_v12 = vadd.f32 %v7989_v46, %v3147_v38  ;;  %v8156_v1 = vld [vmem:[%s6654_s21 + $0xf0] sm:$0xff]  }
 0xe32   : > { %5046 = vmatprep.subr.bf16.mxu0 %v8156_v1 }
 0xe33   : > { %3486 = vmatmul.mubr.bf16.gmra.mrb[88].mxu1 %v3177_v63  ;;  %3599 = vmatmul.mubr.bf16.gmra.mrb[104].mxu0 %v3177_v63  ;;  %v8144_v14 = vadd.f32 %v7989_v46, %v3148_v47  ;;  %v8165_v46 = vld [vmem:[%s6654_s21 + $0xf8] sm:$0xff]  }
 0xe34   : > { %3495 = vmatprep.mubr.bf16.mxu1 %v6253_v31  ;;  %3608 = vmatprep.mubr.bf16.mxu0 %v6253_v31  ;;  %v5647_v31 = vld [vmem:[%s6654_s21 + $0x78] sm:$0xff]  }
 0xe35   : > { %v3178_v4 = vpack.c.bf16 %v8144_v14, %v8147_v12  ;;  %5047 = vmatpush3.bf16.msra.mxu0 %v8159_v39  ;;  %4984 = vmatprep.subr.bf16.mxu1 %v5647_v31 }
 0xe36   : > { %5048 = vmatprep.subr.bf16.mxu0 %v8165_v46  ;;  %4985 = vmatpush3.bf16.msra.mxu1 %v5648_v6 }
 0xe37   : > { %5386 = vmatprep.subr.bf16.mxu1 %v7971_v61 }
 0xe39   : > { %5049 = vmatpush3.bf16.msra.mxu0 %v8169_v56 }
 0xe3b   : > { %3496 = vmatmul.mubr.bf16.gmra.mrb[92].mxu1 %v3178_v4  ;;  %3609 = vmatmul.mubr.bf16.gmra.mrb[108].mxu0 %v3178_v4 }
 0xed3   : > { %v3427_v24 = vpop.f32.mrb[64].mxu1  ;;  %v3540_v10 = vpop.f32.mrb[80].mxu0 }
 0xed4   : > { %v3428_v59 = vadd.f32 %v3427_v24, %v8175_v13  ;;  %v3541_v61 = vadd.f32 %v3540_v10, %v8177_v20  ;;  %v3429_v26 = vpop.f32.mrb[65].mxu1  ;;  %v3542_v30 = vpop.f32.mrb[81].mxu0 }
 0xed5   : > { %v3430_v49 = vadd.f32 %v3429_v26, %v8179_v53  ;;  %v3543_v37 = vadd.f32 %v3542_v30, %v8181_v52  ;;  %v3431_v25 = vpop.f32.mrb[66].mxu1  ;;  %v3544_v28 = vpop.f32.mrb[82].mxu0 }
 0xed6   : > { %v3432_v51 = vadd.f32 %v3431_v25, %v8175_v13  ;;  %v3545_v11 = vadd.f32 %v3544_v28, %v8177_v20  ;;  %v3433_v16 = vpop.f32.mrb[67].mxu1  ;;  %v3546_v15 = vpop.f32.mrb[83].mxu0  ;;  %v3619_v63 = vmax.f32 %v3428_v59, 0.0  ;;  %v3621_v47 = vmax.f32 %v3541_v61, 0.0 }
 0xed7   : > { %v3434_v9 = vadd.f32 %v3433_v16, %v8179_v53  ;;  %v3547_v3 = vadd.f32 %v3546_v15, %v8181_v52  ;;  %v3620_v31 = vmax.f32 %v3430_v49, 0.0  ;;  %v3622_v6 = vmax.f32 %v3543_v37, 0.0 }
 0xed8   : > { %v3623_v38 = vmax.f32 %v3432_v51, 0.0  ;;  %v3625_v4 = vmax.f32 %v3545_v11, 0.0 }
 0xed9   : > { %v3624_v48 = vmax.f32 %v3434_v9, 0.0  ;;  %v3626_v0 = vmax.f32 %v3547_v3, 0.0 }
 0xeda   : > { %v3683_v21 = vpack.c.bf16 %v3623_v38, %v3619_v63  ;;  %v3685_v43 = vpack.c.bf16 %v3625_v4, %v3621_v47 }
 0xedb   : > { %v3684_v18 = vpack.c.bf16 %v3624_v48, %v3620_v31  ;;  %v3686_v58 = vpack.c.bf16 %v3626_v0, %v3622_v6  ;;  %v3437_v42 = vpop.f32.mrb[68].mxu1  ;;  %v3550_v24 = vpop.f32.mrb[84].mxu0 }
 0xedc   : > { %v3438_v10 = vadd.f32 %v3437_v42, %v8175_v13  ;;  %v3551_v26 = vadd.f32 %v3550_v24, %v8177_v20  ;;  %v3439_v30 = vpop.f32.mrb[69].mxu1  ;;  %v3552_v25 = vpop.f32.mrb[85].mxu0 }
 0xedd   : > { %v3440_v59 = vadd.f32 %v3439_v30, %v8179_v53  ;;  %v3553_v61 = vadd.f32 %v3552_v25, %v8181_v52  ;;  %v3441_v49 = vpop.f32.mrb[70].mxu1  ;;  %v3554_v37 = vpop.f32.mrb[86].mxu0  ;;  %4010 = vmatprep.mubr.bf16.mxu1 %v3684_v18  ;;  %4107 = vmatprep.mubr.bf16.mxu0 %v3686_v58 }
 0xede   : > { %v3442_v28 = vadd.f32 %v3441_v49, %v8175_v13  ;;  %v3555_v51 = vadd.f32 %v3554_v37, %v8177_v20  ;;  %v3443_v11 = vpop.f32.mrb[71].mxu1  ;;  %v3556_v16 = vpop.f32.mrb[87].mxu0  ;;  %4011 = vmatmul.mubr.bf16.vlgmr.msra.gmra.mrb[96].mxu1 %v3683_v21  ;;  %4108 = vmatmul.mubr.bf16.vlgmr.msra.gmra.mrb[112].mxu0 %v3685_v43  ;;  %v3627_v3 = vmax.f32 %v3438_v10, 0.0  ;;  %v3629_v63 = vmax.f32 %v3551_v26, 0.0 }
 0xedf   : > { %v3444_v15 = vadd.f32 %v3443_v11, %v8179_v53  ;;  %v3557_v9 = vadd.f32 %v3556_v16, %v8181_v52  ;;  %5394 = vmatpush3.bf16.msra.mxu1 %v8004_v8  ;;  %v3628_v4 = vmax.f32 %v3440_v59, 0.0  ;;  %v3630_v31 = vmax.f32 %v3553_v61, 0.0 }
 0xee0   : > { %v3631_v47 = vmax.f32 %v3442_v28, 0.0  ;;  %v3633_v38 = vmax.f32 %v3555_v51, 0.0  ;;  %5387 = vmatprep.subr.bf16.mxu1 %v8008_v23 }
 0xee1   : > { %v3632_v6 = vmax.f32 %v3444_v15, 0.0  ;;  %v3634_v48 = vmax.f32 %v3557_v9, 0.0 }
 0xee2   : > { %v3687_v0 = vpack.c.bf16 %v3631_v47, %v3627_v3  ;;  %v3689_v18 = vpack.c.bf16 %v3633_v38, %v3629_v63 }
 0xee3   : > { %v3688_v21 = vpack.c.bf16 %v3632_v6, %v3628_v4  ;;  %v3690_v43 = vpack.c.bf16 %v3634_v48, %v3630_v31  ;;  %v3447_v58 = vpop.f32.mrb[72].mxu1  ;;  %v3560_v42 = vpop.f32.mrb[88].mxu0  ;;  %5395 = vmatpush3.bf16.msra.mxu1 %v8020_v29 }
 0xee4   : > { %v3448_v8 = vadd.f32 %v3447_v58, %v8175_v13  ;;  %v3561_v24 = vadd.f32 %v3560_v42, %v8177_v20  ;;  %v3449_v10 = vpop.f32.mrb[73].mxu1  ;;  %v3562_v26 = vpop.f32.mrb[89].mxu0  ;;  %5388 = vmatprep.subr.bf16.mxu1 %v8025_v34 }
 0xee5   : > { %v3450_v23 = vadd.f32 %v3449_v10, %v8179_v53  ;;  %v3563_v30 = vadd.f32 %v3562_v26, %v8181_v52  ;;  %v3451_v25 = vpop.f32.mrb[74].mxu1  ;;  %v3564_v59 = vpop.f32.mrb[90].mxu0  ;;  %4018 = vmatprep.mubr.bf16.mxu1 %v3688_v21  ;;  %4115 = vmatprep.mubr.bf16.mxu0 %v3690_v43 }
 0xee6   : > { %v3452_v61 = vadd.f32 %v3451_v25, %v8175_v13  ;;  %v3565_v29 = vadd.f32 %v3564_v59, %v8177_v20  ;;  %v3453_v49 = vpop.f32.mrb[75].mxu1  ;;  %v3566_v37 = vpop.f32.mrb[91].mxu0  ;;  %4019 = vmatmul.mubr.bf16.gmra.mrb[100].mxu1 %v3687_v0  ;;  %4116 = vmatmul.mubr.bf16.gmra.mrb[116].mxu0 %v3689_v18  ;;  %v3635_v51 = vmax.f32 %v3448_v8, 0.0  ;;  %v3637_v11 = vmax.f32 %v3561_v24, 0.0 }
 0xee7   : > { %v3454_v28 = vadd.f32 %v3453_v49, %v8179_v53  ;;  %v3567_v34 = vadd.f32 %v3566_v37, %v8181_v52  ;;  %5396 = vmatpush3.bf16.msra.mxu1 %v8036_v62  ;;  %v3636_v9 = vmax.f32 %v3450_v23, 0.0  ;;  %v3638_v3 = vmax.f32 %v3563_v30, 0.0 }
 0xee8   : > { %v3639_v16 = vmax.f32 %v3452_v61, 0.0  ;;  %v3641_v15 = vmax.f32 %v3565_v29, 0.0  ;;  %5389 = vmatprep.subr.bf16.mxu1 %v8041_v17 }
 0xee9   : > { %v3640_v63 = vmax.f32 %v3454_v28, 0.0  ;;  %v3642_v47 = vmax.f32 %v3567_v34, 0.0 }
 0xeea   : > { %v3691_v38 = vpack.c.bf16 %v3639_v16, %v3635_v51  ;;  %v3693_v4 = vpack.c.bf16 %v3641_v15, %v3637_v11 }
 0xeeb   : > { %v3692_v31 = vpack.c.bf16 %v3640_v63, %v3636_v9  ;;  %v3694_v6 = vpack.c.bf16 %v3642_v47, %v3638_v3  ;;  %v3457_v48 = vpop.f32.mrb[76].mxu1  ;;  %v3570_v0 = vpop.f32.mrb[92].mxu0  ;;  %5397 = vmatpush3.bf16.msra.mxu1 %v8051_v36 }
 0xeec   : > { %v3458_v62 = vadd.f32 %v3457_v48, %v8175_v13  ;;  %v3571_v18 = vadd.f32 %v3570_v0, %v8177_v20  ;;  %v3459_v21 = vpop.f32.mrb[77].mxu1  ;;  %v3572_v43 = vpop.f32.mrb[93].mxu0  ;;  %5390 = vmatprep.subr.bf16.mxu1 %v8056_v55 }
 0xeed   : > { %v3460_v17 = vadd.f32 %v3459_v21, %v8179_v53  ;;  %v3573_v58 = vadd.f32 %v3572_v43, %v8181_v52  ;;  %v3461_v42 = vpop.f32.mrb[78].mxu1  ;;  %v3574_v8 = vpop.f32.mrb[94].mxu0  ;;  %4026 = vmatprep.mubr.bf16.mxu1 %v3692_v31  ;;  %4123 = vmatprep.mubr.bf16.mxu0 %v3694_v6 }
 0xeee   : > { %v3462_v24 = vadd.f32 %v3461_v42, %v8175_v13  ;;  %v3575_v36 = vadd.f32 %v3574_v8, %v8177_v20  ;;  %v3463_v10 = vpop.f32.mrb[79].mxu1  ;;  %v3576_v26 = vpop.f32.mrb[95].mxu0  ;;  %4027 = vmatmul.mubr.bf16.gmra.mrb[104].mxu1 %v3691_v38  ;;  %4124 = vmatmul.mubr.bf16.gmra.mrb[120].mxu0 %v3693_v4  ;;  %v3643_v30 = vmax.f32 %v3458_v62, 0.0  ;;  %v3645_v25 = vmax.f32 %v3571_v18, 0.0 }
 0xeef   : > { %v3464_v23 = vadd.f32 %v3463_v10, %v8179_v53  ;;  %v3577_v55 = vadd.f32 %v3576_v26, %v8181_v52  ;;  %5398 = vmatpush3.bf16.msra.mxu1 %v8072_v60  ;;  %v3644_v29 = vmax.f32 %v3460_v17, 0.0  ;;  %v3646_v49 = vmax.f32 %v3573_v58, 0.0 }
 0xef0   : > { %v3647_v59 = vmax.f32 %v3462_v24, 0.0  ;;  %v3649_v61 = vmax.f32 %v3575_v36, 0.0  ;;  %5391 = vmatprep.subr.bf16.mxu1 %v8077_v7 }
 0xef1   : > { %v3648_v37 = vmax.f32 %v3464_v23, 0.0  ;;  %v3650_v28 = vmax.f32 %v3577_v55, 0.0 }
 0xef2   : > { %v3695_v34 = vpack.c.bf16 %v3647_v59, %v3643_v30  ;;  %v3697_v51 = vpack.c.bf16 %v3649_v61, %v3645_v25 }
 0xef3   : > { %v3696_v11 = vpack.c.bf16 %v3648_v37, %v3644_v29  ;;  %v3698_v16 = vpack.c.bf16 %v3650_v28, %v3646_v49  ;;  %v3467_v15 = vpop.f32.mrb[80].mxu1  ;;  %v3580_v9 = vpop.f32.mrb[96].mxu0  ;;  %5399 = vmatpush3.bf16.msra.mxu1 %v8152_v40 }
 0xef4   : > { %v3468_v60 = vadd.f32 %v3467_v15, %v8175_v13  ;;  %v3581_v3 = vadd.f32 %v3580_v9, %v8177_v20  ;;  %v3469_v63 = vpop.f32.mrb[81].mxu1  ;;  %v3582_v47 = vpop.f32.mrb[97].mxu0  ;;  %5392 = vmatprep.subr.bf16.mxu1 %v8156_v1 }
 0xef5   : > { %v3470_v7 = vadd.f32 %v3469_v63, %v8179_v53  ;;  %v3583_v38 = vadd.f32 %v3582_v47, %v8181_v52  ;;  %v3471_v4 = vpop.f32.mrb[82].mxu1  ;;  %v3584_v31 = vpop.f32.mrb[98].mxu0  ;;  %4034 = vmatprep.mubr.bf16.mxu1 %v3696_v11  ;;  %4131 = vmatprep.mubr.bf16.mxu0 %v3698_v16 }
 0xef6   : > { %v3472_v6 = vadd.f32 %v3471_v4, %v8175_v13  ;;  %v3585_v40 = vadd.f32 %v3584_v31, %v8177_v20  ;;  %v3473_v48 = vpop.f32.mrb[83].mxu1  ;;  %v3586_v0 = vpop.f32.mrb[99].mxu0  ;;  %4035 = vmatmul.mubr.bf16.gmra.mrb[108].mxu1 %v3695_v34  ;;  %4132 = vmatmul.mubr.bf16.gmra.mrb[124].mxu0 %v3697_v51  ;;  %v3651_v18 = vmax.f32 %v3468_v60, 0.0  ;;  %v3653_v21 = vmax.f32 %v3581_v3, 0.0 }
 0xef7   : > { %v3474_v62 = vadd.f32 %v3473_v48, %v8179_v53  ;;  %v3587_v1 = vadd.f32 %v3586_v0, %v8181_v52  ;;  %5400 = vmatpush3.bf16.msra.mxu1 %v8159_v39  ;;  %v3652_v58 = vmax.f32 %v3470_v7, 0.0  ;;  %v3654_v42 = vmax.f32 %v3583_v38, 0.0 }
 0xef8   : > { %v3655_v43 = vmax.f32 %v3472_v6, 0.0  ;;  %v3657_v17 = vmax.f32 %v3585_v40, 0.0  ;;  %5393 = vmatprep.subr.bf16.mxu1 %v8165_v46 }
 0xef9   : > { %v3656_v8 = vmax.f32 %v3474_v62, 0.0  ;;  %v3658_v24 = vmax.f32 %v3587_v1, 0.0 }
 0xefa   : > { %v3699_v36 = vpack.c.bf16 %v3655_v43, %v3651_v18  ;;  %v3701_v10 = vpack.c.bf16 %v3657_v17, %v3653_v21 }
 0xefb   : > { %v3700_v26 = vpack.c.bf16 %v3656_v8, %v3652_v58  ;;  %v3702_v23 = vpack.c.bf16 %v3658_v24, %v3654_v42  ;;  %v3477_v55 = vpop.f32.mrb[84].mxu1  ;;  %v3590_v30 = vpop.f32.mrb[100].mxu0  ;;  %5401 = vmatpush3.bf16.msra.mxu1 %v8169_v56 }
 0xefc   : > { %v3478_v39 = vadd.f32 %v3477_v55, %v8175_v13  ;;  %v3591_v25 = vadd.f32 %v3590_v30, %v8177_v20  ;;  %v3479_v59 = vpop.f32.mrb[85].mxu1  ;;  %v3592_v61 = vpop.f32.mrb[101].mxu0 }
 0xefd   : > { %v3480_v46 = vadd.f32 %v3479_v59, %v8179_v53  ;;  %v3593_v29 = vadd.f32 %v3592_v61, %v8181_v52  ;;  %v3481_v49 = vpop.f32.mrb[86].mxu1  ;;  %v3594_v37 = vpop.f32.mrb[102].mxu0  ;;  %4042 = vmatprep.mubr.bf16.mxu1 %v3700_v26  ;;  %4139 = vmatprep.mubr.bf16.mxu0 %v3702_v23 }
 0xefe   : > { %v3482_v28 = vadd.f32 %v3481_v49, %v8175_v13  ;;  %v3595_v34 = vadd.f32 %v3594_v37, %v8177_v20  ;;  %v3483_v51 = vpop.f32.mrb[87].mxu1  ;;  %v3596_v56 = vpop.f32.mrb[103].mxu0  ;;  %4043 = vmatmul.mubr.bf16.gmra.mrb[112].mxu1 %v3699_v36  ;;  %4140 = vmatmul.mubr.bf16.gmra.mrb[128].mxu0 %v3701_v10  ;;  %v3659_v15 = vmax.f32 %v3478_v39, 0.0  ;;  %v3661_v9 = vmax.f32 %v3591_v25, 0.0 }
 0xeff   : > { %v3484_v11 = vadd.f32 %v3483_v51, %v8179_v53  ;;  %v3597_v16 = vadd.f32 %v3596_v56, %v8181_v52  ;;  %v3660_v63 = vmax.f32 %v3480_v46, 0.0  ;;  %v3662_v47 = vmax.f32 %v3593_v29, 0.0 }
 0xf00   : > { %v3663_v60 = vmax.f32 %v3482_v28, 0.0  ;;  %v3665_v3 = vmax.f32 %v3595_v34, 0.0 }
 0xf01   : > { %v3664_v7 = vmax.f32 %v3484_v11, 0.0  ;;  %v3666_v38 = vmax.f32 %v3597_v16, 0.0 }
 0xf02   : > { %v3703_v4 = vpack.c.bf16 %v3663_v60, %v3659_v15  ;;  %v3705_v31 = vpack.c.bf16 %v3665_v3, %v3661_v9 }
 0xf03   : > { %v3704_v6 = vpack.c.bf16 %v3664_v7, %v3660_v63  ;;  %v3706_v40 = vpack.c.bf16 %v3666_v38, %v3662_v47 }
 0xf05   : > { %4050 = vmatprep.mubr.bf16.mxu1 %v3704_v6  ;;  %4147 = vmatprep.mubr.bf16.mxu0 %v3706_v40 }
 0xf06   : > { %v3487_v48 = vpop.f32.mrb[88].mxu1  ;;  %v3600_v0 = vpop.f32.mrb[104].mxu0  ;;  %4051 = vmatmul.mubr.bf16.gmra.mrb[116].mxu1 %v3703_v4  ;;  %4148 = vmatmul.mubr.bf16.gmra.mrb[132].mxu0 %v3705_v31 }
 0xf07   : > { %v3488_v62 = vadd.f32 %v3487_v48, %v8175_v13  ;;  %v3601_v1 = vadd.f32 %v3600_v0, %v8177_v20  ;;  %v3489_v18 = vpop.f32.mrb[89].mxu1  ;;  %v3602_v21 = vpop.f32.mrb[105].mxu0 }
 0xf08   : > { %v3490_v43 = vadd.f32 %v3489_v18, %v8179_v53  ;;  %v3603_v17 = vadd.f32 %v3602_v21, %v8181_v52  ;;  %v3491_v58 = vpop.f32.mrb[90].mxu1  ;;  %v3604_v42 = vpop.f32.mrb[106].mxu0 }
 0xf09   : > { %v3492_v8 = vadd.f32 %v3491_v58, %v8175_v13  ;;  %v3605_v24 = vadd.f32 %v3604_v42, %v8177_v20  ;;  %v3493_v36 = vpop.f32.mrb[91].mxu1  ;;  %v3606_v10 = vpop.f32.mrb[107].mxu0  ;;  %v3667_v55 = vmax.f32 %v3488_v62, 0.0  ;;  %v3669_v30 = vmax.f32 %v3601_v1, 0.0 }
 0xf0a   : > { %v3494_v26 = vadd.f32 %v3493_v36, %v8179_v53  ;;  %v3607_v23 = vadd.f32 %v3606_v10, %v8181_v52  ;;  %v3668_v59 = vmax.f32 %v3490_v43, 0.0  ;;  %v3670_v61 = vmax.f32 %v3603_v17, 0.0 }
 0xf0b   : > { %v3671_v39 = vmax.f32 %v3492_v8, 0.0  ;;  %v3673_v25 = vmax.f32 %v3605_v24, 0.0  ;;  %v8267_v8 = vld [vmem:[%s669_s24] ss:$0 sm:$0xff] }
 0xf0c   : > { %v3672_v46 = vmax.f32 %v3494_v26, 0.0  ;;  %v3674_v29 = vmax.f32 %v3607_v23, 0.0 }
 0xf0d   : > { %v3707_v49 = vpack.c.bf16 %v3671_v39, %v3667_v55  ;;  %v3709_v37 = vpack.c.bf16 %v3673_v25, %v3669_v30 }
 0xf0e   : > { %v3708_v28 = vpack.c.bf16 %v3672_v46, %v3668_v59  ;;  %v3710_v34 = vpack.c.bf16 %v3674_v29, %v3670_v61  ;;  %v3497_v51 = vpop.f32.mrb[92].mxu1  ;;  %v3610_v56 = vpop.f32.mrb[108].mxu0 }
 0xf0f   : > { %v3498_v11 = vadd.f32 %v3497_v51, %v8175_v13  ;;  %v3611_v16 = vadd.f32 %v3610_v56, %v8177_v20  ;;  %v3499_v15 = vpop.f32.mrb[93].mxu1  ;;  %v3612_v9 = vpop.f32.mrb[109].mxu0 }
 0xf10   : > { %v3500_v60 = vadd.f32 %v3499_v15, %v8179_v53  ;;  %v3613_v3 = vadd.f32 %v3612_v9, %v8181_v52  ;;  %v3501_v63 = vpop.f32.mrb[94].mxu1  ;;  %v3614_v47 = vpop.f32.mrb[110].mxu0  ;;  %4058 = vmatprep.mubr.bf16.mxu1 %v3708_v28 }
 0xf11   : > { %v3502_v7 = vadd.f32 %v3501_v63, %v8175_v13  ;;  %v3615_v38 = vadd.f32 %v3614_v47, %v8177_v20  ;;  %v3503_v4 = vpop.f32.mrb[95].mxu1  ;;  %v3616_v31 = vpop.f32.mrb[111].mxu0  ;;  %4059 = vmatmul.mubr.bf16.gmra.mrb[120].mxu1 %v3707_v49  ;;  %v3675_v48 = vmax.f32 %v3498_v11, 0.0  ;;  %v3677_v0 = vmax.f32 %v3611_v16, 0.0 }
 0xf12   : > { %v3504_v6 = vadd.f32 %v3503_v4, %v8179_v53  ;;  %v3617_v40 = vadd.f32 %v3616_v31, %v8181_v52  ;;  %v3676_v18 = vmax.f32 %v3500_v60, 0.0  ;;  %v3678_v21 = vmax.f32 %v3613_v3, 0.0 }
 0xf13   : > { %v3679_v62 = vmax.f32 %v3502_v7, 0.0  ;;  %v3681_v1 = vmax.f32 %v3615_v38, 0.0 }
 0xf14   : > { %v3680_v43 = vmax.f32 %v3504_v6, 0.0  ;;  %v3682_v17 = vmax.f32 %v3617_v40, 0.0 }
 0xf15   : > { %v3711_v58 = vpack.c.bf16 %v3679_v62, %v3675_v48  ;;  %v3713_v13 = vpack.c.bf16 %v3681_v1, %v3677_v0 }
 0xf16   : > { %v3712_v42 = vpack.c.bf16 %v3680_v43, %v3676_v18  ;;  %v3714_v20 = vpack.c.bf16 %v3682_v17, %v3678_v21 }
 0xf18   : > { %4066 = vmatprep.mubr.bf16.mxu1 %v3712_v42 }
 0xf19   : > { %4067 = vmatmul.mubr.bf16.gmra.mrb[124].mxu1 %v3711_v58 }
 0xf1a   : > { %4155 = vmatprep.mubr.bf16.mxu1 %v3710_v34 }
 0xf21   : > { %4156 = vmatmul.mubr.bf16.vlgmr.msra.gmra.mrb[128].mxu1 %v3709_v37 }
 0xf22   : > { %4163 = vmatprep.mubr.bf16.mxu1 %v3714_v20 }
 0xf29   : > { %4164 = vmatmul.mubr.bf16.gmra.mrb[132].mxu1 %v3713_v13 }
 0xfb1   : > { %v4986_v53 = vpop.f32.mrb[96].mxu1  ;;  %v5050_v52 = vpop.f32.mrb[112].mxu0 }
 0xfb2   : > { %v4987_v24 = vpop.f32.mrb[97].mxu1  ;;  %v5051_v36 = vpop.f32.mrb[113].mxu0 }
 0xfb3   : > { %v4988_v10 = vadd.f32 %v4987_v24, %v4986_v53  ;;  %v5052_v26 = vadd.f32 %v5051_v36, %v5050_v52  ;;  %v4989_v23 = vpop.f32.mrb[98].mxu1  ;;  %v5053_v55 = vpop.f32.mrb[114].mxu0 }
 0xfb4   : > { %v4990_v30 = vpop.f32.mrb[99].mxu1  ;;  %v5054_v39 = vpop.f32.mrb[115].mxu0 }
 0xfb5   : > { %v4013_v25 = vadd.f32 %v4988_v10, %v8267_v8  ;;  %v4991_v59 = vadd.f32 %v4990_v30, %v4989_v23  ;;  %v5055_v61 = vadd.f32 %v5054_v39, %v5053_v55 }
 0xfb7   : > { %v4110_v46 = vadd.f32 %v5052_v26, %v4013_v25  ;;  %v4016_v29 = vadd.f32 %v4991_v59, %v8267_v8 }
 0xfb9   : > { %v4113_v49 = vadd.f32 %v5055_v61, %v4016_v29  ;;  %v4992_v37 = vpop.f32.mrb[100].mxu1  ;;  %v5056_v28 = vpop.f32.mrb[116].mxu0  ;;  %v8272_v34 = vadd.f32 %v4110_v46, %v7993_v22 }
 0xfba   : > { %v4993_v51 = vpop.f32.mrb[101].mxu1  ;;  %v5057_v56 = vpop.f32.mrb[117].mxu0 }
 0xfbb   : > { %v4994_v11 = vadd.f32 %v4993_v51, %v4992_v37  ;;  %v5058_v16 = vadd.f32 %v5057_v56, %v5056_v28  ;;  %v4995_v15 = vpop.f32.mrb[102].mxu1  ;;  %v5059_v9 = vpop.f32.mrb[118].mxu0  ;;  %4190 = vadd.xlane.f32.xlu0 %v8272_v34  ;;  %v8276_v60 = vadd.f32 %v4113_v49, %v7996_v27 }
 0xfbc   : > { %v4996_v3 = vpop.f32.mrb[103].mxu1  ;;  %v5060_v63 = vpop.f32.mrb[119].mxu0 }
 0xfbd   : > { %v4021_v47 = vadd.f32 %v4994_v11, %v8267_v8  ;;  %v4997_v7 = vadd.f32 %v4996_v3, %v4995_v15  ;;  %v5061_v38 = vadd.f32 %v5060_v63, %v5059_v9  ;;  %4192 = vadd.xlane.f32.xlu1 %v8276_v60 }
 0xfbf   : > { %v4118_v22 = vadd.f32 %v5058_v16, %v4021_v47  ;;  %v4024_v4 = vadd.f32 %v4997_v7, %v8267_v8 }
 0xfc1   : > { %v4121_v31 = vadd.f32 %v5061_v38, %v4024_v4  ;;  %v4998_v6 = vpop.f32.mrb[104].mxu1  ;;  %v5062_v40 = vpop.f32.mrb[120].mxu0  ;;  %v8282_v48 = vadd.f32 %v4118_v22, %v8028_v54 }
 0xfc2   : > { %v4999_v0 = vpop.f32.mrb[105].mxu1  ;;  %v5063_v27 = vpop.f32.mrb[121].mxu0 }
 0xfc3   : > { %v5000_v62 = vadd.f32 %v4999_v0, %v4998_v6  ;;  %v5064_v1 = vadd.f32 %v5063_v27, %v5062_v40  ;;  %v5001_v18 = vpop.f32.mrb[106].mxu1  ;;  %v5065_v21 = vpop.f32.mrb[122].mxu0  ;;  %4194 = vadd.xlane.f32.xlu0 %v8282_v48  ;;  %v8286_v43 = vadd.f32 %v4121_v31, %v8015_v50 }
 0xfc4   : > { %v5002_v17 = vpop.f32.mrb[107].mxu1  ;;  %v5066_v58 = vpop.f32.mrb[123].mxu0 }
 0xfc5   : > { %v4029_v13 = vadd.f32 %v5000_v62, %v8267_v8  ;;  %v5003_v42 = vadd.f32 %v5002_v17, %v5001_v18  ;;  %v5067_v20 = vadd.f32 %v5066_v58, %v5065_v21  ;;  %4196 = vadd.xlane.f32.xlu1 %v8286_v43 }
 0xfc7   : > { %v4126_v54 = vadd.f32 %v5064_v1, %v4029_v13  ;;  %v4032_v53 = vadd.f32 %v5003_v42, %v8267_v8 }
 0xfc9   : > { %v4129_v52 = vadd.f32 %v5067_v20, %v4032_v53  ;;  %v5004_v24 = vpop.f32.mrb[108].mxu1  ;;  %v5068_v36 = vpop.f32.mrb[124].mxu0  ;;  %v8292_v10 = vadd.f32 %v4126_v54, %v8059_v41 }
 0xfca   : > { %v5005_v26 = vpop.f32.mrb[109].mxu1  ;;  %v5069_v50 = vpop.f32.mrb[125].mxu0 }
 0xfcb   : > { %v5006_v23 = vadd.f32 %v5005_v26, %v5004_v24  ;;  %v5070_v55 = vadd.f32 %v5069_v50, %v5068_v36  ;;  %v5007_v30 = vpop.f32.mrb[110].mxu1  ;;  %v5071_v39 = vpop.f32.mrb[126].mxu0  ;;  %4198 = vadd.xlane.f32.xlu0 %v8292_v10  ;;  %v8296_v25 = vadd.f32 %v4129_v52, %v8062_v19 }
 0xfcc   : > { %v5008_v59 = vpop.f32.mrb[111].mxu1  ;;  %v5072_v61 = vpop.f32.mrb[127].mxu0 }
 0xfcd   : > { %v4037_v46 = vadd.f32 %v5006_v23, %v8267_v8  ;;  %v5009_v29 = vadd.f32 %v5008_v59, %v5007_v30  ;;  %v5073_v49 = vadd.f32 %v5072_v61, %v5071_v39  ;;  %4200 = vadd.xlane.f32.xlu1 %v8296_v25 }
 0xfcf   : > { %v4134_v41 = vadd.f32 %v5070_v55, %v4037_v46  ;;  %v4040_v37 = vadd.f32 %v5009_v29, %v8267_v8 }
 0xfd1   : > { %v4137_v28 = vadd.f32 %v5073_v49, %v4040_v37  ;;  %v5010_v51 = vpop.f32.mrb[112].mxu1  ;;  %v5074_v56 = vpop.f32.mrb[128].mxu0  ;;  %v8302_v11 = vadd.f32 %v4134_v41, %v8090_v33 }
 0xfd2   : > { %v5011_v16 = vpop.f32.mrb[113].mxu1  ;;  %v5075_v19 = vpop.f32.mrb[129].mxu0 }
 0xfd3   : > { %v5012_v15 = vadd.f32 %v5011_v16, %v5010_v51  ;;  %v5076_v9 = vadd.f32 %v5075_v19, %v5074_v56  ;;  %v5013_v3 = vpop.f32.mrb[114].mxu1  ;;  %v5077_v63 = vpop.f32.mrb[130].mxu0  ;;  %4202 = vadd.xlane.f32.xlu0 %v8302_v11  ;;  %v8306_v47 = vadd.f32 %v4137_v28, %v8083_v35 }
 0xfd4   : > { %v5014_v7 = vpop.f32.mrb[115].mxu1  ;;  %v5078_v38 = vpop.f32.mrb[131].mxu0 }
 0xfd5   : > { %v4045_v22 = vadd.f32 %v5012_v15, %v8267_v8  ;;  %v5015_v4 = vadd.f32 %v5014_v7, %v5013_v3  ;;  %v5079_v31 = vadd.f32 %v5078_v38, %v5077_v63  ;;  %4204 = vadd.xlane.f32.xlu1 %v8306_v47 }
 0xfd7   : > { %v4142_v33 = vadd.f32 %v5076_v9, %v4045_v22  ;;  %v4048_v6 = vadd.f32 %v5015_v4, %v8267_v8 }
 0xfd9   : > { %v4145_v40 = vadd.f32 %v5079_v31, %v4048_v6  ;;  %v5016_v0 = vpop.f32.mrb[116].mxu1  ;;  %v5080_v27 = vpop.f32.mrb[132].mxu0  ;;  %v8312_v62 = vadd.f32 %v4142_v33, %v8102_v32 }
 0xfda   : > { %v5017_v1 = vpop.f32.mrb[117].mxu1  ;;  %v5081_v35 = vpop.f32.mrb[133].mxu0 }
 0xfdb   : > { %v5018_v18 = vadd.f32 %v5017_v1, %v5016_v0  ;;  %v5082_v21 = vadd.f32 %v5081_v35, %v5080_v27  ;;  %v5019_v17 = vpop.f32.mrb[118].mxu1  ;;  %v5083_v58 = vpop.f32.mrb[134].mxu0  ;;  %4206 = vadd.xlane.f32.xlu0 %v8312_v62  ;;  %v8316_v13 = vadd.f32 %v4145_v40, %v8106_v2 }
 0xfdc   : > { %v5020_v42 = vpop.f32.mrb[119].mxu1  ;;  %v5084_v20 = vpop.f32.mrb[135].mxu0 }
 0xfdd   : > { %v4053_v54 = vadd.f32 %v5018_v18, %v8267_v8  ;;  %v5021_v53 = vadd.f32 %v5020_v42, %v5019_v17  ;;  %v5085_v52 = vadd.f32 %v5084_v20, %v5083_v58  ;;  %4208 = vadd.xlane.f32.xlu1 %v8316_v13 }
 0xfdf   : > { %v4150_v32 = vadd.f32 %v5082_v21, %v4053_v54  ;;  %v4056_v24 = vadd.f32 %v5021_v53, %v8267_v8 }
 0xfe1   : > { %v4153_v36 = vadd.f32 %v5085_v52, %v4056_v24  ;;  %v8322_v26 = vadd.f32 %v4150_v32, %v8119_v45 }
 0xfe3   : > { %4210 = vadd.xlane.f32.xlu0 %v8322_v26  ;;  %v8326_v2 = vadd.f32 %v4153_v36, %v8116_v57 }
 0xfe4   : > { %v5022_v50 = vpop.f32.mrb[120].mxu1 }
 0xfe5   : > { %v5023_v23 = vpop.f32.mrb[121].mxu1  ;;  %4212 = vadd.xlane.f32.xlu1 %v8326_v2 }
 0xfe6   : > { %v5024_v55 = vadd.f32 %v5023_v23, %v5022_v50  ;;  %v5025_v30 = vpop.f32.mrb[122].mxu1 }
 0xfe7   : > { %v5026_v39 = vpop.f32.mrb[123].mxu1 }
 0xfe8   : > { %v4061_v59 = vadd.f32 %v5024_v55, %v8267_v8  ;;  %v5027_v61 = vadd.f32 %v5026_v39, %v5025_v30 }
 0xfea   : > { %v4064_v46 = vadd.f32 %v5027_v61, %v8267_v8 }
 0xfec   : > { %v5028_v29 = vpop.f32.mrb[124].mxu1 }
 0xfed   : > { %v5029_v45 = vpop.f32.mrb[125].mxu1 }
 0xfee   : > { %v5030_v49 = vadd.f32 %v5029_v45, %v5028_v29  ;;  %v5031_v41 = vpop.f32.mrb[126].mxu1 }
 0xfef   : > { %v5032_v37 = vpop.f32.mrb[127].mxu1 }
 0xff0   : > { %v4069_v57 = vadd.f32 %v5030_v49, %v8267_v8  ;;  %v5033_v28 = vadd.f32 %v5032_v37, %v5031_v41 }
 0xff2   : > { %v4072_v51 = vadd.f32 %v5033_v28, %v8267_v8 }
 0xff4   : > { %v5086_v56 = vpop.f32.mrb[128].mxu1 }
 0xff5   : > { %v5087_v16 = vpop.f32.mrb[129].mxu1 }
 0xff6   : > { %v5088_v19 = vadd.f32 %v5087_v16, %v5086_v56  ;;  %v5089_v15 = vpop.f32.mrb[130].mxu1 }
 0xff7   : > { %v5090_v9 = vpop.f32.mrb[131].mxu1 }
 0xff8   : > { %v4158_v3 = vadd.f32 %v5088_v19, %v4061_v59  ;;  %v5091_v63 = vadd.f32 %v5090_v9, %v5089_v15 }
 0xffa   : > { %v4161_v7 = vadd.f32 %v5091_v63, %v4064_v46  ;;  %v8334_v38 = vadd.f32 %v4158_v3, %v8130_v5 }
 0xffc   : > { %v5092_v22 = vpop.f32.mrb[132].mxu1  ;;  %4214 = vadd.xlane.f32.xlu0 %v8334_v38  ;;  %v8338_v4 = vadd.f32 %v4161_v7, %v8133_v44 }
 0xffd   : > { %v5093_v31 = vpop.f32.mrb[133].mxu1 }
 0xffe   : > { %v5094_v33 = vadd.f32 %v5093_v31, %v5092_v22  ;;  %v5095_v8 = vpop.f32.mrb[134].mxu1  ;;  %4216 = vadd.xlane.f32.xlu1 %v8338_v4 }
 0xfff   : > { %v5096_v6 = vpop.f32.mrb[135].mxu1 }
0x1000   : > { %v4166_v40 = vadd.f32 %v5094_v33, %v4069_v57  ;;  %v5097_v0 = vadd.f32 %v5096_v6, %v5095_v8 }
0x1002   : > { %v4169_v27 = vadd.f32 %v5097_v0, %v4072_v51  ;;  %v8342_v1 = vadd.f32 %v4166_v40, %v8147_v12 }
0x1004   : > { %4218 = vadd.xlane.f32.xlu0 %v8342_v1  ;;  %v8346_v5 = vadd.f32 %v4169_v27, %v8144_v14 }
0x1006   : > { %4220 = vadd.xlane.f32.xlu1 %v8346_v5 }
0x1048   : > { %v4191_v44 = vpop.xlane.xlu0 %4190 }
0x1049   : > { %v4222_v35 = vmul.f32 0.0078125, %v4191_v44 }
0x104a   : > { %v4193_v18 = vpop.xlane.xlu1 %4192 }
0x104b   : > { %v8350_v21 = vsub.f32 %v8272_v34, %v4222_v35  ;;  %v4223_v17 = vmul.f32 0.0078125, %v4193_v18 }
0x104d   : > { %v8353_v58 = vsub.f32 %v8276_v60, %v4223_v17  ;;  %v4254_v12 = vmul.f32 %v8350_v21, %v8350_v21 }
0x104f   : > { %4270 = vadd.xlane.f32.xlu0 %v4254_v12  ;;  %v4255_v14 = vmul.f32 %v8353_v58, %v8353_v58 }
0x1050   : > { %v4195_v42 = vpop.xlane.xlu0 %4194 }
0x1051   : > { %v4224_v20 = vmul.f32 0.0078125, %v4195_v42  ;;  %4272 = vadd.xlane.f32.xlu1 %v4255_v14 }
0x1052   : > { %v4197_v54 = vpop.xlane.xlu1 %4196 }
0x1053   : > { %v8360_v53 = vsub.f32 %v8282_v48, %v4224_v20  ;;  %v4225_v34 = vmul.f32 0.0078125, %v4197_v54 }
0x1055   : > { %v8363_v52 = vsub.f32 %v8286_v43, %v4225_v34  ;;  %v4256_v60 = vmul.f32 %v8360_v53, %v8360_v53 }
0x1057   : > { %4274 = vadd.xlane.f32.xlu0 %v4256_v60  ;;  %v4257_v32 = vmul.f32 %v8363_v52, %v8363_v52 }
0x1058   : > { %v4199_v24 = vpop.xlane.xlu0 %4198 }
0x1059   : > { %v4226_v36 = vmul.f32 0.0078125, %v4199_v24  ;;  %4276 = vadd.xlane.f32.xlu1 %v4257_v32 }
0x105a   : > { %v4201_v50 = vpop.xlane.xlu1 %4200 }
0x105b   : > { %v8370_v23 = vsub.f32 %v8292_v10, %v4226_v36  ;;  %v4227_v48 = vmul.f32 0.0078125, %v4201_v50  ;;  %v8434_v36 = vld [vmem:[%s672_s19] ss:$0 sm:$0xff]  ;;  %s4825_s19 = sshll.u32 %s8694_s20, 11 }
0x105c   : > { %s8509_s8 = scalar_lea.hbm %s8695_s6, %s4825_s19 }
0x105d   : > { %v8373_v55 = vsub.f32 %v8296_v25, %v4227_v48  ;;  %v4258_v43 = vmul.f32 %v8370_v23, %v8370_v23 }
0x105f   : > { %4278 = vadd.xlane.f32.xlu0 %v4258_v43  ;;  %v4259_v30 = vmul.f32 %v8373_v55, %v8373_v55 }
0x1060   : > { %v4203_v39 = vpop.xlane.xlu0 %4202 }
0x1061   : > { %v4228_v59 = vmul.f32 0.0078125, %v4203_v39  ;;  %4280 = vadd.xlane.f32.xlu1 %v4259_v30  ;;  %v8442_v30 = vld [vmem:[%s675_s16] ss:$0 sm:$0xff]  ;;  %s4456_s16 = sshll.u32 %s6703_s15, 4  ;;  %s8511_s16 = int_to_ptr.vmem [resolvable:$true] %s4456_s16 }
0x1062   : > { %v4205_v61 = vpop.xlane.xlu1 %4204  ;;  %s6108_s29 = scalar_lea.vmem %s8511_s16, 2048  ;;  %p6115_p10 = scmp.lt.s32.totalorder %s8511_s16, %s6113_s7 }
0x1063   : > { %v8380_v46 = vsub.f32 %v8302_v11, %v4228_v59  ;;  %v4229_v10 = vmul.f32 0.0078125, %v4205_v61  ;;  %p6109_p2 = scmp.ne.s32.totalorder %s8511_s16, %s6108_s29  ;;  %p6116_p13 = scmp.lt.s32.totalorder %s6114_s27, %s6108_s29 }
0x1065   : > { %v8383_v29 = vsub.f32 %v8306_v47, %v4229_v10  ;;  %v4260_v25 = vmul.f32 %v8380_v46, %v8380_v46  ;;  %p6110_p3 = pnand %p6109_p2, %p8696_p7  ;;  %p6117_p11 = por %p6116_p13, %p6115_p10 }
0x1067   : > { %4282 = vadd.xlane.f32.xlu0 %v4260_v25  ;;  %v4261_v45 = vmul.f32 %v8383_v29, %v8383_v29  ;;  %p6111_p0 = pneg %p6110_p3 }
0x1068   : > { %v4207_v49 = vpop.xlane.xlu0 %4206 }
0x1069   : > { %v4230_v41 = vmul.f32 0.0078125, %v4207_v49  ;;  %4284 = vadd.xlane.f32.xlu1 %v4261_v45  ;;  %p6118_p4 = pnand %p6117_p11, %p6111_p0 }
0x106a   : > { %v4209_v37 = vpop.xlane.xlu1 %4208 }
0x106b   : > { %v8390_v57 = vsub.f32 %v8312_v62, %v4230_v41  ;;  %v4231_v11 = vmul.f32 0.0078125, %v4209_v37 }
0x106d   : > { %v8393_v28 = vsub.f32 %v8316_v13, %v4231_v11  ;;  %v4262_v47 = vmul.f32 %v8390_v57, %v8390_v57 }
0x106f   : > { %4286 = vadd.xlane.f32.xlu0 %v4262_v47  ;;  %v4263_v51 = vmul.f32 %v8393_v28, %v8393_v28 }
0x1070   : > { %v4211_v56 = vpop.xlane.xlu0 %4210 }
0x1071   : > { %v4232_v16 = vmul.f32 0.0078125, %v4211_v56  ;;  %4288 = vadd.xlane.f32.xlu1 %v4263_v51 }
0x1072   : > { %v4213_v19 = vpop.xlane.xlu1 %4212 }
0x1073   : > { %v8400_v15 = vsub.f32 %v8322_v26, %v4232_v16  ;;  %v4233_v62 = vmul.f32 0.0078125, %v4213_v19 }
0x1075   : > { %v8403_v9 = vsub.f32 %v8326_v2, %v4233_v62  ;;  %v4264_v13 = vmul.f32 %v8400_v15, %v8400_v15 }
0x1077   : > { %4290 = vadd.xlane.f32.xlu0 %v4264_v13  ;;  %v4265_v3 = vmul.f32 %v8403_v9, %v8403_v9 }
0x1079   : > { %4292 = vadd.xlane.f32.xlu1 %v4265_v3 }
0x1089   : > { %v4215_v63 = vpop.xlane.xlu0 %4214 }
0x108a   : > { %v4234_v7 = vmul.f32 0.0078125, %v4215_v63 }
0x108b   : > { %v4217_v22 = vpop.xlane.xlu1 %4216 }
0x108c   : > { %v8410_v31 = vsub.f32 %v8334_v38, %v4234_v7  ;;  %v4235_v26 = vmul.f32 0.0078125, %v4217_v22 }
0x108e   : > { %v8413_v33 = vsub.f32 %v8338_v4, %v4235_v26  ;;  %v4266_v2 = vmul.f32 %v8410_v31, %v8410_v31 }
0x1090   : > { %4294 = vadd.xlane.f32.xlu0 %v4266_v2  ;;  %v4267_v8 = vmul.f32 %v8413_v33, %v8413_v33 }
0x1091   : > { %v4219_v6 = vpop.xlane.xlu0 %4218 }
0x1092   : > { %v4236_v40 = vmul.f32 0.0078125, %v4219_v6  ;;  %4296 = vadd.xlane.f32.xlu1 %v4267_v8 }
0x1093   : > { %v4221_v0 = vpop.xlane.xlu1 %4220 }
0x1094   : > { %v8420_v27 = vsub.f32 %v8342_v1, %v4236_v40  ;;  %v4237_v38 = vmul.f32 0.0078125, %v4221_v0 }
0x1096   : > { %v8423_v44 = vsub.f32 %v8346_v5, %v4237_v38  ;;  %v4268_v4 = vmul.f32 %v8420_v27, %v8420_v27 }
0x1098   : > { %4298 = vadd.xlane.f32.xlu0 %v4268_v4  ;;  %v4269_v35 = vmul.f32 %v8423_v44, %v8423_v44 }
0x109a   : > { %4300 = vadd.xlane.f32.xlu1 %v4269_v35 }
0x10dc   : > { %v4271_v18 = vpop.xlane.xlu0 %4270 }
0x10dd   : > { %v4302_v17 = vmul.f32 0.0078125, %v4271_v18 }
0x10de   : > { %v4273_v12 = vpop.xlane.xlu1 %4272 }
0x10df   : > { %v4318_v14 = vadd.f32 1e-05, %v4302_v17  ;;  %v4303_v42 = vmul.f32 0.0078125, %v4273_v12 }
0x10e1   : > { %5939 = vrsqrt.f32 %v4318_v14  ;;  %v4319_v1 = vadd.f32 1e-05, %v4303_v42 }
0x10e3   : > { %5941 = vrsqrt.f32 %v4319_v1 }
0x10e4   : > { %v4275_v5 = vpop.xlane.xlu0 %4274 }
0x10e5   : > { %v4304_v20 = vmul.f32 0.0078125, %v4275_v5 }
0x10e6   : > { %v4277_v54 = vpop.xlane.xlu1 %4276 }
0x10e7   : > { %v4320_v34 = vadd.f32 1e-05, %v4304_v20  ;;  %v4305_v60 = vmul.f32 0.0078125, %v4277_v54 }
0x10e9   : > { %5943 = vrsqrt.f32 %v4320_v34  ;;  %v4321_v32 = vadd.f32 1e-05, %v4305_v60 }
0x10eb   : > { %v5940_v24 = vpop.eup %5939  ;;  %5945 = vrsqrt.f32 %v4321_v32 }
0x10ec   : > { %v4350_v50 = vmul.f32 %v5940_v24, %v8350_v21  ;;  %v4279_v48 = vpop.xlane.xlu0 %4278 }
0x10ed   : > { %v5942_v43 = vpop.eup %5941  ;;  %v4306_v39 = vmul.f32 0.0078125, %v4279_v48 }
0x10ee   : > { %v4372_v59 = vmul.f32 %v8434_v36, %v4350_v50  ;;  %v4351_v61 = vmul.f32 %v5942_v43, %v8353_v58  ;;  %v4281_v10 = vpop.xlane.xlu1 %4280 }
0x10ef   : > { %v4322_v25 = vadd.f32 1e-05, %v4306_v39  ;;  %v4307_v45 = vmul.f32 0.0078125, %v4281_v10 }
0x10f0   : > { %v4394_v49 = vadd.f32 %v8442_v30, %v4372_v59  ;;  %v4373_v21 = vmul.f32 %v8434_v36, %v4351_v61 }
0x10f1   : > { %5947 = vrsqrt.f32 %v4322_v25  ;;  %v4323_v41 = vadd.f32 1e-05, %v4307_v45 }
0x10f2   : > { %4410 = vst [vmem:[#allocation2] sm:$0xff] %v4394_v49  ;;  %4426 = vst [vmem:[%s6703_s15] sm:$0xff] %v4394_v49  ;;  %v4395_v37 = vadd.f32 %v8442_v30, %v4373_v21 }
0x10f3   : > { %v5944_v11 = vpop.eup %5943  ;;  %5949 = vrsqrt.f32 %v4323_v41 }
0x10f4   : > { %4411 = vst [vmem:[#allocation2 + $0x8] sm:$0xff] %v4395_v37  ;;  %4427 = vst [vmem:[%s6703_s15 + $0x8] sm:$0xff] %v4395_v37  ;;  %v4352_v58 = vmul.f32 %v5944_v11, %v8360_v53  ;;  %v4283_v47 = vpop.xlane.xlu0 %4282 }
0x10f5   : > { %v5946_v51 = vpop.eup %5945  ;;  %v4308_v56 = vmul.f32 0.0078125, %v4283_v47 }
0x10f6   : > { %v4374_v16 = vmul.f32 %v8434_v36, %v4352_v58  ;;  %v4353_v19 = vmul.f32 %v5946_v51, %v8363_v52  ;;  %v4285_v62 = vpop.xlane.xlu1 %4284 }
0x10f7   : > { %v4324_v13 = vadd.f32 1e-05, %v4308_v56  ;;  %v4309_v3 = vmul.f32 0.0078125, %v4285_v62 }
0x10f8   : > { %v4396_v63 = vadd.f32 %v8442_v30, %v4374_v16  ;;  %v4375_v7 = vmul.f32 %v8434_v36, %v4353_v19 }
0x10f9   : > { %5951 = vrsqrt.f32 %v4324_v13  ;;  %v4325_v22 = vadd.f32 1e-05, %v4309_v3 }
0x10fa   : > { %4412 = vst [vmem:[#allocation2 + $0x10] sm:$0xff] %v4396_v63  ;;  %4428 = vst [vmem:[%s6703_s15 + $0x10] sm:$0xff] %v4396_v63  ;;  %v4397_v53 = vadd.f32 %v8442_v30, %v4375_v7 }
0x10fb   : > { %v5948_v26 = vpop.eup %5947  ;;  %5953 = vrsqrt.f32 %v4325_v22 }
0x10fc   : > { %4413 = vst [vmem:[#allocation2 + $0x18] sm:$0xff] %v4397_v53  ;;  %4429 = vst [vmem:[%s6703_s15 + $0x18] sm:$0xff] %v4397_v53  ;;  %v4354_v52 = vmul.f32 %v5948_v26, %v8370_v23  ;;  %v4287_v2 = vpop.xlane.xlu0 %4286 }
0x10fd   : > { %v5950_v8 = vpop.eup %5949  ;;  %v4310_v6 = vmul.f32 0.0078125, %v4287_v2 }
0x10fe   : > { %v4376_v40 = vmul.f32 %v8434_v36, %v4354_v52  ;;  %v4355_v0 = vmul.f32 %v5950_v8, %v8373_v55  ;;  %v4289_v38 = vpop.xlane.xlu1 %4288 }
0x10ff   : > { %v4326_v4 = vadd.f32 1e-05, %v4310_v6  ;;  %v4311_v35 = vmul.f32 0.0078125, %v4289_v38 }
0x1100   : > { %v4398_v18 = vadd.f32 %v8442_v30, %v4376_v40  ;;  %v4377_v17 = vmul.f32 %v8434_v36, %v4355_v0 }
0x1101   : > { %5955 = vrsqrt.f32 %v4326_v4  ;;  %v4327_v12 = vadd.f32 1e-05, %v4311_v35 }
0x1102   : > { %4414 = vst [vmem:[#allocation2 + $0x20] sm:$0xff] %v4398_v18  ;;  %4430 = vst [vmem:[%s6703_s15 + $0x20] sm:$0xff] %v4398_v18  ;;  %v4399_v23 = vadd.f32 %v8442_v30, %v4377_v17 }
0x1103   : > { %v5952_v14 = vpop.eup %5951  ;;  %5957 = vrsqrt.f32 %v4327_v12 }
0x1104   : > { %4415 = vst [vmem:[#allocation2 + $0x28] sm:$0xff] %v4399_v23  ;;  %4431 = vst [vmem:[%s6703_s15 + $0x28] sm:$0xff] %v4399_v23  ;;  %v4356_v55 = vmul.f32 %v5952_v14, %v8380_v46  ;;  %v4291_v42 = vpop.xlane.xlu0 %4290 }
0x1105   : > { %v5954_v1 = vpop.eup %5953  ;;  %v4312_v5 = vmul.f32 0.0078125, %v4291_v42 }
0x1106   : > { %v4378_v20 = vmul.f32 %v8434_v36, %v4356_v55  ;;  %v4357_v54 = vmul.f32 %v5954_v1, %v8383_v29  ;;  %v4293_v34 = vpop.xlane.xlu1 %4292 }
0x1107   : > { %v4328_v60 = vadd.f32 1e-05, %v4312_v5  ;;  %v4313_v32 = vmul.f32 0.0078125, %v4293_v34 }
0x1108   : > { %v4400_v24 = vadd.f32 %v8442_v30, %v4378_v20  ;;  %v4379_v50 = vmul.f32 %v8434_v36, %v4357_v54 }
0x1109   : > { %5959 = vrsqrt.f32 %v4328_v60  ;;  %v4329_v48 = vadd.f32 1e-05, %v4313_v32 }
0x110a   : > { %4416 = vst [vmem:[#allocation2 + $0x30] sm:$0xff] %v4400_v24  ;;  %4432 = vst [vmem:[%s6703_s15 + $0x30] sm:$0xff] %v4400_v24  ;;  %v4401_v46 = vadd.f32 %v8442_v30, %v4379_v50 }
0x110b   : > { %v5956_v43 = vpop.eup %5955  ;;  %5961 = vrsqrt.f32 %v4329_v48 }
0x110c   : > { %4417 = vst [vmem:[#allocation2 + $0x38] sm:$0xff] %v4401_v46  ;;  %4433 = vst [vmem:[%s6703_s15 + $0x38] sm:$0xff] %v4401_v46  ;;  %v4358_v29 = vmul.f32 %v5956_v43, %v8390_v57 }
0x110d   : > { %v5958_v39 = vpop.eup %5957 }
0x110e   : > { %v4380_v59 = vmul.f32 %v8434_v36, %v4358_v29  ;;  %v4359_v61 = vmul.f32 %v5958_v39, %v8393_v28 }
0x1110   : > { %v4402_v10 = vadd.f32 %v8442_v30, %v4380_v59  ;;  %v4381_v25 = vmul.f32 %v8434_v36, %v4359_v61 }
0x1112   : > { %4418 = vst [vmem:[#allocation2 + $0x40] sm:$0xff] %v4402_v10  ;;  %4434 = vst [vmem:[%s6703_s15 + $0x40] sm:$0xff] %v4402_v10  ;;  %v4403_v45 = vadd.f32 %v8442_v30, %v4381_v25 }
0x1113   : > { %v5960_v49 = vpop.eup %5959 }
0x1114   : > { %4419 = vst [vmem:[#allocation2 + $0x48] sm:$0xff] %v4403_v45  ;;  %4435 = vst [vmem:[%s6703_s15 + $0x48] sm:$0xff] %v4403_v45  ;;  %v4360_v57 = vmul.f32 %v5960_v49, %v8400_v15 }
0x1115   : > { %v5962_v21 = vpop.eup %5961 }
0x1116   : > { %v4382_v41 = vmul.f32 %v8434_v36, %v4360_v57  ;;  %v4361_v28 = vmul.f32 %v5962_v21, %v8403_v9 }
0x1118   : > { %v4404_v37 = vadd.f32 %v8442_v30, %v4382_v41  ;;  %v4383_v11 = vmul.f32 %v8434_v36, %v4361_v28 }
0x111a   : > { %4420 = vst [vmem:[#allocation2 + $0x50] sm:$0xff] %v4404_v37  ;;  %4436 = vst [vmem:[%s6703_s15 + $0x50] sm:$0xff] %v4404_v37  ;;  %v4405_v58 = vadd.f32 %v8442_v30, %v4383_v11 }
0x111c   : > { %4421 = vst [vmem:[#allocation2 + $0x58] sm:$0xff] %v4405_v58  ;;  %4437 = vst [vmem:[%s6703_s15 + $0x58] sm:$0xff] %v4405_v58 }
0x111d   : > { %v4295_v47 = vpop.xlane.xlu0 %4294 }
0x111e   : > { %v4314_v51 = vmul.f32 0.0078125, %v4295_v47 }
0x111f   : > { %v4297_v56 = vpop.xlane.xlu1 %4296 }
0x1120   : > { %v4330_v16 = vadd.f32 1e-05, %v4314_v51  ;;  %v4315_v15 = vmul.f32 0.0078125, %v4297_v56 }
0x1122   : > { %5963 = vrsqrt.f32 %v4330_v16  ;;  %v4331_v19 = vadd.f32 1e-05, %v4315_v15 }
0x1124   : > { %5965 = vrsqrt.f32 %v4331_v19 }
0x1125   : > { %v4299_v62 = vpop.xlane.xlu0 %4298 }
0x1126   : > { %v4316_v9 = vmul.f32 0.0078125, %v4299_v62 }
0x1127   : > { %v4301_v13 = vpop.xlane.xlu1 %4300 }
0x1128   : > { %v4332_v3 = vadd.f32 1e-05, %v4316_v9  ;;  %v4317_v63 = vmul.f32 0.0078125, %v4301_v13 }
0x112a   : > { %5967 = vrsqrt.f32 %v4332_v3  ;;  %v4333_v7 = vadd.f32 1e-05, %v4317_v63 }
0x112c   : > { %v5964_v22 = vpop.eup %5963  ;;  %5969 = vrsqrt.f32 %v4333_v7 }
0x112d   : > { %v4362_v53 = vmul.f32 %v5964_v22, %v8410_v31 }
0x112e   : > { %v5966_v26 = vpop.eup %5965 }
0x112f   : > { %v4384_v52 = vmul.f32 %v8434_v36, %v4362_v53  ;;  %v4363_v2 = vmul.f32 %v5966_v26, %v8413_v33 }
0x1131   : > { %v4406_v8 = vadd.f32 %v8442_v30, %v4384_v52  ;;  %v4385_v6 = vmul.f32 %v8434_v36, %v4363_v2 }
0x1133   : > { %4422 = vst [vmem:[#allocation2 + $0x60] sm:$0xff] %v4406_v8  ;;  %4438 = vst [vmem:[%s6703_s15 + $0x60] sm:$0xff] %v4406_v8  ;;  %v4407_v40 = vadd.f32 %v8442_v30, %v4385_v6 }
0x1134   : > { %v5968_v0 = vpop.eup %5967 }
0x1135   : > { %4423 = vst [vmem:[#allocation2 + $0x68] sm:$0xff] %v4407_v40  ;;  %4439 = vst [vmem:[%s6703_s15 + $0x68] sm:$0xff] %v4407_v40  ;;  %v4364_v31 = vmul.f32 %v5968_v0, %v8420_v27 }
0x1136   : > { %v5970_v38 = vpop.eup %5969 }
0x1137   : > { %v4386_v4 = vmul.f32 %v8434_v36, %v4364_v31  ;;  %v4365_v33 = vmul.f32 %v5970_v38, %v8423_v44 }
0x1139   : > { %v4408_v35 = vadd.f32 %v8442_v30, %v4386_v4  ;;  %v4387_v18 = vmul.f32 %v8434_v36, %v4365_v33 }
0x113b   : > { %4424 = vst [vmem:[#allocation2 + $0x70] sm:$0xff] %v4408_v35  ;;  %4440 = vst [vmem:[%s6703_s15 + $0x70] sm:$0xff] %v4408_v35  ;;  %v4409_v27 = vadd.f32 %v8442_v30, %v4387_v18 }
0x113d   : > { %4425 = vst [vmem:[#allocation2 + $0x78] sm:$0xff] %v4409_v27  ;;  %4441 = vst [vmem:[%s6703_s15 + $0x78] sm:$0xff] %v4409_v27 }
0x113e   : > { %6121 = shalt.err (!%p6118_p4)
}
0x113f   : > { %s6122_s15 = scalar_lea.hbm %s8509_s8, 2048  ;;  %s6126_s26 = scalar_lea.hbm %s8695_s6, 4096 }
0x1140   : > { %p6123_p9 = scmp.ne.s32.totalorder %s8509_s8, %s6122_s15  ;;  %p6127_p1 = scmp.lt.u32.totalorder %s8509_s8, %s8695_s6 }
0x1141   : > { %p6128_p8 = scmp.lt.u32.totalorder %s6126_s26, %s6122_s15  ;;  %p6130_p2 = scmp.lt.u32.totalorder %s6122_s15, %s8509_s8 }
0x1142   : > { %p6124_p5 = pnand %p6123_p9, %p8696_p7 }
0x1143   : > { %p6129_p6 = por %p6128_p8, %p6127_p1 }
0x1144   : > { %p6125_p12 = pneg %p6124_p5 }
0x1145   : > { %p6131_p3 = por %p6130_p2, %p6129_p6 }
0x1147   : > { %p6132_p0 = pnand %p6131_p3, %p6125_p12 }
0x1149   : > { %6135 = shalt.err (!%p6132_p0)
}
0x114a   : > { %s6255_s10 = smov 128   ;;  %s6256_s22 = smov 8  }
0x114b   : > { %5442 = dma.vmem_to_hbm [thread:$0]  (%p8696_p7), %s8511_s16, 2048, %s8509_s8, %s4443_s25, %s6255_s10, %s6255_s10, %s6256_s22  }
0x114c PF: > { %s8697_s21 = sld [smem:[#allocation19_spill]]  ;;  %s8698_s30 = sld [smem:[#allocation30_spill]] }
0x114d   : > { %p5462_p10 = scmp.ge.s32.totalorder %s6238_s13, 2 }
0x1152   : > { %s4471_s24 = sand.u32 1, %s8697_s21   ;;  %p8699_p13 = scmp.ne.s32.totalorder %s8698_s30, 0 }
0x1153   : > { %s4472_s1 = scalar_lea.sflag [#allocation6], %s4471_s24 }
0x1154   : > { %p5458_p11 = pnand %p5462_p10, %p8699_p13 }
0x1156   : > { %6193 = dma.done.wait (!%p5458_p11), %s4472_s1, 2048  }
0x1157   : > { %6195 = vsyncadd (!%p5458_p11), %s4472_s1, 4294965248  ;;  %s34_s13 = sadd.s32 1, %s6238_s13   ;;  %s8700_s21 = sld [smem:[#allocation17_spill]] }
0x1158   : > { %p31_p4 = scmp.ge.s32.totalorder %s34_s13, 6   ;;  %s8701_s22 = sld [smem:[#allocation18_spill]] }
0x1159   : > { %s8702_s23 = sld [smem:[#allocation27_spill]]  ;;  %s8703_s24 = sld [smem:[#allocation20_spill]] }
0x115a   : > { %s8704_s25 = sld [smem:[#allocation21_spill]]  ;;  %s8705_s26 = sld [smem:[#allocation29_spill]] }
0x115b   : > { %s8706_s27 = sld [smem:[#allocation24_spill]]  ;;  %s8707_s28 = sld [smem:[#allocation25_spill]] }
0x115c   : > { %s8708_s29 = sld [smem:[#allocation26_spill]]  ;;  %s8709_s30 = sld [smem:[#allocation28_spill]] }
0x115d   :  { %33 = sbr.rel (!%p31_p4) target bundleno = 27 (0x1b), region = 178 }
0x1164   :  { %4477 = vsyncpa [#allocation5], 1 }
0x1165   :  { %4479 = vsyncpa [#allocation5 + $0x1], 1 }
0x1166   :  { %4480 = vsyncpa [#allocation8], 1 }
0x1167   :  { %4482 = vsyncpa [#allocation8 + $0x1], 1 }
0x1168   :  { %4483 = vsyncpa [#allocation11], 1 }
0x1169   :  { %4485 = vsyncpa [#allocation11 + $0x1], 1 }
0x116a   :  { %4486 = vsyncpa [#allocation6], 1 }
0x116b   :  { %4488 = vsyncpa [#allocation6 + $0x1], 1 }

</bundles_post_ra>
